<compile_context>
chip_gen: v6e
topology: v6e:2x2x1
jax: 0.10.0
libtpu: 0.0.40
codegen_flags: <defaults>
</compile_context>

<pallas_src>
import functools

import numpy as np

import jax
import jax.numpy as jnp
from jax import lax
from jax.experimental import pallas as pl
from jax.experimental.pallas import tpu as pltpu


# ----------------------------------------------------------------------------
# Fused Pallas kernel: the whole network in one call.
# ----------------------------------------------------------------------------
def _make_encoder_kernel(plan):
    """plan: static tuple of ("gemm" | "tapconv", apply_relu) layer descriptors.

    Kernel refs (in order): [act0, <per-layer tensors...>, out].
      "gemm"    consumes (W, b)        : act <- act @ W + b
      "tapconv" consumes (T, Wst, b)   : act <- sum_t (T[t] @ act) @ Wst[t] + b
    All weights arrive as bf16 and are upcast in-VMEM; accumulation is f32.
    """

    def kernel(*refs):
        out_ref = refs[-1]
        in_refs = refs[:-1]
        f32 = jnp.float32

        # rows are (batch-major, spatial row-major); features on the lane axis.
        act = in_refs[0][...].astype(f32)
        idx = 1
        for kind, relu in plan:
            if kind == "gemm":
                w_ref, b_ref = in_refs[idx], in_refs[idx + 1]
                idx += 2
                act = jnp.dot(act, w_ref[...].astype(f32),
                              preferred_element_type=f32) + b_ref[...]
            else:  # "tapconv": 3x3 / stride-2 / pad-1 conv via tap-selection GEMMs
                t_ref, w_ref, b_ref = in_refs[idx], in_refs[idx + 1], in_refs[idx + 2]
                idx += 3
                acc = None
                for t in range(t_ref.shape[0]):  # static tap count -> unrolled
                    rows_t = jnp.dot(t_ref[t].astype(f32), act,
                                     preferred_element_type=f32)
                    y_t = jnp.dot(rows_t, w_ref[t].astype(f32),
                                  preferred_element_type=f32)
                    acc = y_t if acc is None else acc + y_t
                act = acc + b_ref[...]
            if relu:
                act = jnp.maximum(act, 0.0)

        out_ref[...] = act.astype(out_ref.dtype)

    return kernel


# ----------------------------------------------------------------------------
# Static packing: selection matrices + bf16 weights (done once, outside jit).
# ----------------------------------------------------------------------------
def _build_tap_selectors(batch, hi, wi):
    """0/1 matrices that gather the stride-2 im2col rows of a 3x3/pad-1 conv.

    Input rows are indexed n = b*hi*wi + r*wi + c, output rows
    m = b*ho*wo + i*wo + j. For tap (kh, kw), T[m, n] = 1 iff that tap of
    output (i, j) lands on valid input (r, c) = (2i+kh-1, 2j+kw-1) of the same
    batch; taps that only ever see zero padding are dropped entirely.
    """
    ho, wo = (hi + 1) // 2, (wi + 1) // 2
    taps, mats = [], []
    for kh in range(3):
        for kw in range(3):
            T = np.zeros((batch * ho * wo, batch * hi * wi), np.float32)
            any_valid = False
            for b in range(batch):
                for i in range(ho):
                    for j in range(wo):
                        r, c = 2 * i + kh - 1, 2 * j + kw - 1
                        if 0 <= r < hi and 0 <= c < wi:
                            T[b * ho * wo + i * wo + j,
                              b * hi * wi + r * wi + c] = 1.0
                            any_valid = True
            if any_valid:
                taps.append((kh, kw))
                mats.append(T)
    return taps, np.stack(mats, axis=0)


def pack_params(params, batch, height, width):
    """Build the static layer plan + kernel operand list (bf16 weights)."""
    plan, tensors = [], []
    convs = params["conv"]

    # conv1: plain GEMM on externally-built im2col patches of the raw input.
    w, b = convs[0]
    cin, cout = w.shape[2], w.shape[3]
    plan.append(("gemm", True))
    tensors += [w.reshape(9 * cin, cout).astype(jnp.bfloat16),
                b.reshape(1, -1).astype(jnp.float32)]
    hi, wi = (height + 1) // 2, (width + 1) // 2

    for w, b in convs[1:]:
        if hi == 1 and wi == 1:
            # 1x1 input, pad=1, stride=2: the 8 off-center taps only read zero
            # padding, so the conv is exactly  x @ w[1, 1]  (center tap).
            plan.append(("gemm", True))
            tensors += [w[1, 1].astype(jnp.bfloat16),
                        b.reshape(1, -1).astype(jnp.float32)]
        else:
            taps, sel = _build_tap_selectors(batch, hi, wi)
            wstack = jnp.stack([w[kh, kw] for kh, kw in taps], axis=0)
            plan.append(("tapconv", True))
            tensors += [jnp.asarray(sel, dtype=jnp.bfloat16),   # 0/1: exact in bf16
                        wstack.astype(jnp.bfloat16),
                        b.reshape(1, -1).astype(jnp.float32)]
        hi, wi = (hi + 1) // 2, (wi + 1) // 2

    assert hi == 1 and wi == 1, "encoder must reduce to 1x1 before the FC head"

    fcs = params["fc"]
    for li, (w, b) in enumerate(fcs):
        plan.append(("gemm", li < len(fcs) - 1))
        tensors += [w.astype(jnp.bfloat16), b.reshape(1, -1).astype(jnp.float32)]

    return tuple(plan), tuple(tensors)


# ----------------------------------------------------------------------------
# Forward pass (single pallas_call; only input im2col happens in XLA).
# ----------------------------------------------------------------------------
def pixel_encoder_forward(x_nchw, tensors, *, plan):
    x = jnp.transpose(x_nchw, (0, 2, 3, 1)).astype(jnp.float32)  # NCHW -> NHWC
    B, H, W, Cin = x.shape
    Ho, Wo = (H + 1) // 2, (W + 1) // 2

    # im2col of the raw input only (ordering (kh, kw, cin) matches w1.reshape).
    xp = jnp.pad(x, ((0, 0), (1, 1), (1, 1), (0, 0)))
    cols = [xp[:, kh:kh + 2 * Ho:2, kw:kw + 2 * Wo:2, :]
            for kh in range(3) for kw in range(3)]
    patches = jnp.stack(cols, axis=3).reshape(B * Ho * Wo, 9 * Cin)

    state_dim = tensors[-1].shape[1]
    kernel = _make_encoder_kernel(plan)
    n_inputs = 1 + len(tensors)

    # Everything (~2 MB) fits whole-array in VMEM -> no grid, no pipelining,
    # no double buffering; only the tiny (B, state_dim) result goes to HBM.
    return pl.pallas_call(
        kernel,
        out_shape=jax.ShapeDtypeStruct((B, state_dim), jnp.float32),
        in_specs=[pl.BlockSpec(memory_space=pltpu.MemorySpace.VMEM)] * n_inputs,
        out_specs=pl.BlockSpec(memory_space=pltpu.MemorySpace.VMEM),
    )(patches, *tensors)


# ----------------------------------------------------------------------------
# Parameter init (f32 masters, PyTorch-equivalent layout) and reference.
# ----------------------------------------------------------------------------
def init_params(key, input_c, state_dim):
    conv_channels = [input_c, 32, 64, 128, 256, 256, 256, 256, 512]
    fc_dims = [512, 128, 64, state_dim]
    params = {"conv": [], "fc": []}
    keys = jax.random.split(key, len(conv_channels) - 1 + len(fc_dims) - 1)
    ki = 0
    for cin, cout in zip(conv_channels[:-1], conv_channels[1:]):
        w = jax.random.normal(keys[ki], (3, 3, cin, cout), jnp.float32) * jnp.sqrt(2.0 / (9 * cin))
        params["conv"].append((w, jnp.zeros((cout,), jnp.float32)))
        ki += 1
    for din, dout in zip(fc_dims[:-1], fc_dims[1:]):
        w = jax.random.normal(keys[ki], (din, dout), jnp.float32) * jnp.sqrt(2.0 / din)
        params["fc"].append((w, jnp.zeros((dout,), jnp.float32)))
        ki += 1
    return params


def reference_forward(x_nchw, params):
    """Pure-JAX reference using the SAME bf16-rounded weights as the kernel."""
    deq = lambda w: w.astype(jnp.bfloat16).astype(jnp.float32)
    x = jnp.transpose(x_nchw, (0, 2, 3, 1)).astype(jnp.float32)
    for w, b in params["conv"]:
        x = lax.conv_general_dilated(
            x, deq(w), window_strides=(2, 2), padding=((1, 1), (1, 1)),
            dimension_numbers=("NHWC", "HWIO", "NHWC"),
            precision=lax.Precision.HIGHEST)
        x = jnp.maximum(x + b, 0.0)
    feat = x.reshape(x.shape[0], -1)
    (w1, b1), (w2, b2), (w3, b3) = params["fc"]
    hp = functools.partial(jnp.dot, precision=lax.Precision.HIGHEST)
    h = jnp.maximum(hp(feat, deq(w1)) + b1, 0.0)
    h = jnp.maximum(hp(h, deq(w2)) + b2, 0.0)
    return hp(h, deq(w3)) + b3


if __name__ == "__main__":
    key = jax.random.PRNGKey(0)
    k_in, k_par = jax.random.split(key)

    # opt.stack_n = 1 -> input_c = 3 ; opt.state_dim = 16
    stack_n, state_dim = 1, 16
    B, C, H, W = 2, stack_n * 3, 16, 16   # 16 -> 8 -> 4 -> 2 -> 1 -> 1 -> 1 -> 1 -> 1

    x = jax.random.normal(k_in, (B, C, H, W), jnp.float32)
    params = init_params(k_par, C, state_dim)

    # Static per-model packing (bf16 weights, tap selectors) done once.
    plan, tensors = pack_params(params, B, H, W)
    fwd = jax.jit(functools.partial(pixel_encoder_forward, plan=plan))

    out = jax.block_until_ready(fwd(x, tensors))
    # torch's .squeeze() gives (B, 512) feature for B > 1; we keep (B, state_dim).
    assert out.shape == (B, state_dim), out.shape

    ref = jax.block_until_ready(reference_forward(x, params))
    err = float(jnp.max(jnp.abs(out - ref)))
    scale = float(jnp.max(jnp.abs(ref))) + 1e-6
    # Both sides use identical bf16-rounded weights; the remaining slack covers
    # MXU default-precision activation rounding over the 11 chained matmuls.
    assert err <= 2e-2 * scale + 1e-5, f"mismatch: max|diff|={err}, max|ref|={scale}"

    print("KERNEL_OK")
</pallas_src>

<mosaic_0001>
module attributes {stable_mosaic.version = 11 : i64} {
  func.func @kernel(%arg0: memref<128x27xf32, #tpu.memory_space<vmem>>, %arg1: memref<27x32xbf16, #tpu.memory_space<vmem>>, %arg2: memref<1x32xf32, #tpu.memory_space<vmem>>, %arg3: memref<9x32x128xbf16, #tpu.memory_space<vmem>>, %arg4: memref<9x32x64xbf16, #tpu.memory_space<vmem>>, %arg5: memref<1x64xf32, #tpu.memory_space<vmem>>, %arg6: memref<9x8x32xbf16, #tpu.memory_space<vmem>>, %arg7: memref<9x64x128xbf16, #tpu.memory_space<vmem>>, %arg8: memref<1x128xf32, #tpu.memory_space<vmem>>, %arg9: memref<4x2x8xbf16, #tpu.memory_space<vmem>>, %arg10: memref<4x128x256xbf16, #tpu.memory_space<vmem>>, %arg11: memref<1x256xf32, #tpu.memory_space<vmem>>, %arg12: memref<256x256xbf16, #tpu.memory_space<vmem>>, %arg13: memref<1x256xf32, #tpu.memory_space<vmem>>, %arg14: memref<256x256xbf16, #tpu.memory_space<vmem>>, %arg15: memref<1x256xf32, #tpu.memory_space<vmem>>, %arg16: memref<256x256xbf16, #tpu.memory_space<vmem>>, %arg17: memref<1x256xf32, #tpu.memory_space<vmem>>, %arg18: memref<256x512xbf16, #tpu.memory_space<vmem>>, %arg19: memref<1x512xf32, #tpu.memory_space<vmem>>, %arg20: memref<512x128xbf16, #tpu.memory_space<vmem>>, %arg21: memref<1x128xf32, #tpu.memory_space<vmem>>, %arg22: memref<128x64xbf16, #tpu.memory_space<vmem>>, %arg23: memref<1x64xf32, #tpu.memory_space<vmem>>, %arg24: memref<64x16xbf16, #tpu.memory_space<vmem>>, %arg25: memref<1x16xf32, #tpu.memory_space<vmem>>, %arg26: memref<2x16xf32, #tpu.memory_space<vmem>>) attributes {dimension_semantics = [], scalar_prefetch = 0 : i64, scratch_operands = 0 : i64, tpu.core_type = #tpu.core_type<tc>} {
    %c0 = arith.constant 0 : index
    %c0_0 = arith.constant 0 : index
    %0 = vector.load %arg0[%c0, %c0_0] : memref<128x27xf32, #tpu.memory_space<vmem>>, vector<128x27xf32>
    %c0_1 = arith.constant 0 : index
    %c0_2 = arith.constant 0 : index
    %1 = vector.load %arg1[%c0_1, %c0_2] : memref<27x32xbf16, #tpu.memory_space<vmem>>, vector<27x32xbf16>
    %2 = arith.extf %1 : vector<27x32xbf16> to vector<27x32xf32>
    %cst = arith.constant dense<0.000000e+00> : vector<128x32xf32>
    %3 = tpu.matmul %0, %2, %cst {dimension_numbers = #tpu.dot_dimension_numbers<[1], [0], [0], [1], [0, 0, 1, 1], [], []>} : vector<128x27xf32>, vector<27x32xf32>, vector<128x32xf32> -> vector<128x32xf32>
    %c0_3 = arith.constant 0 : index
    %c0_4 = arith.constant 0 : index
    %4 = vector.load %arg2[%c0_3, %c0_4] : memref<1x32xf32, #tpu.memory_space<vmem>>, vector<1x32xf32>
    %5 = vector.broadcast %4 : vector<1x32xf32> to vector<128x32xf32>
    %6 = arith.addf %3, %5 : vector<128x32xf32>
    %cst_5 = arith.constant 0.000000e+00 : f32
    %7 = vector.broadcast %cst_5 : f32 to vector<128x32xf32>
    %8 = arith.maximumf %6, %7 : vector<128x32xf32>
    %c0_6 = arith.constant 0 : index
    %c0_7 = arith.constant 0 : index
    %c0_8 = arith.constant 0 : index
    %9 = vector.load %arg3[%c0_6, %c0_7, %c0_8] : memref<9x32x128xbf16, #tpu.memory_space<vmem>>, vector<1x32x128xbf16>
    %10 = vector.shape_cast %9 : vector<1x32x128xbf16> to vector<32x128xbf16>
    %11 = arith.extf %10 : vector<32x128xbf16> to vector<32x128xf32>
    %cst_9 = arith.constant dense<0.000000e+00> : vector<32x32xf32>
    %12 = tpu.matmul %11, %8, %cst_9 {dimension_numbers = #tpu.dot_dimension_numbers<[1], [0], [0], [1], [0, 0, 1, 1], [], []>} : vector<32x128xf32>, vector<128x32xf32>, vector<32x32xf32> -> vector<32x32xf32>
    %c0_10 = arith.constant 0 : index
    %c0_11 = arith.constant 0 : index
    %c0_12 = arith.constant 0 : index
    %13 = vector.load %arg4[%c0_10, %c0_11, %c0_12] : memref<9x32x64xbf16, #tpu.memory_space<vmem>>, vector<1x32x64xbf16>
    %14 = vector.shape_cast %13 : vector<1x32x64xbf16> to vector<32x64xbf16>
    %15 = arith.extf %14 : vector<32x64xbf16> to vector<32x64xf32>
    %cst_13 = arith.constant dense<0.000000e+00> : vector<32x64xf32>
    %16 = tpu.matmul %12, %15, %cst_13 {dimension_numbers = #tpu.dot_dimension_numbers<[1], [0], [0], [1], [0, 0, 1, 1], [], []>} : vector<32x32xf32>, vector<32x64xf32>, vector<32x64xf32> -> vector<32x64xf32>
    %c1 = arith.constant 1 : index
    %c0_14 = arith.constant 0 : index
    %c0_15 = arith.constant 0 : index
    %17 = vector.load %arg3[%c1, %c0_14, %c0_15] : memref<9x32x128xbf16, #tpu.memory_space<vmem>>, vector<1x32x128xbf16>
    %18 = vector.shape_cast %17 : vector<1x32x128xbf16> to vector<32x128xbf16>
    %19 = arith.extf %18 : vector<32x128xbf16> to vector<32x128xf32>
    %cst_16 = arith.constant dense<0.000000e+00> : vector<32x32xf32>
    %20 = tpu.matmul %19, %8, %cst_16 {dimension_numbers = #tpu.dot_dimension_numbers<[1], [0], [0], [1], [0, 0, 1, 1], [], []>} : vector<32x128xf32>, vector<128x32xf32>, vector<32x32xf32> -> vector<32x32xf32>
    %c1_17 = arith.constant 1 : index
    %c0_18 = arith.constant 0 : index
    %c0_19 = arith.constant 0 : index
    %21 = vector.load %arg4[%c1_17, %c0_18, %c0_19] : memref<9x32x64xbf16, #tpu.memory_space<vmem>>, vector<1x32x64xbf16>
    %22 = vector.shape_cast %21 : vector<1x32x64xbf16> to vector<32x64xbf16>
    %23 = arith.extf %22 : vector<32x64xbf16> to vector<32x64xf32>
    %cst_20 = arith.constant dense<0.000000e+00> : vector<32x64xf32>
    %24 = tpu.matmul %20, %23, %cst_20 {dimension_numbers = #tpu.dot_dimension_numbers<[1], [0], [0], [1], [0, 0, 1, 1], [], []>} : vector<32x32xf32>, vector<32x64xf32>, vector<32x64xf32> -> vector<32x64xf32>
    %25 = arith.addf %16, %24 : vector<32x64xf32>
    %c2 = arith.constant 2 : index
    %c0_21 = arith.constant 0 : index
    %c0_22 = arith.constant 0 : index
    %26 = vector.load %arg3[%c2, %c0_21, %c0_22] : memref<9x32x128xbf16, #tpu.memory_space<vmem>>, vector<1x32x128xbf16>
    %27 = vector.shape_cast %26 : vector<1x32x128xbf16> to vector<32x128xbf16>
    %28 = arith.extf %27 : vector<32x128xbf16> to vector<32x128xf32>
    %cst_23 = arith.constant dense<0.000000e+00> : vector<32x32xf32>
    %29 = tpu.matmul %28, %8, %cst_23 {dimension_numbers = #tpu.dot_dimension_numbers<[1], [0], [0], [1], [0, 0, 1, 1], [], []>} : vector<32x128xf32>, vector<128x32xf32>, vector<32x32xf32> -> vector<32x32xf32>
    %c2_24 = arith.constant 2 : index
    %c0_25 = arith.constant 0 : index
    %c0_26 = arith.constant 0 : index
    %30 = vector.load %arg4[%c2_24, %c0_25, %c0_26] : memref<9x32x64xbf16, #tpu.memory_space<vmem>>, vector<1x32x64xbf16>
    %31 = vector.shape_cast %30 : vector<1x32x64xbf16> to vector<32x64xbf16>
    %32 = arith.extf %31 : vector<32x64xbf16> to vector<32x64xf32>
    %cst_27 = arith.constant dense<0.000000e+00> : vector<32x64xf32>
    %33 = tpu.matmul %29, %32, %cst_27 {dimension_numbers = #tpu.dot_dimension_numbers<[1], [0], [0], [1], [0, 0, 1, 1], [], []>} : vector<32x32xf32>, vector<32x64xf32>, vector<32x64xf32> -> vector<32x64xf32>
    %34 = arith.addf %25, %33 : vector<32x64xf32>
    %c3 = arith.constant 3 : index
    %c0_28 = arith.constant 0 : index
    %c0_29 = arith.constant 0 : index
    %35 = vector.load %arg3[%c3, %c0_28, %c0_29] : memref<9x32x128xbf16, #tpu.memory_space<vmem>>, vector<1x32x128xbf16>
    %36 = vector.shape_cast %35 : vector<1x32x128xbf16> to vector<32x128xbf16>
    %37 = arith.extf %36 : vector<32x128xbf16> to vector<32x128xf32>
    %cst_30 = arith.constant dense<0.000000e+00> : vector<32x32xf32>
    %38 = tpu.matmul %37, %8, %cst_30 {dimension_numbers = #tpu.dot_dimension_numbers<[1], [0], [0], [1], [0, 0, 1, 1], [], []>} : vector<32x128xf32>, vector<128x32xf32>, vector<32x32xf32> -> vector<32x32xf32>
    %c3_31 = arith.constant 3 : index
    %c0_32 = arith.constant 0 : index
    %c0_33 = arith.constant 0 : index
    %39 = vector.load %arg4[%c3_31, %c0_32, %c0_33] : memref<9x32x64xbf16, #tpu.memory_space<vmem>>, vector<1x32x64xbf16>
    %40 = vector.shape_cast %39 : vector<1x32x64xbf16> to vector<32x64xbf16>
    %41 = arith.extf %40 : vector<32x64xbf16> to vector<32x64xf32>
    %cst_34 = arith.constant dense<0.000000e+00> : vector<32x64xf32>
    %42 = tpu.matmul %38, %41, %cst_34 {dimension_numbers = #tpu.dot_dimension_numbers<[1], [0], [0], [1], [0, 0, 1, 1], [], []>} : vector<32x32xf32>, vector<32x64xf32>, vector<32x64xf32> -> vector<32x64xf32>
    %43 = arith.addf %34, %42 : vector<32x64xf32>
    %c4 = arith.constant 4 : index
    %c0_35 = arith.constant 0 : index
    %c0_36 = arith.constant 0 : index
    %44 = vector.load %arg3[%c4, %c0_35, %c0_36] : memref<9x32x128xbf16, #tpu.memory_space<vmem>>, vector<1x32x128xbf16>
    %45 = vector.shape_cast %44 : vector<1x32x128xbf16> to vector<32x128xbf16>
    %46 = arith.extf %45 : vector<32x128xbf16> to vector<32x128xf32>
    %cst_37 = arith.constant dense<0.000000e+00> : vector<32x32xf32>
    %47 = tpu.matmul %46, %8, %cst_37 {dimension_numbers = #tpu.dot_dimension_numbers<[1], [0], [0], [1], [0, 0, 1, 1], [], []>} : vector<32x128xf32>, vector<128x32xf32>, vector<32x32xf32> -> vector<32x32xf32>
    %c4_38 = arith.constant 4 : index
    %c0_39 = arith.constant 0 : index
    %c0_40 = arith.constant 0 : index
    %48 = vector.load %arg4[%c4_38, %c0_39, %c0_40] : memref<9x32x64xbf16, #tpu.memory_space<vmem>>, vector<1x32x64xbf16>
    %49 = vector.shape_cast %48 : vector<1x32x64xbf16> to vector<32x64xbf16>
    %50 = arith.extf %49 : vector<32x64xbf16> to vector<32x64xf32>
    %cst_41 = arith.constant dense<0.000000e+00> : vector<32x64xf32>
    %51 = tpu.matmul %47, %50, %cst_41 {dimension_numbers = #tpu.dot_dimension_numbers<[1], [0], [0], [1], [0, 0, 1, 1], [], []>} : vector<32x32xf32>, vector<32x64xf32>, vector<32x64xf32> -> vector<32x64xf32>
    %52 = arith.addf %43, %51 : vector<32x64xf32>
    %c5 = arith.constant 5 : index
    %c0_42 = arith.constant 0 : index
    %c0_43 = arith.constant 0 : index
    %53 = vector.load %arg3[%c5, %c0_42, %c0_43] : memref<9x32x128xbf16, #tpu.memory_space<vmem>>, vector<1x32x128xbf16>
    %54 = vector.shape_cast %53 : vector<1x32x128xbf16> to vector<32x128xbf16>
    %55 = arith.extf %54 : vector<32x128xbf16> to vector<32x128xf32>
    %cst_44 = arith.constant dense<0.000000e+00> : vector<32x32xf32>
    %56 = tpu.matmul %55, %8, %cst_44 {dimension_numbers = #tpu.dot_dimension_numbers<[1], [0], [0], [1], [0, 0, 1, 1], [], []>} : vector<32x128xf32>, vector<128x32xf32>, vector<32x32xf32> -> vector<32x32xf32>
    %c5_45 = arith.constant 5 : index
    %c0_46 = arith.constant 0 : index
    %c0_47 = arith.constant 0 : index
    %57 = vector.load %arg4[%c5_45, %c0_46, %c0_47] : memref<9x32x64xbf16, #tpu.memory_space<vmem>>, vector<1x32x64xbf16>
    %58 = vector.shape_cast %57 : vector<1x32x64xbf16> to vector<32x64xbf16>
    %59 = arith.extf %58 : vector<32x64xbf16> to vector<32x64xf32>
    %cst_48 = arith.constant dense<0.000000e+00> : vector<32x64xf32>
    %60 = tpu.matmul %56, %59, %cst_48 {dimension_numbers = #tpu.dot_dimension_numbers<[1], [0], [0], [1], [0, 0, 1, 1], [], []>} : vector<32x32xf32>, vector<32x64xf32>, vector<32x64xf32> -> vector<32x64xf32>
    %61 = arith.addf %52, %60 : vector<32x64xf32>
    %c6 = arith.constant 6 : index
    %c0_49 = arith.constant 0 : index
    %c0_50 = arith.constant 0 : index
    %62 = vector.load %arg3[%c6, %c0_49, %c0_50] : memref<9x32x128xbf16, #tpu.memory_space<vmem>>, vector<1x32x128xbf16>
    %63 = vector.shape_cast %62 : vector<1x32x128xbf16> to vector<32x128xbf16>
    %64 = arith.extf %63 : vector<32x128xbf16> to vector<32x128xf32>
    %cst_51 = arith.constant dense<0.000000e+00> : vector<32x32xf32>
    %65 = tpu.matmul %64, %8, %cst_51 {dimension_numbers = #tpu.dot_dimension_numbers<[1], [0], [0], [1], [0, 0, 1, 1], [], []>} : vector<32x128xf32>, vector<128x32xf32>, vector<32x32xf32> -> vector<32x32xf32>
    %c6_52 = arith.constant 6 : index
    %c0_53 = arith.constant 0 : index
    %c0_54 = arith.constant 0 : index
    %66 = vector.load %arg4[%c6_52, %c0_53, %c0_54] : memref<9x32x64xbf16, #tpu.memory_space<vmem>>, vector<1x32x64xbf16>
    %67 = vector.shape_cast %66 : vector<1x32x64xbf16> to vector<32x64xbf16>
    %68 = arith.extf %67 : vector<32x64xbf16> to vector<32x64xf32>
    %cst_55 = arith.constant dense<0.000000e+00> : vector<32x64xf32>
    %69 = tpu.matmul %65, %68, %cst_55 {dimension_numbers = #tpu.dot_dimension_numbers<[1], [0], [0], [1], [0, 0, 1, 1], [], []>} : vector<32x32xf32>, vector<32x64xf32>, vector<32x64xf32> -> vector<32x64xf32>
    %70 = arith.addf %61, %69 : vector<32x64xf32>
    %c7 = arith.constant 7 : index
    %c0_56 = arith.constant 0 : index
    %c0_57 = arith.constant 0 : index
    %71 = vector.load %arg3[%c7, %c0_56, %c0_57] : memref<9x32x128xbf16, #tpu.memory_space<vmem>>, vector<1x32x128xbf16>
    %72 = vector.shape_cast %71 : vector<1x32x128xbf16> to vector<32x128xbf16>
    %73 = arith.extf %72 : vector<32x128xbf16> to vector<32x128xf32>
    %cst_58 = arith.constant dense<0.000000e+00> : vector<32x32xf32>
    %74 = tpu.matmul %73, %8, %cst_58 {dimension_numbers = #tpu.dot_dimension_numbers<[1], [0], [0], [1], [0, 0, 1, 1], [], []>} : vector<32x128xf32>, vector<128x32xf32>, vector<32x32xf32> -> vector<32x32xf32>
    %c7_59 = arith.constant 7 : index
    %c0_60 = arith.constant 0 : index
    %c0_61 = arith.constant 0 : index
    %75 = vector.load %arg4[%c7_59, %c0_60, %c0_61] : memref<9x32x64xbf16, #tpu.memory_space<vmem>>, vector<1x32x64xbf16>
    %76 = vector.shape_cast %75 : vector<1x32x64xbf16> to vector<32x64xbf16>
    %77 = arith.extf %76 : vector<32x64xbf16> to vector<32x64xf32>
    %cst_62 = arith.constant dense<0.000000e+00> : vector<32x64xf32>
    %78 = tpu.matmul %74, %77, %cst_62 {dimension_numbers = #tpu.dot_dimension_numbers<[1], [0], [0], [1], [0, 0, 1, 1], [], []>} : vector<32x32xf32>, vector<32x64xf32>, vector<32x64xf32> -> vector<32x64xf32>
    %79 = arith.addf %70, %78 : vector<32x64xf32>
    %c8 = arith.constant 8 : index
    %c0_63 = arith.constant 0 : index
    %c0_64 = arith.constant 0 : index
    %80 = vector.load %arg3[%c8, %c0_63, %c0_64] : memref<9x32x128xbf16, #tpu.memory_space<vmem>>, vector<1x32x128xbf16>
    %81 = vector.shape_cast %80 : vector<1x32x128xbf16> to vector<32x128xbf16>
    %82 = arith.extf %81 : vector<32x128xbf16> to vector<32x128xf32>
    %cst_65 = arith.constant dense<0.000000e+00> : vector<32x32xf32>
    %83 = tpu.matmul %82, %8, %cst_65 {dimension_numbers = #tpu.dot_dimension_numbers<[1], [0], [0], [1], [0, 0, 1, 1], [], []>} : vector<32x128xf32>, vector<128x32xf32>, vector<32x32xf32> -> vector<32x32xf32>
    %c8_66 = arith.constant 8 : index
    %c0_67 = arith.constant 0 : index
    %c0_68 = arith.constant 0 : index
    %84 = vector.load %arg4[%c8_66, %c0_67, %c0_68] : memref<9x32x64xbf16, #tpu.memory_space<vmem>>, vector<1x32x64xbf16>
    %85 = vector.shape_cast %84 : vector<1x32x64xbf16> to vector<32x64xbf16>
    %86 = arith.extf %85 : vector<32x64xbf16> to vector<32x64xf32>
    %cst_69 = arith.constant dense<0.000000e+00> : vector<32x64xf32>
    %87 = tpu.matmul %83, %86, %cst_69 {dimension_numbers = #tpu.dot_dimension_numbers<[1], [0], [0], [1], [0, 0, 1, 1], [], []>} : vector<32x32xf32>, vector<32x64xf32>, vector<32x64xf32> -> vector<32x64xf32>
    %88 = arith.addf %79, %87 : vector<32x64xf32>
    %c0_70 = arith.constant 0 : index
    %c0_71 = arith.constant 0 : index
    %89 = vector.load %arg5[%c0_70, %c0_71] : memref<1x64xf32, #tpu.memory_space<vmem>>, vector<1x64xf32>
    %90 = vector.broadcast %89 : vector<1x64xf32> to vector<32x64xf32>
    %91 = arith.addf %88, %90 : vector<32x64xf32>
    %cst_72 = arith.constant 0.000000e+00 : f32
    %92 = vector.broadcast %cst_72 : f32 to vector<32x64xf32>
    %93 = arith.maximumf %91, %92 : vector<32x64xf32>
    %c0_73 = arith.constant 0 : index
    %c0_74 = arith.constant 0 : index
    %c0_75 = arith.constant 0 : index
    %94 = vector.load %arg6[%c0_73, %c0_74, %c0_75] : memref<9x8x32xbf16, #tpu.memory_space<vmem>>, vector<1x8x32xbf16>
    %95 = vector.shape_cast %94 : vector<1x8x32xbf16> to vector<8x32xbf16>
    %96 = arith.extf %95 : vector<8x32xbf16> to vector<8x32xf32>
    %cst_76 = arith.constant dense<0.000000e+00> : vector<8x64xf32>
    %97 = tpu.matmul %96, %93, %cst_76 {dimension_numbers = #tpu.dot_dimension_numbers<[1], [0], [0], [1], [0, 0, 1, 1], [], []>} : vector<8x32xf32>, vector<32x64xf32>, vector<8x64xf32> -> vector<8x64xf32>
    %c0_77 = arith.constant 0 : index
    %c0_78 = arith.constant 0 : index
    %c0_79 = arith.constant 0 : index
    %98 = vector.load %arg7[%c0_77, %c0_78, %c0_79] : memref<9x64x128xbf16, #tpu.memory_space<vmem>>, vector<1x64x128xbf16>
    %99 = vector.shape_cast %98 : vector<1x64x128xbf16> to vector<64x128xbf16>
    %100 = arith.extf %99 : vector<64x128xbf16> to vector<64x128xf32>
    %cst_80 = arith.constant dense<0.000000e+00> : vector<8x128xf32>
    %101 = tpu.matmul %97, %100, %cst_80 {dimension_numbers = #tpu.dot_dimension_numbers<[1], [0], [0], [1], [0, 0, 1, 1], [], []>} : vector<8x64xf32>, vector<64x128xf32>, vector<8x128xf32> -> vector<8x128xf32>
    %c1_81 = arith.constant 1 : index
    %c0_82 = arith.constant 0 : index
    %c0_83 = arith.constant 0 : index
    %102 = vector.load %arg6[%c1_81, %c0_82, %c0_83] : memref<9x8x32xbf16, #tpu.memory_space<vmem>>, vector<1x8x32xbf16>
    %103 = vector.shape_cast %102 : vector<1x8x32xbf16> to vector<8x32xbf16>
    %104 = arith.extf %103 : vector<8x32xbf16> to vector<8x32xf32>
    %cst_84 = arith.constant dense<0.000000e+00> : vector<8x64xf32>
    %105 = tpu.matmul %104, %93, %cst_84 {dimension_numbers = #tpu.dot_dimension_numbers<[1], [0], [0], [1], [0, 0, 1, 1], [], []>} : vector<8x32xf32>, vector<32x64xf32>, vector<8x64xf32> -> vector<8x64xf32>
    %c1_85 = arith.constant 1 : index
    %c0_86 = arith.constant 0 : index
    %c0_87 = arith.constant 0 : index
    %106 = vector.load %arg7[%c1_85, %c0_86, %c0_87] : memref<9x64x128xbf16, #tpu.memory_space<vmem>>, vector<1x64x128xbf16>
    %107 = vector.shape_cast %106 : vector<1x64x128xbf16> to vector<64x128xbf16>
    %108 = arith.extf %107 : vector<64x128xbf16> to vector<64x128xf32>
    %cst_88 = arith.constant dense<0.000000e+00> : vector<8x128xf32>
    %109 = tpu.matmul %105, %108, %cst_88 {dimension_numbers = #tpu.dot_dimension_numbers<[1], [0], [0], [1], [0, 0, 1, 1], [], []>} : vector<8x64xf32>, vector<64x128xf32>, vector<8x128xf32> -> vector<8x128xf32>
    %110 = arith.addf %101, %109 : vector<8x128xf32>
    %c2_89 = arith.constant 2 : index
    %c0_90 = arith.constant 0 : index
    %c0_91 = arith.constant 0 : index
    %111 = vector.load %arg6[%c2_89, %c0_90, %c0_91] : memref<9x8x32xbf16, #tpu.memory_space<vmem>>, vector<1x8x32xbf16>
    %112 = vector.shape_cast %111 : vector<1x8x32xbf16> to vector<8x32xbf16>
    %113 = arith.extf %112 : vector<8x32xbf16> to vector<8x32xf32>
    %cst_92 = arith.constant dense<0.000000e+00> : vector<8x64xf32>
    %114 = tpu.matmul %113, %93, %cst_92 {dimension_numbers = #tpu.dot_dimension_numbers<[1], [0], [0], [1], [0, 0, 1, 1], [], []>} : vector<8x32xf32>, vector<32x64xf32>, vector<8x64xf32> -> vector<8x64xf32>
    %c2_93 = arith.constant 2 : index
    %c0_94 = arith.constant 0 : index
    %c0_95 = arith.constant 0 : index
    %115 = vector.load %arg7[%c2_93, %c0_94, %c0_95] : memref<9x64x128xbf16, #tpu.memory_space<vmem>>, vector<1x64x128xbf16>
    %116 = vector.shape_cast %115 : vector<1x64x128xbf16> to vector<64x128xbf16>
    %117 = arith.extf %116 : vector<64x128xbf16> to vector<64x128xf32>
    %cst_96 = arith.constant dense<0.000000e+00> : vector<8x128xf32>
    %118 = tpu.matmul %114, %117, %cst_96 {dimension_numbers = #tpu.dot_dimension_numbers<[1], [0], [0], [1], [0, 0, 1, 1], [], []>} : vector<8x64xf32>, vector<64x128xf32>, vector<8x128xf32> -> vector<8x128xf32>
    %119 = arith.addf %110, %118 : vector<8x128xf32>
    %c3_97 = arith.constant 3 : index
    %c0_98 = arith.constant 0 : index
    %c0_99 = arith.constant 0 : index
    %120 = vector.load %arg6[%c3_97, %c0_98, %c0_99] : memref<9x8x32xbf16, #tpu.memory_space<vmem>>, vector<1x8x32xbf16>
    %121 = vector.shape_cast %120 : vector<1x8x32xbf16> to vector<8x32xbf16>
    %122 = arith.extf %121 : vector<8x32xbf16> to vector<8x32xf32>
    %cst_100 = arith.constant dense<0.000000e+00> : vector<8x64xf32>
    %123 = tpu.matmul %122, %93, %cst_100 {dimension_numbers = #tpu.dot_dimension_numbers<[1], [0], [0], [1], [0, 0, 1, 1], [], []>} : vector<8x32xf32>, vector<32x64xf32>, vector<8x64xf32> -> vector<8x64xf32>
    %c3_101 = arith.constant 3 : index
    %c0_102 = arith.constant 0 : index
    %c0_103 = arith.constant 0 : index
    %124 = vector.load %arg7[%c3_101, %c0_102, %c0_103] : memref<9x64x128xbf16, #tpu.memory_space<vmem>>, vector<1x64x128xbf16>
    %125 = vector.shape_cast %124 : vector<1x64x128xbf16> to vector<64x128xbf16>
    %126 = arith.extf %125 : vector<64x128xbf16> to vector<64x128xf32>
    %cst_104 = arith.constant dense<0.000000e+00> : vector<8x128xf32>
    %127 = tpu.matmul %123, %126, %cst_104 {dimension_numbers = #tpu.dot_dimension_numbers<[1], [0], [0], [1], [0, 0, 1, 1], [], []>} : vector<8x64xf32>, vector<64x128xf32>, vector<8x128xf32> -> vector<8x128xf32>
    %128 = arith.addf %119, %127 : vector<8x128xf32>
    %c4_105 = arith.constant 4 : index
    %c0_106 = arith.constant 0 : index
    %c0_107 = arith.constant 0 : index
    %129 = vector.load %arg6[%c4_105, %c0_106, %c0_107] : memref<9x8x32xbf16, #tpu.memory_space<vmem>>, vector<1x8x32xbf16>
    %130 = vector.shape_cast %129 : vector<1x8x32xbf16> to vector<8x32xbf16>
    %131 = arith.extf %130 : vector<8x32xbf16> to vector<8x32xf32>
    %cst_108 = arith.constant dense<0.000000e+00> : vector<8x64xf32>
    %132 = tpu.matmul %131, %93, %cst_108 {dimension_numbers = #tpu.dot_dimension_numbers<[1], [0], [0], [1], [0, 0, 1, 1], [], []>} : vector<8x32xf32>, vector<32x64xf32>, vector<8x64xf32> -> vector<8x64xf32>
    %c4_109 = arith.constant 4 : index
    %c0_110 = arith.constant 0 : index
    %c0_111 = arith.constant 0 : index
    %133 = vector.load %arg7[%c4_109, %c0_110, %c0_111] : memref<9x64x128xbf16, #tpu.memory_space<vmem>>, vector<1x64x128xbf16>
    %134 = vector.shape_cast %133 : vector<1x64x128xbf16> to vector<64x128xbf16>
    %135 = arith.extf %134 : vector<64x128xbf16> to vector<64x128xf32>
    %cst_112 = arith.constant dense<0.000000e+00> : vector<8x128xf32>
    %136 = tpu.matmul %132, %135, %cst_112 {dimension_numbers = #tpu.dot_dimension_numbers<[1], [0], [0], [1], [0, 0, 1, 1], [], []>} : vector<8x64xf32>, vector<64x128xf32>, vector<8x128xf32> -> vector<8x128xf32>
    %137 = arith.addf %128, %136 : vector<8x128xf32>
    %c5_113 = arith.constant 5 : index
    %c0_114 = arith.constant 0 : index
    %c0_115 = arith.constant 0 : index
    %138 = vector.load %arg6[%c5_113, %c0_114, %c0_115] : memref<9x8x32xbf16, #tpu.memory_space<vmem>>, vector<1x8x32xbf16>
    %139 = vector.shape_cast %138 : vector<1x8x32xbf16> to vector<8x32xbf16>
    %140 = arith.extf %139 : vector<8x32xbf16> to vector<8x32xf32>
    %cst_116 = arith.constant dense<0.000000e+00> : vector<8x64xf32>
    %141 = tpu.matmul %140, %93, %cst_116 {dimension_numbers = #tpu.dot_dimension_numbers<[1], [0], [0], [1], [0, 0, 1, 1], [], []>} : vector<8x32xf32>, vector<32x64xf32>, vector<8x64xf32> -> vector<8x64xf32>
    %c5_117 = arith.constant 5 : index
    %c0_118 = arith.constant 0 : index
    %c0_119 = arith.constant 0 : index
    %142 = vector.load %arg7[%c5_117, %c0_118, %c0_119] : memref<9x64x128xbf16, #tpu.memory_space<vmem>>, vector<1x64x128xbf16>
    %143 = vector.shape_cast %142 : vector<1x64x128xbf16> to vector<64x128xbf16>
    %144 = arith.extf %143 : vector<64x128xbf16> to vector<64x128xf32>
    %cst_120 = arith.constant dense<0.000000e+00> : vector<8x128xf32>
    %145 = tpu.matmul %141, %144, %cst_120 {dimension_numbers = #tpu.dot_dimension_numbers<[1], [0], [0], [1], [0, 0, 1, 1], [], []>} : vector<8x64xf32>, vector<64x128xf32>, vector<8x128xf32> -> vector<8x128xf32>
    %146 = arith.addf %137, %145 : vector<8x128xf32>
    %c6_121 = arith.constant 6 : index
    %c0_122 = arith.constant 0 : index
    %c0_123 = arith.constant 0 : index
    %147 = vector.load %arg6[%c6_121, %c0_122, %c0_123] : memref<9x8x32xbf16, #tpu.memory_space<vmem>>, vector<1x8x32xbf16>
    %148 = vector.shape_cast %147 : vector<1x8x32xbf16> to vector<8x32xbf16>
    %149 = arith.extf %148 : vector<8x32xbf16> to vector<8x32xf32>
    %cst_124 = arith.constant dense<0.000000e+00> : vector<8x64xf32>
    %150 = tpu.matmul %149, %93, %cst_124 {dimension_numbers = #tpu.dot_dimension_numbers<[1], [0], [0], [1], [0, 0, 1, 1], [], []>} : vector<8x32xf32>, vector<32x64xf32>, vector<8x64xf32> -> vector<8x64xf32>
    %c6_125 = arith.constant 6 : index
    %c0_126 = arith.constant 0 : index
    %c0_127 = arith.constant 0 : index
    %151 = vector.load %arg7[%c6_125, %c0_126, %c0_127] : memref<9x64x128xbf16, #tpu.memory_space<vmem>>, vector<1x64x128xbf16>
    %152 = vector.shape_cast %151 : vector<1x64x128xbf16> to vector<64x128xbf16>
    %153 = arith.extf %152 : vector<64x128xbf16> to vector<64x128xf32>
    %cst_128 = arith.constant dense<0.000000e+00> : vector<8x128xf32>
    %154 = tpu.matmul %150, %153, %cst_128 {dimension_numbers = #tpu.dot_dimension_numbers<[1], [0], [0], [1], [0, 0, 1, 1], [], []>} : vector<8x64xf32>, vector<64x128xf32>, vector<8x128xf32> -> vector<8x128xf32>
    %155 = arith.addf %146, %154 : vector<8x128xf32>
    %c7_129 = arith.constant 7 : index
    %c0_130 = arith.constant 0 : index
    %c0_131 = arith.constant 0 : index
    %156 = vector.load %arg6[%c7_129, %c0_130, %c0_131] : memref<9x8x32xbf16, #tpu.memory_space<vmem>>, vector<1x8x32xbf16>
    %157 = vector.shape_cast %156 : vector<1x8x32xbf16> to vector<8x32xbf16>
    %158 = arith.extf %157 : vector<8x32xbf16> to vector<8x32xf32>
    %cst_132 = arith.constant dense<0.000000e+00> : vector<8x64xf32>
    %159 = tpu.matmul %158, %93, %cst_132 {dimension_numbers = #tpu.dot_dimension_numbers<[1], [0], [0], [1], [0, 0, 1, 1], [], []>} : vector<8x32xf32>, vector<32x64xf32>, vector<8x64xf32> -> vector<8x64xf32>
    %c7_133 = arith.constant 7 : index
    %c0_134 = arith.constant 0 : index
    %c0_135 = arith.constant 0 : index
    %160 = vector.load %arg7[%c7_133, %c0_134, %c0_135] : memref<9x64x128xbf16, #tpu.memory_space<vmem>>, vector<1x64x128xbf16>
    %161 = vector.shape_cast %160 : vector<1x64x128xbf16> to vector<64x128xbf16>
    %162 = arith.extf %161 : vector<64x128xbf16> to vector<64x128xf32>
    %cst_136 = arith.constant dense<0.000000e+00> : vector<8x128xf32>
    %163 = tpu.matmul %159, %162, %cst_136 {dimension_numbers = #tpu.dot_dimension_numbers<[1], [0], [0], [1], [0, 0, 1, 1], [], []>} : vector<8x64xf32>, vector<64x128xf32>, vector<8x128xf32> -> vector<8x128xf32>
    %164 = arith.addf %155, %163 : vector<8x128xf32>
    %c8_137 = arith.constant 8 : index
    %c0_138 = arith.constant 0 : index
    %c0_139 = arith.constant 0 : index
    %165 = vector.load %arg6[%c8_137, %c0_138, %c0_139] : memref<9x8x32xbf16, #tpu.memory_space<vmem>>, vector<1x8x32xbf16>
    %166 = vector.shape_cast %165 : vector<1x8x32xbf16> to vector<8x32xbf16>
    %167 = arith.extf %166 : vector<8x32xbf16> to vector<8x32xf32>
    %cst_140 = arith.constant dense<0.000000e+00> : vector<8x64xf32>
    %168 = tpu.matmul %167, %93, %cst_140 {dimension_numbers = #tpu.dot_dimension_numbers<[1], [0], [0], [1], [0, 0, 1, 1], [], []>} : vector<8x32xf32>, vector<32x64xf32>, vector<8x64xf32> -> vector<8x64xf32>
    %c8_141 = arith.constant 8 : index
    %c0_142 = arith.constant 0 : index
    %c0_143 = arith.constant 0 : index
    %169 = vector.load %arg7[%c8_141, %c0_142, %c0_143] : memref<9x64x128xbf16, #tpu.memory_space<vmem>>, vector<1x64x128xbf16>
    %170 = vector.shape_cast %169 : vector<1x64x128xbf16> to vector<64x128xbf16>
    %171 = arith.extf %170 : vector<64x128xbf16> to vector<64x128xf32>
    %cst_144 = arith.constant dense<0.000000e+00> : vector<8x128xf32>
    %172 = tpu.matmul %168, %171, %cst_144 {dimension_numbers = #tpu.dot_dimension_numbers<[1], [0], [0], [1], [0, 0, 1, 1], [], []>} : vector<8x64xf32>, vector<64x128xf32>, vector<8x128xf32> -> vector<8x128xf32>
    %173 = arith.addf %164, %172 : vector<8x128xf32>
    %c0_145 = arith.constant 0 : index
    %c0_146 = arith.constant 0 : index
    %174 = vector.load %arg8[%c0_145, %c0_146] : memref<1x128xf32, #tpu.memory_space<vmem>>, vector<1x128xf32>
    %175 = vector.broadcast %174 : vector<1x128xf32> to vector<8x128xf32>
    %176 = arith.addf %173, %175 : vector<8x128xf32>
    %cst_147 = arith.constant 0.000000e+00 : f32
    %177 = vector.broadcast %cst_147 : f32 to vector<8x128xf32>
    %178 = arith.maximumf %176, %177 : vector<8x128xf32>
    %c0_148 = arith.constant 0 : index
    %c0_149 = arith.constant 0 : index
    %c0_150 = arith.constant 0 : index
    %179 = vector.load %arg9[%c0_148, %c0_149, %c0_150] : memref<4x2x8xbf16, #tpu.memory_space<vmem>>, vector<1x2x8xbf16>
    %180 = vector.shape_cast %179 : vector<1x2x8xbf16> to vector<2x8xbf16>
    %181 = arith.extf %180 : vector<2x8xbf16> to vector<2x8xf32>
    %cst_151 = arith.constant dense<0.000000e+00> : vector<2x128xf32>
    %182 = tpu.matmul %181, %178, %cst_151 {dimension_numbers = #tpu.dot_dimension_numbers<[1], [0], [0], [1], [0, 0, 1, 1], [], []>} : vector<2x8xf32>, vector<8x128xf32>, vector<2x128xf32> -> vector<2x128xf32>
    %c0_152 = arith.constant 0 : index
    %c0_153 = arith.constant 0 : index
    %c0_154 = arith.constant 0 : index
    %183 = vector.load %arg10[%c0_152, %c0_153, %c0_154] : memref<4x128x256xbf16, #tpu.memory_space<vmem>>, vector<1x128x256xbf16>
    %184 = vector.shape_cast %183 : vector<1x128x256xbf16> to vector<128x256xbf16>
    %185 = arith.extf %184 : vector<128x256xbf16> to vector<128x256xf32>
    %cst_155 = arith.constant dense<0.000000e+00> : vector<2x256xf32>
    %186 = tpu.matmul %182, %185, %cst_155 {dimension_numbers = #tpu.dot_dimension_numbers<[1], [0], [0], [1], [0, 0, 1, 1], [], []>} : vector<2x128xf32>, vector<128x256xf32>, vector<2x256xf32> -> vector<2x256xf32>
    %c1_156 = arith.constant 1 : index
    %c0_157 = arith.constant 0 : index
    %c0_158 = arith.constant 0 : index
    %187 = vector.load %arg9[%c1_156, %c0_157, %c0_158] : memref<4x2x8xbf16, #tpu.memory_space<vmem>>, vector<1x2x8xbf16>
    %188 = vector.shape_cast %187 : vector<1x2x8xbf16> to vector<2x8xbf16>
    %189 = arith.extf %188 : vector<2x8xbf16> to vector<2x8xf32>
    %cst_159 = arith.constant dense<0.000000e+00> : vector<2x128xf32>
    %190 = tpu.matmul %189, %178, %cst_159 {dimension_numbers = #tpu.dot_dimension_numbers<[1], [0], [0], [1], [0, 0, 1, 1], [], []>} : vector<2x8xf32>, vector<8x128xf32>, vector<2x128xf32> -> vector<2x128xf32>
    %c1_160 = arith.constant 1 : index
    %c0_161 = arith.constant 0 : index
    %c0_162 = arith.constant 0 : index
    %191 = vector.load %arg10[%c1_160, %c0_161, %c0_162] : memref<4x128x256xbf16, #tpu.memory_space<vmem>>, vector<1x128x256xbf16>
    %192 = vector.shape_cast %191 : vector<1x128x256xbf16> to vector<128x256xbf16>
    %193 = arith.extf %192 : vector<128x256xbf16> to vector<128x256xf32>
    %cst_163 = arith.constant dense<0.000000e+00> : vector<2x256xf32>
    %194 = tpu.matmul %190, %193, %cst_163 {dimension_numbers = #tpu.dot_dimension_numbers<[1], [0], [0], [1], [0, 0, 1, 1], [], []>} : vector<2x128xf32>, vector<128x256xf32>, vector<2x256xf32> -> vector<2x256xf32>
    %195 = arith.addf %186, %194 : vector<2x256xf32>
    %c2_164 = arith.constant 2 : index
    %c0_165 = arith.constant 0 : index
    %c0_166 = arith.constant 0 : index
    %196 = vector.load %arg9[%c2_164, %c0_165, %c0_166] : memref<4x2x8xbf16, #tpu.memory_space<vmem>>, vector<1x2x8xbf16>
    %197 = vector.shape_cast %196 : vector<1x2x8xbf16> to vector<2x8xbf16>
    %198 = arith.extf %197 : vector<2x8xbf16> to vector<2x8xf32>
    %cst_167 = arith.constant dense<0.000000e+00> : vector<2x128xf32>
    %199 = tpu.matmul %198, %178, %cst_167 {dimension_numbers = #tpu.dot_dimension_numbers<[1], [0], [0], [1], [0, 0, 1, 1], [], []>} : vector<2x8xf32>, vector<8x128xf32>, vector<2x128xf32> -> vector<2x128xf32>
    %c2_168 = arith.constant 2 : index
    %c0_169 = arith.constant 0 : index
    %c0_170 = arith.constant 0 : index
    %200 = vector.load %arg10[%c2_168, %c0_169, %c0_170] : memref<4x128x256xbf16, #tpu.memory_space<vmem>>, vector<1x128x256xbf16>
    %201 = vector.shape_cast %200 : vector<1x128x256xbf16> to vector<128x256xbf16>
    %202 = arith.extf %201 : vector<128x256xbf16> to vector<128x256xf32>
    %cst_171 = arith.constant dense<0.000000e+00> : vector<2x256xf32>
    %203 = tpu.matmul %199, %202, %cst_171 {dimension_numbers = #tpu.dot_dimension_numbers<[1], [0], [0], [1], [0, 0, 1, 1], [], []>} : vector<2x128xf32>, vector<128x256xf32>, vector<2x256xf32> -> vector<2x256xf32>
    %204 = arith.addf %195, %203 : vector<2x256xf32>
    %c3_172 = arith.constant 3 : index
    %c0_173 = arith.constant 0 : index
    %c0_174 = arith.constant 0 : index
    %205 = vector.load %arg9[%c3_172, %c0_173, %c0_174] : memref<4x2x8xbf16, #tpu.memory_space<vmem>>, vector<1x2x8xbf16>
    %206 = vector.shape_cast %205 : vector<1x2x8xbf16> to vector<2x8xbf16>
    %207 = arith.extf %206 : vector<2x8xbf16> to vector<2x8xf32>
    %cst_175 = arith.constant dense<0.000000e+00> : vector<2x128xf32>
    %208 = tpu.matmul %207, %178, %cst_175 {dimension_numbers = #tpu.dot_dimension_numbers<[1], [0], [0], [1], [0, 0, 1, 1], [], []>} : vector<2x8xf32>, vector<8x128xf32>, vector<2x128xf32> -> vector<2x128xf32>
    %c3_176 = arith.constant 3 : index
    %c0_177 = arith.constant 0 : index
    %c0_178 = arith.constant 0 : index
    %209 = vector.load %arg10[%c3_176, %c0_177, %c0_178] : memref<4x128x256xbf16, #tpu.memory_space<vmem>>, vector<1x128x256xbf16>
    %210 = vector.shape_cast %209 : vector<1x128x256xbf16> to vector<128x256xbf16>
    %211 = arith.extf %210 : vector<128x256xbf16> to vector<128x256xf32>
    %cst_179 = arith.constant dense<0.000000e+00> : vector<2x256xf32>
    %212 = tpu.matmul %208, %211, %cst_179 {dimension_numbers = #tpu.dot_dimension_numbers<[1], [0], [0], [1], [0, 0, 1, 1], [], []>} : vector<2x128xf32>, vector<128x256xf32>, vector<2x256xf32> -> vector<2x256xf32>
    %213 = arith.addf %204, %212 : vector<2x256xf32>
    %c0_180 = arith.constant 0 : index
    %c0_181 = arith.constant 0 : index
    %214 = vector.load %arg11[%c0_180, %c0_181] : memref<1x256xf32, #tpu.memory_space<vmem>>, vector<1x256xf32>
    %215 = vector.broadcast %214 : vector<1x256xf32> to vector<2x256xf32>
    %216 = arith.addf %213, %215 : vector<2x256xf32>
    %cst_182 = arith.constant 0.000000e+00 : f32
    %217 = vector.broadcast %cst_182 : f32 to vector<2x256xf32>
    %218 = arith.maximumf %216, %217 : vector<2x256xf32>
    %c0_183 = arith.constant 0 : index
    %c0_184 = arith.constant 0 : index
    %219 = vector.load %arg12[%c0_183, %c0_184] : memref<256x256xbf16, #tpu.memory_space<vmem>>, vector<256x256xbf16>
    %220 = arith.extf %219 : vector<256x256xbf16> to vector<256x256xf32>
    %cst_185 = arith.constant dense<0.000000e+00> : vector<2x256xf32>
    %221 = tpu.matmul %218, %220, %cst_185 {dimension_numbers = #tpu.dot_dimension_numbers<[1], [0], [0], [1], [0, 0, 1, 1], [], []>} : vector<2x256xf32>, vector<256x256xf32>, vector<2x256xf32> -> vector<2x256xf32>
    %c0_186 = arith.constant 0 : index
    %c0_187 = arith.constant 0 : index
    %222 = vector.load %arg13[%c0_186, %c0_187] : memref<1x256xf32, #tpu.memory_space<vmem>>, vector<1x256xf32>
    %223 = vector.broadcast %222 : vector<1x256xf32> to vector<2x256xf32>
    %224 = arith.addf %221, %223 : vector<2x256xf32>
    %cst_188 = arith.constant 0.000000e+00 : f32
    %225 = vector.broadcast %cst_188 : f32 to vector<2x256xf32>
    %226 = arith.maximumf %224, %225 : vector<2x256xf32>
    %c0_189 = arith.constant 0 : index
    %c0_190 = arith.constant 0 : index
    %227 = vector.load %arg14[%c0_189, %c0_190] : memref<256x256xbf16, #tpu.memory_space<vmem>>, vector<256x256xbf16>
    %228 = arith.extf %227 : vector<256x256xbf16> to vector<256x256xf32>
    %cst_191 = arith.constant dense<0.000000e+00> : vector<2x256xf32>
    %229 = tpu.matmul %226, %228, %cst_191 {dimension_numbers = #tpu.dot_dimension_numbers<[1], [0], [0], [1], [0, 0, 1, 1], [], []>} : vector<2x256xf32>, vector<256x256xf32>, vector<2x256xf32> -> vector<2x256xf32>
    %c0_192 = arith.constant 0 : index
    %c0_193 = arith.constant 0 : index
    %230 = vector.load %arg15[%c0_192, %c0_193] : memref<1x256xf32, #tpu.memory_space<vmem>>, vector<1x256xf32>
    %231 = vector.broadcast %230 : vector<1x256xf32> to vector<2x256xf32>
    %232 = arith.addf %229, %231 : vector<2x256xf32>
    %cst_194 = arith.constant 0.000000e+00 : f32
    %233 = vector.broadcast %cst_194 : f32 to vector<2x256xf32>
    %234 = arith.maximumf %232, %233 : vector<2x256xf32>
    %c0_195 = arith.constant 0 : index
    %c0_196 = arith.constant 0 : index
    %235 = vector.load %arg16[%c0_195, %c0_196] : memref<256x256xbf16, #tpu.memory_space<vmem>>, vector<256x256xbf16>
    %236 = arith.extf %235 : vector<256x256xbf16> to vector<256x256xf32>
    %cst_197 = arith.constant dense<0.000000e+00> : vector<2x256xf32>
    %237 = tpu.matmul %234, %236, %cst_197 {dimension_numbers = #tpu.dot_dimension_numbers<[1], [0], [0], [1], [0, 0, 1, 1], [], []>} : vector<2x256xf32>, vector<256x256xf32>, vector<2x256xf32> -> vector<2x256xf32>
    %c0_198 = arith.constant 0 : index
    %c0_199 = arith.constant 0 : index
    %238 = vector.load %arg17[%c0_198, %c0_199] : memref<1x256xf32, #tpu.memory_space<vmem>>, vector<1x256xf32>
    %239 = vector.broadcast %238 : vector<1x256xf32> to vector<2x256xf32>
    %240 = arith.addf %237, %239 : vector<2x256xf32>
    %cst_200 = arith.constant 0.000000e+00 : f32
    %241 = vector.broadcast %cst_200 : f32 to vector<2x256xf32>
    %242 = arith.maximumf %240, %241 : vector<2x256xf32>
    %c0_201 = arith.constant 0 : index
    %c0_202 = arith.constant 0 : index
    %243 = vector.load %arg18[%c0_201, %c0_202] : memref<256x512xbf16, #tpu.memory_space<vmem>>, vector<256x512xbf16>
    %244 = arith.extf %243 : vector<256x512xbf16> to vector<256x512xf32>
    %cst_203 = arith.constant dense<0.000000e+00> : vector<2x512xf32>
    %245 = tpu.matmul %242, %244, %cst_203 {dimension_numbers = #tpu.dot_dimension_numbers<[1], [0], [0], [1], [0, 0, 1, 1], [], []>} : vector<2x256xf32>, vector<256x512xf32>, vector<2x512xf32> -> vector<2x512xf32>
    %c0_204 = arith.constant 0 : index
    %c0_205 = arith.constant 0 : index
    %246 = vector.load %arg19[%c0_204, %c0_205] : memref<1x512xf32, #tpu.memory_space<vmem>>, vector<1x512xf32>
    %247 = vector.broadcast %246 : vector<1x512xf32> to vector<2x512xf32>
    %248 = arith.addf %245, %247 : vector<2x512xf32>
    %cst_206 = arith.constant 0.000000e+00 : f32
    %249 = vector.broadcast %cst_206 : f32 to vector<2x512xf32>
    %250 = arith.maximumf %248, %249 : vector<2x512xf32>
    %c0_207 = arith.constant 0 : index
    %c0_208 = arith.constant 0 : index
    %251 = vector.load %arg20[%c0_207, %c0_208] : memref<512x128xbf16, #tpu.memory_space<vmem>>, vector<512x128xbf16>
    %252 = arith.extf %251 : vector<512x128xbf16> to vector<512x128xf32>
    %cst_209 = arith.constant dense<0.000000e+00> : vector<2x128xf32>
    %253 = tpu.matmul %250, %252, %cst_209 {dimension_numbers = #tpu.dot_dimension_numbers<[1], [0], [0], [1], [0, 0, 1, 1], [], []>} : vector<2x512xf32>, vector<512x128xf32>, vector<2x128xf32> -> vector<2x128xf32>
    %c0_210 = arith.constant 0 : index
    %c0_211 = arith.constant 0 : index
    %254 = vector.load %arg21[%c0_210, %c0_211] : memref<1x128xf32, #tpu.memory_space<vmem>>, vector<1x128xf32>
    %255 = vector.broadcast %254 : vector<1x128xf32> to vector<2x128xf32>
    %256 = arith.addf %253, %255 : vector<2x128xf32>
    %cst_212 = arith.constant 0.000000e+00 : f32
    %257 = vector.broadcast %cst_212 : f32 to vector<2x128xf32>
    %258 = arith.maximumf %256, %257 : vector<2x128xf32>
    %c0_213 = arith.constant 0 : index
    %c0_214 = arith.constant 0 : index
    %259 = vector.load %arg22[%c0_213, %c0_214] : memref<128x64xbf16, #tpu.memory_space<vmem>>, vector<128x64xbf16>
    %260 = arith.extf %259 : vector<128x64xbf16> to vector<128x64xf32>
    %cst_215 = arith.constant dense<0.000000e+00> : vector<2x64xf32>
    %261 = tpu.matmul %258, %260, %cst_215 {dimension_numbers = #tpu.dot_dimension_numbers<[1], [0], [0], [1], [0, 0, 1, 1], [], []>} : vector<2x128xf32>, vector<128x64xf32>, vector<2x64xf32> -> vector<2x64xf32>
    %c0_216 = arith.constant 0 : index
    %c0_217 = arith.constant 0 : index
    %262 = vector.load %arg23[%c0_216, %c0_217] : memref<1x64xf32, #tpu.memory_space<vmem>>, vector<1x64xf32>
    %263 = vector.broadcast %262 : vector<1x64xf32> to vector<2x64xf32>
    %264 = arith.addf %261, %263 : vector<2x64xf32>
    %cst_218 = arith.constant 0.000000e+00 : f32
    %265 = vector.broadcast %cst_218 : f32 to vector<2x64xf32>
    %266 = arith.maximumf %264, %265 : vector<2x64xf32>
    %c0_219 = arith.constant 0 : index
    %c0_220 = arith.constant 0 : index
    %267 = vector.load %arg24[%c0_219, %c0_220] : memref<64x16xbf16, #tpu.memory_space<vmem>>, vector<64x16xbf16>
    %268 = arith.extf %267 : vector<64x16xbf16> to vector<64x16xf32>
    %cst_221 = arith.constant dense<0.000000e+00> : vector<2x16xf32>
    %269 = tpu.matmul %266, %268, %cst_221 {dimension_numbers = #tpu.dot_dimension_numbers<[1], [0], [0], [1], [0, 0, 1, 1], [], []>} : vector<2x64xf32>, vector<64x16xf32>, vector<2x16xf32> -> vector<2x16xf32>
    %c0_222 = arith.constant 0 : index
    %c0_223 = arith.constant 0 : index
    %270 = vector.load %arg25[%c0_222, %c0_223] : memref<1x16xf32, #tpu.memory_space<vmem>>, vector<1x16xf32>
    %271 = vector.broadcast %270 : vector<1x16xf32> to vector<2x16xf32>
    %272 = arith.addf %269, %271 : vector<2x16xf32>
    %c0_224 = arith.constant 0 : index
    %c0_225 = arith.constant 0 : index
    %273 = vector.load %arg26[%c0_224, %c0_225] : memref<2x16xf32, #tpu.memory_space<vmem>>, vector<2x16xf32>
    tpu.vector_store %arg26[%c0_224, %c0_225], %272 {strides = array<i32>} : memref<2x16xf32, #tpu.memory_space<vmem>>, vector<2x16xf32>,
    return
  }
}

</mosaic_0001>

<bundles_post_ra>
// kernel: pixel_encoder_forward.1
= control target key start
LH: loop header
LB: loop body
LE: loop exit
PB: predicated region body
PF: predicated region fallthrough
CT: control target
= control target key end

     0   :  { %s10166_s0 = inlined_call_operand.vmem [shape: f32[128,27], index: 0, kind: input, shape index: {}]   ;;  %s10167_s1 = inlined_call_operand.vmem [shape: bf16[27,32], index: 1, kind: input, shape index: {}]   ;;  %s10168_s2 = inlined_call_operand.vmem [shape: f32[1,32], index: 2, kind: input, shape index: {}]   ;;  %s10169_s3 = inlined_call_operand.vmem [shape: bf16[9,32,128], index: 3, kind: input, shape index: {}]   ;;  %s10170_s4 = inlined_call_operand.vmem [shape: bf16[9,32,64], index: 4, kind: input, shape index: {}]   ;;  %s10171_s5 = inlined_call_operand.vmem [shape: f32[1,64], index: 5, kind: input, shape index: {}]   ;;  %s10172_s6 = inlined_call_operand.vmem [shape: bf16[9,8,32], index: 6, kind: input, shape index: {}]   ;;  %s10173_s7 = inlined_call_operand.vmem [shape: bf16[9,64,128], index: 7, kind: input, shape index: {}]   ;;  %s10174_s8 = inlined_call_operand.vmem [shape: f32[1,128], index: 8, kind: input, shape index: {}]   ;;  %s10175_s9 = inlined_call_operand.vmem [shape: bf16[4,2,8], index: 9, kind: input, shape index: {}]   ;;  %s10176_s10 = inlined_call_operand.vmem [shape: bf16[4,128,256], index: 10, kind: input, shape index: {}]   ;;  %s10177_s11 = inlined_call_operand.vmem [shape: f32[1,256], index: 11, kind: input, shape index: {}]   ;;  %s10178_s12 = inlined_call_operand.vmem [shape: bf16[256,256], index: 12, kind: input, shape index: {}]   ;;  %s10179_s13 = inlined_call_operand.vmem [shape: f32[1,256], index: 13, kind: input, shape index: {}]   ;;  %s10180_s14 = inlined_call_operand.vmem [shape: bf16[256,256], index: 14, kind: input, shape index: {}]   ;;  %s10181_s15 = inlined_call_operand.vmem [shape: f32[1,256], index: 15, kind: input, shape index: {}]   ;;  %s10182_s16 = inlined_call_operand.vmem [shape: bf16[256,256], index: 16, kind: input, shape index: {}]   ;;  %s10183_s17 = inlined_call_operand.vmem [shape: f32[1,256], index: 17, kind: input, shape index: {}]   ;;  %s10184_s18 = inlined_call_operand.vmem [shape: bf16[256,512], index: 18, kind: input, shape index: {}]   ;;  %s10185_s19 = inlined_call_operand.vmem [shape: f32[1,512], index: 19, kind: input, shape index: {}]   ;;  %s10186_s20 = inlined_call_operand.vmem [shape: bf16[512,128], index: 20, kind: input, shape index: {}]   ;;  %s10187_s21 = inlined_call_operand.vmem [shape: f32[1,128], index: 21, kind: input, shape index: {}]   ;;  %s10188_s22 = inlined_call_operand.vmem [shape: bf16[128,64], index: 22, kind: input, shape index: {}]   ;;  %s10189_s23 = inlined_call_operand.vmem [shape: f32[1,64], index: 23, kind: input, shape index: {}]   ;;  %s10190_s24 = inlined_call_operand.vmem [shape: bf16[64,16], index: 24, kind: input, shape index: {}]   ;;  %s10191_s25 = inlined_call_operand.vmem [shape: f32[1,16], index: 25, kind: input, shape index: {}]   ;;  %s10192_s26 = inlined_call_operand.hbm [shape: f32[2,16], index: 26, kind: output, shape index: {}]  }
   0x1   :  { %10201 = sst [smem:[#allocation5_spill]] %s10166_s0 }
   0x2   :  { %10202 = sst [smem:[#allocation6_spill]] %s10167_s1 }
   0x3   :  { %10203 = sst [smem:[#allocation7_spill]] %s10168_s2 }
   0x4   :  { %10204 = sst [smem:[#allocation8_spill]] %s10169_s3 }
   0x5   :  { %10205 = sst [smem:[#allocation9_spill]] %s10170_s4 }
   0x6   :  { %10206 = sst [smem:[#allocation10_spill]] %s10171_s5 }
   0x7   :  { %10207 = sst [smem:[#allocation11_spill]] %s10172_s6 }
   0x8   :  { %10208 = sst [smem:[#allocation12_spill]] %s10173_s7 }
   0x9   :  { %10209 = sst [smem:[#allocation13_spill]] %s10174_s8 }
   0xa   :  { %10210 = sst [smem:[#allocation14_spill]] %s10175_s9 }
   0xb   :  { %10211 = sst [smem:[#allocation15_spill]] %s10176_s10 }
   0xc   :  { %s10212_s7 = sld [smem:[#allocation6_spill]]  ;;  %vm164_vm0 = vcmask 1042432   ;;  %vm115_vm1 = vcmask 220160  }
   0xd   :  { %s10213_s30 = sld [smem:[#allocation5_spill]] }
  0x12   :  { %v103_v0 = vld [vmem:[%s10212_s7 + $0xc] sm:$0x3]  ;;  %v102_v1 = vld [vmem:[%s10212_s7 + $0x8] sm:$0xf]  ;;  %v6154_v2 = vld [vmem:[%s10212_s7] sm:$0xff]  }
  0x13   :  { %v107_v3 = vunpack.c.l.bf16 %v103_v0  ;;  %v106_v4 = vunpack.c.l.bf16 %v102_v1  ;;  %v84_v5 = vld [vmem:[%s10213_s30] sm:$0xff]  ;;  %v6156_v6 = vunpack.c.h.bf16 %v6154_v2  ;;  %v6155_v7 = vunpack.c.l.bf16 %v6154_v2 }
  0x14   :  { %7241 = vmatprep.mubr.msk.f32.mxu0 %vm115_vm1, %v84_v5 }
  0x15   :  { %7233 = vmatprep.subr.msk.mxu0 %vm164_vm0, %v107_v3 }
  0x16   :  { %7234 = vmatpush3.msk.msra.mxu0 %vm164_vm0, %v107_v3 }
  0x17   :  { %7235 = vmatprep.subr.mxu0 %v106_v4 }
  0x18   :  { %7236 = vmatpush3.msra.mxu0 %v106_v4 }
  0x19   :  { %31 = vsyncpa [#allocation3], 0  ;;  %7237 = vmatprep.subr.mxu0 %v6156_v6  ;;  %v85_v8 = vld [vmem:[%s10213_s30 + $0x8] sm:$0xff]  ;;  %v86_v9 = vld [vmem:[%s10213_s30 + $0x10] sm:$0xff]  ;;  %s10214_s1 = sld [smem:[#allocation8_spill]]  ;;  %vm533_vm2 = vcmask 261120  }
  0x1a   :  { %7238 = vmatpush3.msra.mxu0 %v6156_v6  ;;  %v87_v10 = vld [vmem:[%s10213_s30 + $0x18] sm:$0xff]  ;;  %v88_v11 = vld [vmem:[%s10213_s30 + $0x20] sm:$0xff]  ;;  %v89_v12 = vld [vmem:[%s10213_s30 + $0x28] sm:$0xff]  ;;  %s10215_s28 = sld [smem:[#allocation7_spill]]  ;;  %vm8103_vm3 = vmmov 0   ;;  %vm2355_vm4 = vcmask 523264  }
  0x1b   :  { %7239 = vmatprep.subr.mxu0 %v6155_v7  ;;  %v90_v13 = vld [vmem:[%s10213_s30 + $0x30] sm:$0xff]  ;;  %v91_v14 = vld [vmem:[%s10213_s30 + $0x38] sm:$0xff]  ;;  %v92_v15 = vld [vmem:[%s10213_s30 + $0x40] sm:$0xff]  ;;  %s10216_s29 = sld [smem:[#allocation9_spill]]  ;;  %vm3682_vm5 = vcmask 64512   ;;  %vm5868_vm6 = vcmask 123904  }
  0x1c   :  { %7240 = vmatpush3.msra.mxu0 %v6155_v7  ;;  %v93_v16 = vld [vmem:[%s10213_s30 + $0x48] sm:$0xff]  ;;  %v94_v17 = vld [vmem:[%s10213_s30 + $0x50] sm:$0xff]  ;;  %v95_v18 = vld [vmem:[%s10213_s30 + $0x58] sm:$0xff]  ;;  %s10217_s9 = sld [smem:[#allocation12_spill]] }
  0x1d   :  { %7242 = vmatmul.mubr.msk.f32.vlgmr.msra.gmra.mxu0 %vm115_vm1, %v85_v8  ;;  %v96_v19 = vld [vmem:[%s10213_s30 + $0x60] sm:$0xff]  ;;  %v97_v20 = vld [vmem:[%s10213_s30 + $0x68] sm:$0xff]  ;;  %v98_v21 = vld [vmem:[%s10213_s30 + $0x70] sm:$0xff]  ;;  %s10219_s4 = sld [smem:[#allocation11_spill]] }
  0x1e   :  { %7244 = vmatprep.mubr.msk.f32.mxu0 %vm115_vm1, %v86_v9  ;;  %v99_v22 = vld [vmem:[%s10213_s30 + $0x78] sm:$0xff]  ;;  %s10220_s3 = sld [smem:[#allocation15_spill]] }
  0x1f   :  { %v8316_v23 = vld [vmem:[%s10214_s1] sm:$0xff]   ;;  %v8321_v24 = vld [vmem:[%s10214_s1 + $0x10] sm:$0xff]  }
  0x20   :  { %v6159_v25 = vunpack.c.l.bf16 %v8316_v23  ;;  %v6175_v26 = vunpack.c.l.bf16 %v8321_v24  ;;  %v8338_v41 = vld [vmem:[%s10215_s28] ss:$0 sm:$0xff]  ;;  %s10218_s28 = sld [smem:[#allocation10_spill]] }
  0x21   :  { %7245 = vmatmul.mubr.msk.f32.gmra.mxu0 %vm115_vm1, %v87_v10 }
  0x22   :  { %7247 = vmatprep.mubr.msk.f32.mxu0 %vm115_vm1, %v88_v11  ;;  %7297 = vmatprep.mubr.f32.mxu1 %v6159_v25  ;;  %v6626_v11 = vld [vmem:[%s10216_s29 + $0x18] sm:$0xff]  }
  0x25   :  { %7248 = vmatmul.mubr.msk.f32.gmra.mxu0 %vm115_vm1, %v89_v12  ;;  %v6621_v12 = vld [vmem:[%s10214_s1 + $0x8] sm:$0xff]  }
  0x26   :  { %7250 = vmatprep.mubr.msk.f32.mxu0 %vm115_vm1, %v90_v13  ;;  %v6624_v13 = vld [vmem:[%s10214_s1 + $0x18] sm:$0xff]  }
  0x29   :  { %7251 = vmatmul.mubr.msk.f32.gmra.mxu0 %vm115_vm1, %v91_v14 }
  0x2a   :  { %7253 = vmatprep.mubr.msk.f32.mxu0 %vm115_vm1, %v92_v15  ;;  %v6160_v15 = vunpack.c.h.bf16 %v8316_v23 }
  0x2d   :  { %7254 = vmatmul.mubr.msk.f32.gmra.mxu0 %vm115_vm1, %v93_v16  ;;  %v6176_v16 = vunpack.c.h.bf16 %v8321_v24  ;;  %v6180_v24 = vunpack.c.h.bf16 %v6624_v13 }
  0x2e   :  { %7256 = vmatprep.mubr.msk.f32.mxu0 %vm115_vm1, %v94_v17  ;;  %v6622_v17 = vld [vmem:[%s10216_s29 + $0x8] sm:$0xff]  }
  0x2f   :  { %v6172_v23 = vunpack.c.h.bf16 %v6622_v17 }
  0x31   :  { %7257 = vmatmul.mubr.msk.f32.gmra.mxu0 %vm115_vm1, %v95_v18  ;;  %v6188_v18 = vunpack.c.h.bf16 %v6626_v11 }
  0x32   :  { %7259 = vmatprep.mubr.msk.f32.mxu0 %vm115_vm1, %v96_v19  ;;  %v6163_v19 = vunpack.c.l.bf16 %v6621_v12 }
  0x35   :  { %7260 = vmatmul.mubr.msk.f32.gmra.mxu0 %vm115_vm1, %v97_v20  ;;  %v6625_v20 = vld [vmem:[%s10216_s29 + $0x10] sm:$0xff]  }
  0x36   :  { %7262 = vmatprep.mubr.msk.f32.mxu0 %vm115_vm1, %v98_v21  ;;  %v6179_v21 = vunpack.c.l.bf16 %v6624_v13  ;;  %v6184_v25 = vunpack.c.h.bf16 %v6625_v20 }
  0x39   :  { %7263 = vmatmul.mubr.msk.f32.gmra.mxu0 %vm115_vm1, %v99_v22  ;;  %v6187_v22 = vunpack.c.l.bf16 %v6626_v11 }
  0x3a   :  { %7335 = vmatprep.mubr.f32.mxu0 %v6175_v26  ;;  %v6164_v26 = vunpack.c.h.bf16 %v6621_v12 }
  0xdd   :  { %v8325_v27 = vpop.f32.mrf.mxu0 }
  0xde   :  { %v240_v6 = vadd.f32 %v8325_v27, %v8338_v41  ;;  %v6166_v27 = vld [vmem:[%s10216_s29] sm:$0xff]  }
  0xdf   :  { %v8327_v28 = vpop.f32.mrf.mxu0 }
  0xe0   :  { %v235_v8 = vadd.f32 %v8338_v41, %v8327_v28  ;;  %v8441_v10 = vmax.f32 %v240_v6, 0.0  ;;  %v6183_v28 = vunpack.c.l.bf16 %v6625_v20 }
  0xe1   :  { %v8329_v29 = vpop.f32.mrf.mxu0 }
  0xe2   :  { %v250_v2 = vadd.f32 %v8329_v29, %v8338_v41  ;;  %v8456_v14 = vmax.f32 %v235_v8, 0.0  ;;  %v6171_v29 = vunpack.c.l.bf16 %v6622_v17 }
  0xe3   :  { %v8331_v30 = vpop.f32.mrf.mxu0 }
  0xe4   :  { %v245_v4 = vadd.f32 %v8338_v41, %v8331_v30  ;;  %v8427_v7 = vmax.f32 %v250_v2, 0.0  ;;  %v6168_v30 = vunpack.c.h.bf16 %v6166_v27 }
  0xe5   :  { %v7249_v31 = vpop.f32.mrf.mxu0 }
  0xe6   :  { %v260_v62 = vadd.f32 %v7249_v31, %v8338_v41  ;;  %v8435_v9 = vmax.f32 %v245_v4, 0.0  ;;  %v6167_v31 = vunpack.c.l.bf16 %v6166_v27  ;;  %v6632_v27 = vld [vmem:[%s10214_s1 + $0x38] sm:$0xff]  }
  0xe7   :  { %v8333_v32 = vpop.f32.mrf.mxu0 }
  0xe8   :  { %v255_v0 = vadd.f32 %v8338_v41, %v8333_v32  ;;  %v8411_v3 = vmax.f32 %v260_v62, 0.0  ;;  %v6630_v32 = vld [vmem:[%s10216_s29 + $0x28] sm:$0xff]  }
  0xe9   :  { %v7252_v33 = vpop.f32.mrf.mxu0 }
  0xea   :  { %v270_v58 = vadd.f32 %v7252_v33, %v8338_v41  ;;  %v8419_v5 = vmax.f32 %v255_v0, 0.0  ;;  %v6204_v33 = vunpack.c.h.bf16 %v6630_v32 }
  0xeb   :  { %v264_v34 = vpop.f32.mrf.mxu0 }
  0xec   :  { %v265_v60 = vadd.f32 %v8338_v41, %v264_v34  ;;  %v8395_v63 = vmax.f32 %v270_v58, 0.0 }
  0xed   :  { %v7255_v35 = vpop.f32.mrf.mxu0 }
  0xee   :  { %v280_v54 = vadd.f32 %v7255_v35, %v8338_v41  ;;  %v8403_v1 = vmax.f32 %v265_v60, 0.0  ;;  %v6633_v60 = vld [vmem:[%s10216_s29 + $0x30] sm:$0xff]  }
  0xef   :  { %v274_v36 = vpop.f32.mrf.mxu0  ;;  %v6216_v2 = vunpack.c.h.bf16 %v6633_v60  ;;  %v6215_v4 = vunpack.c.l.bf16 %v6633_v60  ;;  %v6636_v60 = vld [vmem:[%s10214_s1 + $0x48] sm:$0xff]  }
  0xf0   :  { %v275_v56 = vadd.f32 %v8338_v41, %v274_v36  ;;  %v8381_v59 = vmax.f32 %v280_v54, 0.0  ;;  %v6629_v36 = vld [vmem:[%s10216_s29 + $0x20] sm:$0xff]  }
  0xf1   :  { %v7258_v37 = vpop.f32.mrf.mxu0 }
  0xf2   :  { %v290_v50 = vadd.f32 %v7258_v37, %v8338_v41  ;;  %v8388_v61 = vmax.f32 %v275_v56, 0.0 }
  0xf3   :  { %v284_v38 = vpop.f32.mrf.mxu0 }
  0xf4   :  { %v285_v52 = vadd.f32 %v8338_v41, %v284_v38  ;;  %v8367_v55 = vmax.f32 %v290_v50, 0.0  ;;  %v6634_v50 = vld [vmem:[%s10216_s29 + $0x38] sm:$0xff]  }
  0xf5   :  { %v7261_v39 = vpop.f32.mrf.mxu0  ;;  %v6220_v56 = vunpack.c.h.bf16 %v6634_v50  ;;  %v6219_v62 = vunpack.c.l.bf16 %v6634_v50  ;;  %v6635_v50 = vld [vmem:[%s10214_s1 + $0x40] sm:$0xff]  }
  0xf6   :  { %v300_v45 = vadd.f32 %v7261_v39, %v8338_v41  ;;  %v8374_v57 = vmax.f32 %v285_v52, 0.0  ;;  %v6203_v39 = vunpack.c.l.bf16 %v6630_v32  ;;  %v6628_v52 = vld [vmem:[%s10214_s1 + $0x28] sm:$0xff]  }
  0xf7   :  { %v294_v40 = vpop.f32.mrf.mxu0  ;;  %v6195_v58 = vunpack.c.l.bf16 %v6628_v52  ;;  %v6196_v0 = vunpack.c.h.bf16 %v6628_v52 }
  0xf8   :  { %v295_v48 = vadd.f32 %v8338_v41, %v294_v40  ;;  %v8353_v51 = vmax.f32 %v300_v45, 0.0  ;;  %v6200_v40 = vunpack.c.h.bf16 %v6629_v36  ;;  %v6627_v45 = vld [vmem:[%s10214_s1 + $0x20] sm:$0xff]  }
  0xf9   :  { %v7264_v42 = vpop.f32.mrf.mxu0  ;;  %v6192_v54 = vunpack.c.h.bf16 %v6627_v45 }
  0xfa   :  { %v310_v43 = vadd.f32 %v7264_v42, %v8338_v41  ;;  %v8360_v53 = vmax.f32 %v295_v48, 0.0  ;;  %v6191_v48 = vunpack.c.l.bf16 %v6627_v45 }
  0xfb   :  { %v304_v44 = vpop.f32.mrf.mxu0 }
  0xfc   :  { %v8342_v46 = vmax.f32 %v310_v43, 0.0  ;;  %v305_v47 = vadd.f32 %v8338_v41, %v304_v44  ;;  %v6199_v41 = vunpack.c.l.bf16 %v6629_v36 }
  0xfe   :  { %v8346_v49 = vmax.f32 %v305_v47, 0.0  ;;  %7265 = vmatprep.subr.mxu1 %v8342_v46  ;;  %7303 = vmatprep.subr.mxu0 %v8342_v46 }
  0xff   :  { %7266 = vmatpush3.msra.mxu1 %v8342_v46  ;;  %7304 = vmatpush3.msra.mxu0 %v8342_v46 }
 0x100   :  { %7267 = vmatprep.subr.mxu1 %v8346_v49  ;;  %7305 = vmatprep.subr.mxu0 %v8346_v49 }
 0x101   :  { %7268 = vmatpush3.msra.mxu1 %v8346_v49  ;;  %7306 = vmatpush3.msra.mxu0 %v8346_v49 }
 0x102   :  { %7269 = vmatprep.subr.mxu1 %v8353_v51  ;;  %7307 = vmatprep.subr.mxu0 %v8353_v51 }
 0x103   :  { %7270 = vmatpush3.msra.mxu1 %v8353_v51  ;;  %7308 = vmatpush3.msra.mxu0 %v8353_v51 }
 0x104   :  { %7271 = vmatprep.subr.mxu1 %v8360_v53  ;;  %7309 = vmatprep.subr.mxu0 %v8360_v53 }
 0x105   :  { %7272 = vmatpush3.msra.mxu1 %v8360_v53  ;;  %7310 = vmatpush3.msra.mxu0 %v8360_v53 }
 0x106   :  { %7273 = vmatprep.subr.mxu1 %v8367_v55  ;;  %7311 = vmatprep.subr.mxu0 %v8367_v55 }
 0x107   :  { %7274 = vmatpush3.msra.mxu1 %v8367_v55  ;;  %7312 = vmatpush3.msra.mxu0 %v8367_v55 }
 0x108   :  { %7275 = vmatprep.subr.mxu1 %v8374_v57  ;;  %7313 = vmatprep.subr.mxu0 %v8374_v57 }
 0x109   :  { %7276 = vmatpush3.msra.mxu1 %v8374_v57  ;;  %7314 = vmatpush3.msra.mxu0 %v8374_v57 }
 0x10a   :  { %7277 = vmatprep.subr.mxu1 %v8381_v59  ;;  %7315 = vmatprep.subr.mxu0 %v8381_v59 }
 0x10b   :  { %7278 = vmatpush3.msra.mxu1 %v8381_v59  ;;  %7316 = vmatpush3.msra.mxu0 %v8381_v59 }
 0x10c   :  { %7279 = vmatprep.subr.mxu1 %v8388_v61  ;;  %7317 = vmatprep.subr.mxu0 %v8388_v61 }
 0x10d   :  { %7280 = vmatpush3.msra.mxu1 %v8388_v61  ;;  %7318 = vmatpush3.msra.mxu0 %v8388_v61 }
 0x10e   :  { %7281 = vmatprep.subr.mxu1 %v8395_v63  ;;  %7319 = vmatprep.subr.mxu0 %v8395_v63 }
 0x10f   :  { %7282 = vmatpush3.msra.mxu1 %v8395_v63  ;;  %7320 = vmatpush3.msra.mxu0 %v8395_v63 }
 0x110   :  { %7283 = vmatprep.subr.mxu1 %v8403_v1  ;;  %7321 = vmatprep.subr.mxu0 %v8403_v1 }
 0x111   :  { %7284 = vmatpush3.msra.mxu1 %v8403_v1  ;;  %7322 = vmatpush3.msra.mxu0 %v8403_v1 }
 0x112   :  { %7285 = vmatprep.subr.mxu1 %v8411_v3  ;;  %7323 = vmatprep.subr.mxu0 %v8411_v3 }
 0x113   :  { %7286 = vmatpush3.msra.mxu1 %v8411_v3  ;;  %7324 = vmatpush3.msra.mxu0 %v8411_v3 }
 0x114   :  { %7287 = vmatprep.subr.mxu1 %v8419_v5  ;;  %7325 = vmatprep.subr.mxu0 %v8419_v5 }
 0x115   :  { %7288 = vmatpush3.msra.mxu1 %v8419_v5  ;;  %7326 = vmatpush3.msra.mxu0 %v8419_v5 }
 0x116   :  { %7289 = vmatprep.subr.mxu1 %v8427_v7  ;;  %7327 = vmatprep.subr.mxu0 %v8427_v7 }
 0x117   :  { %7290 = vmatpush3.msra.mxu1 %v8427_v7  ;;  %7328 = vmatpush3.msra.mxu0 %v8427_v7 }
 0x118   :  { %7291 = vmatprep.subr.mxu1 %v8435_v9  ;;  %7329 = vmatprep.subr.mxu0 %v8435_v9 }
 0x119   :  { %7292 = vmatpush3.msra.mxu1 %v8435_v9  ;;  %7330 = vmatpush3.msra.mxu0 %v8435_v9 }
 0x11a   :  { %7293 = vmatprep.subr.mxu1 %v8441_v10  ;;  %7331 = vmatprep.subr.mxu0 %v8441_v10 }
 0x11b   :  { %7294 = vmatpush3.msra.mxu1 %v8441_v10  ;;  %7332 = vmatpush3.msra.mxu0 %v8441_v10 }
 0x11c   :  { %7295 = vmatprep.subr.mxu1 %v8456_v14  ;;  %7333 = vmatprep.subr.mxu0 %v8456_v14 }
 0x11d   :  { %7296 = vmatpush3.msra.mxu1 %v8456_v14  ;;  %7334 = vmatpush3.msra.mxu0 %v8456_v14 }
 0x11e   :  { %7298 = vmatmul.mubr.f32.vlgmr.msra.gmra.mxu1 %v6160_v15  ;;  %7336 = vmatmul.mubr.f32.vlgmr.msra.gmra.mxu0 %v6176_v16 }
 0x11f   :  { %7341 = vmatprep.subr.mxu1 %v6188_v18  ;;  %7300 = vmatprep.mubr.f32.mxu1 %v6163_v19 }
 0x120   :  { %7342 = vmatpush3.msra.mxu1 %v6188_v18  ;;  %7338 = vmatprep.mubr.f32.mxu0 %v6179_v21 }
 0x121   :  { %7343 = vmatprep.subr.mxu1 %v6187_v22  ;;  %7355 = vmatprep.subr.mxu0 %v6172_v23 }
 0x122   :  { %7344 = vmatpush3.msra.mxu1 %v6187_v22  ;;  %7339 = vmatmul.mubr.f32.gmra.mxu0 %v6180_v24  ;;  %v6631_v22 = vld [vmem:[%s10214_s1 + $0x30] sm:$0xff]  }
 0x123   :  { %7345 = vmatprep.subr.mxu1 %v6184_v25  ;;  %7301 = vmatmul.mubr.f32.gmra.mxu1 %v6164_v26  ;;  %v6207_v24 = vunpack.c.l.bf16 %v6631_v22  ;;  %v6638_v26 = vld [vmem:[%s10216_s29 + $0x48] sm:$0xff]  }
 0x124   :  { %7346 = vmatpush3.msra.mxu1 %v6184_v25  ;;  %7356 = vmatpush3.msra.mxu0 %v6172_v23  ;;  %v6235_v32 = vunpack.c.l.bf16 %v6638_v26 }
 0x125   :  { %7347 = vmatprep.subr.mxu1 %v6183_v28  ;;  %7357 = vmatprep.subr.mxu0 %v6171_v29 }
 0x126   :  { %7348 = vmatpush3.msra.mxu1 %v6183_v28  ;;  %7358 = vmatpush3.msra.mxu0 %v6171_v29  ;;  %v6208_v28 = vunpack.c.h.bf16 %v6631_v22  ;;  %v6236_v29 = vunpack.c.h.bf16 %v6638_v26 }
 0x127   :  { %7369 = vmatprep.subr.mxu1 %v8342_v46  ;;  %7359 = vmatprep.subr.mxu0 %v6168_v30 }
 0x128   :  { %7360 = vmatpush3.msra.mxu0 %v6168_v30  ;;  %v6211_v30 = vunpack.c.l.bf16 %v6632_v27 }
 0x129   :  { %7361 = vmatprep.subr.mxu0 %v6167_v31 }
 0x12a   :  { %7362 = vmatpush3.msra.mxu0 %v6167_v31  ;;  %v6637_v31 = vld [vmem:[%s10216_s29 + $0x40] sm:$0xff]  }
 0x12b   :  { %7407 = vmatprep.subr.mxu0 %v6204_v33 }
 0x1de   :  { %v7299_v34 = vpop.f32.mrf.mxu1  ;;  %v7337_v35 = vpop.f32.mrf.mxu0 }
 0x1e0   :  { %v403_v37 = vpop.f32.mrf.mxu1  ;;  %v505_v38 = vpop.f32.mrf.mxu0 }
 0x1e1   :  { %7349 = vmatprep.mubr.msk.f32.mxu1 %vm533_vm2, %v505_v38  ;;  %7363 = vmatprep.mubr.msk.f32.mxu0 %vm533_vm2, %v403_v37 }
 0x1e2   :  { %7350 = vmatmul.mubr.msk.f32.vlgmr.msra.gmra.mxu1 %vm533_vm2, %v7337_v35  ;;  %7364 = vmatmul.mubr.msk.f32.vlgmr.msra.gmra.mxu0 %vm533_vm2, %v7299_v34  ;;  %v7340_v42 = vpop.f32.mrf.mxu0  ;;  %v6232_v34 = vunpack.c.h.bf16 %v6637_v31  ;;  %v6231_v35 = vunpack.c.l.bf16 %v6637_v31 }
 0x1e3   :  { %7370 = vmatpush3.msra.mxu1 %v8342_v46  ;;  %7408 = vmatpush3.msra.mxu0 %v6204_v33  ;;  %v7302_v43 = vpop.f32.mrf.mxu1  ;;  %v6212_v33 = vunpack.c.h.bf16 %v6632_v27 }
 0x1e4   :  { %7371 = vmatprep.subr.mxu1 %v8346_v49  ;;  %7409 = vmatprep.subr.mxu0 %v6203_v39  ;;  %v515_v44 = vpop.f32.mrf.mxu0 }
 0x1e5   :  { %7372 = vmatpush3.msra.mxu1 %v8346_v49  ;;  %7410 = vmatpush3.msra.mxu0 %v6203_v39  ;;  %v413_v47 = vpop.f32.mrf.mxu1 }
 0x1e6   :  { %7373 = vmatprep.subr.mxu1 %v8353_v51  ;;  %7411 = vmatprep.subr.mxu0 %v6200_v40 }
 0x1e7   :  { %7374 = vmatpush3.msra.mxu1 %v8353_v51  ;;  %7412 = vmatpush3.msra.mxu0 %v6200_v40 }
 0x1e8   :  { %7375 = vmatprep.subr.mxu1 %v8360_v53  ;;  %7413 = vmatprep.subr.mxu0 %v6199_v41 }
 0x1e9   :  { %7376 = vmatpush3.msra.mxu1 %v8360_v53  ;;  %7414 = vmatpush3.msra.mxu0 %v6199_v41 }
 0x1ea   :  { %7377 = vmatprep.subr.mxu1 %v8367_v55  ;;  %7421 = vmatprep.subr.mxu0 %v8342_v46 }
 0x1eb   :  { %7378 = vmatpush3.msra.mxu1 %v8367_v55  ;;  %7352 = vmatprep.mubr.msk.f32.mxu1 %vm533_vm2, %v515_v44 }
 0x1ec   :  { %7379 = vmatprep.subr.mxu1 %v8374_v57  ;;  %7366 = vmatprep.mubr.msk.f32.mxu0 %vm533_vm2, %v413_v47 }
 0x1ed   :  { %7380 = vmatpush3.msra.mxu1 %v8374_v57  ;;  %7367 = vmatmul.mubr.msk.f32.gmra.mxu0 %vm533_vm2, %v7302_v43 }
 0x1ee   :  { %7381 = vmatprep.subr.mxu1 %v8381_v59  ;;  %7353 = vmatmul.mubr.msk.f32.gmra.mxu1 %vm533_vm2, %v7340_v42 }
 0x1ef   :  { %7382 = vmatpush3.msra.mxu1 %v8381_v59  ;;  %7401 = vmatprep.mubr.f32.mxu1 %v6191_v48 }
 0x1f0   :  { %7383 = vmatprep.subr.mxu1 %v8388_v61 }
 0x1f1   :  { %7384 = vmatpush3.msra.mxu1 %v8388_v61 }
 0x1f2   :  { %7385 = vmatprep.subr.mxu1 %v8395_v63 }
 0x1f3   :  { %7386 = vmatpush3.msra.mxu1 %v8395_v63 }
 0x1f4   :  { %7387 = vmatprep.subr.mxu1 %v8403_v1 }
 0x1f5   :  { %7388 = vmatpush3.msra.mxu1 %v8403_v1 }
 0x1f6   :  { %7389 = vmatprep.subr.mxu1 %v8411_v3 }
 0x1f7   :  { %7390 = vmatpush3.msra.mxu1 %v8411_v3 }
 0x1f8   :  { %7391 = vmatprep.subr.mxu1 %v8419_v5 }
 0x1f9   :  { %7392 = vmatpush3.msra.mxu1 %v8419_v5 }
 0x1fa   :  { %7393 = vmatprep.subr.mxu1 %v8427_v7 }
 0x1fb   :  { %7394 = vmatpush3.msra.mxu1 %v8427_v7 }
 0x1fc   :  { %7395 = vmatprep.subr.mxu1 %v8435_v9 }
 0x1fd   :  { %7396 = vmatpush3.msra.mxu1 %v8435_v9 }
 0x1fe   :  { %7397 = vmatprep.subr.mxu1 %v8441_v10 }
 0x1ff   :  { %7398 = vmatpush3.msra.mxu1 %v8441_v10 }
 0x200   :  { %7399 = vmatprep.subr.mxu1 %v8456_v14 }
 0x201   :  { %7400 = vmatpush3.msra.mxu1 %v8456_v14 }
 0x202   :  { %7402 = vmatmul.mubr.f32.vlgmr.msra.gmra.mxu1 %v6192_v54  ;;  %7459 = vmatprep.subr.mxu1 %v6220_v56  ;;  %v6223_v54 = vunpack.c.l.bf16 %v6635_v50 }
 0x203   :  { %7460 = vmatpush3.msra.mxu1 %v6220_v56  ;;  %7404 = vmatprep.mubr.f32.mxu1 %v6195_v58  ;;  %v6642_v58 = vld [vmem:[%s10216_s29 + $0x58] sm:$0xff]  }
 0x204   :  { %7461 = vmatprep.subr.mxu1 %v6219_v62 }
 0x205   :  { %7462 = vmatpush3.msra.mxu1 %v6219_v62  ;;  %v6224_v62 = vunpack.c.h.bf16 %v6635_v50  ;;  %v6643_v50 = vld [vmem:[%s10214_s1 + $0x60] sm:$0xff]  }
 0x206   :  { %7405 = vmatmul.mubr.f32.gmra.mxu1 %v6196_v0  ;;  %7463 = vmatprep.subr.mxu1 %v6216_v2  ;;  %v6252_v0 = vunpack.c.h.bf16 %v6642_v58 }
 0x207   :  { %7464 = vmatpush3.msra.mxu1 %v6216_v2  ;;  %v6227_v2 = vunpack.c.l.bf16 %v6636_v60 }
 0x208   :  { %7465 = vmatprep.subr.mxu1 %v6215_v4 }
 0x209   :  { %7466 = vmatpush3.msra.mxu1 %v6215_v4  ;;  %v6641_v4 = vld [vmem:[%s10216_s29 + $0x50] sm:$0xff]  }
 0x20a   :  { %7473 = vmatprep.subr.mxu1 %v8342_v46 }
 0x2a2   :  { %v7351_v6 = vpop.f32.mrf.mxu1  ;;  %v7365_v8 = vpop.f32.mrf.mxu0 }
 0x2a3   :  { %v8537_v11 = vadd.f32 %v7365_v8, %v7351_v6  ;;  %v6251_v6 = vunpack.c.l.bf16 %v6642_v58  ;;  %v6228_v8 = vunpack.c.h.bf16 %v6636_v60  ;;  %v6650_v58 = vld [vmem:[%s10216_s29 + $0x78] sm:$0xff]   ;;  %v6644_v60 = vld [vmem:[%s10214_s1 + $0x68] sm:$0xff]  }
 0x2a4   :  { %v612_v12 = vpop.f32.mrf.mxu1  ;;  %v709_v13 = vpop.f32.mrf.mxu0 }
 0x2a5   :  { %v8539_v15 = vadd.f32 %v709_v13, %v612_v12  ;;  %v6247_v12 = vunpack.c.l.bf16 %v6641_v4 }
 0x2ad   :  { %v7368_v17 = vpop.f32.mrf.mxu0 }
 0x2ae   :  { %v7354_v16 = vpop.f32.mrf.mxu1 }
 0x2af   :  { %v8541_v18 = vadd.f32 %v7368_v17, %v7354_v16  ;;  %v719_v36 = vpop.f32.mrf.mxu0 }
 0x2b0   :  { %v8543_v19 = vpop.f32.mrf.mxu1 }
 0x2b1   :  { %v720_v42 = vadd.f32 %v719_v36, %v8543_v19 }
 0x2c2   :  { %v7403_v20 = vpop.f32.mrf.mxu1 }
 0x2c4   :  { %v803_v21 = vpop.f32.mrf.mxu1 }
 0x2c5   :  { %7415 = vmatprep.mubr.msk.f32.mxu0 %vm533_vm2, %v803_v21 }
 0x2c6   :  { %v7406_v23 = vpop.f32.mrf.mxu1  ;;  %7416 = vmatmul.mubr.msk.f32.vlgmr.msra.gmra.mxu0 %vm533_vm2, %v7403_v20 }
 0x2c7   :  { %7422 = vmatpush3.msra.mxu0 %v8342_v46 }
 0x2c8   :  { %7423 = vmatprep.subr.mxu0 %v8346_v49  ;;  %v813_v25 = vpop.f32.mrf.mxu1 }
 0x2c9   :  { %7424 = vmatpush3.msra.mxu0 %v8346_v49  ;;  %7418 = vmatprep.mubr.msk.f32.mxu0 %vm533_vm2, %v813_v25 }
 0x2ca   :  { %7425 = vmatprep.subr.mxu0 %v8353_v51  ;;  %7419 = vmatmul.mubr.msk.f32.gmra.mxu0 %vm533_vm2, %v7406_v23 }
 0x2cb   :  { %7426 = vmatpush3.msra.mxu0 %v8353_v51  ;;  %7453 = vmatprep.mubr.f32.mxu0 %v6207_v24  ;;  %v6639_v24 = vld [vmem:[%s10214_s1 + $0x50] sm:$0xff]  }
 0x2cc   :  { %7427 = vmatprep.subr.mxu0 %v8360_v53  ;;  %v6239_v26 = vunpack.c.l.bf16 %v6639_v24 }
 0x2cd   :  { %7428 = vmatpush3.msra.mxu0 %v8360_v53 }
 0x2ce   :  { %7429 = vmatprep.subr.mxu0 %v8367_v55 }
 0x2cf   :  { %7430 = vmatpush3.msra.mxu0 %v8367_v55 }
 0x2d0   :  { %7431 = vmatprep.subr.mxu0 %v8374_v57 }
 0x2d1   :  { %7432 = vmatpush3.msra.mxu0 %v8374_v57 }
 0x2d2   :  { %7433 = vmatprep.subr.mxu0 %v8381_v59 }
 0x2d3   :  { %7434 = vmatpush3.msra.mxu0 %v8381_v59 }
 0x2d4   :  { %7435 = vmatprep.subr.mxu0 %v8388_v61 }
 0x2d5   :  { %7436 = vmatpush3.msra.mxu0 %v8388_v61 }
 0x2d6   :  { %7437 = vmatprep.subr.mxu0 %v8395_v63 }
 0x2d7   :  { %7438 = vmatpush3.msra.mxu0 %v8395_v63 }
 0x2d8   :  { %7439 = vmatprep.subr.mxu0 %v8403_v1 }
 0x2d9   :  { %7440 = vmatpush3.msra.mxu0 %v8403_v1 }
 0x2da   :  { %7441 = vmatprep.subr.mxu0 %v8411_v3 }
 0x2db   :  { %7442 = vmatpush3.msra.mxu0 %v8411_v3 }
 0x2dc   :  { %7443 = vmatprep.subr.mxu0 %v8419_v5 }
 0x2dd   :  { %7444 = vmatpush3.msra.mxu0 %v8419_v5 }
 0x2de   :  { %7445 = vmatprep.subr.mxu0 %v8427_v7 }
 0x2df   :  { %7446 = vmatpush3.msra.mxu0 %v8427_v7 }
 0x2e0   :  { %7447 = vmatprep.subr.mxu0 %v8435_v9 }
 0x2e1   :  { %7448 = vmatpush3.msra.mxu0 %v8435_v9 }
 0x2e2   :  { %7449 = vmatprep.subr.mxu0 %v8441_v10 }
 0x2e3   :  { %7450 = vmatpush3.msra.mxu0 %v8441_v10 }
 0x2e4   :  { %7451 = vmatprep.subr.mxu0 %v8456_v14 }
 0x2e5   :  { %7452 = vmatpush3.msra.mxu0 %v8456_v14 }
 0x2e6   :  { %7454 = vmatmul.mubr.f32.vlgmr.msra.gmra.mxu0 %v6208_v28  ;;  %7511 = vmatprep.subr.mxu0 %v6236_v29  ;;  %v6646_v28 = vld [vmem:[%s10216_s29 + $0x68] sm:$0xff]  }
 0x2e7   :  { %7512 = vmatpush3.msra.mxu0 %v6236_v29  ;;  %7456 = vmatprep.mubr.f32.mxu0 %v6211_v30  ;;  %v6640_v29 = vld [vmem:[%s10214_s1 + $0x58] sm:$0xff]   ;;  %v6240_v30 = vunpack.c.h.bf16 %v6639_v24  ;;  %v6268_v31 = vunpack.c.h.bf16 %v6646_v28  ;;  %v6647_v24 = vld [vmem:[%s10214_s1 + $0x70] sm:$0xff]  }
 0x2e8   :  { %7513 = vmatprep.subr.mxu0 %v6235_v32 }
 0x2e9   :  { %7514 = vmatpush3.msra.mxu0 %v6235_v32  ;;  %v6243_v32 = vunpack.c.l.bf16 %v6640_v29 }
 0x2ea   :  { %7457 = vmatmul.mubr.f32.gmra.mxu0 %v6212_v33  ;;  %7515 = vmatprep.subr.mxu0 %v6232_v34  ;;  %v6645_v33 = vld [vmem:[%s10216_s29 + $0x60] sm:$0xff]  }
 0x2eb   :  { %7516 = vmatpush3.msra.mxu0 %v6232_v34  ;;  %v6267_v34 = vunpack.c.l.bf16 %v6646_v28  ;;  %v6264_v36 = vunpack.c.h.bf16 %v6645_v33  ;;  %v6648_v28 = vld [vmem:[%s10214_s1 + $0x78] sm:$0xff]  }
 0x2ec   :  { %7517 = vmatprep.subr.mxu0 %v6231_v35 }
 0x2ed   :  { %7518 = vmatpush3.msra.mxu0 %v6231_v35  ;;  %v6244_v35 = vunpack.c.h.bf16 %v6640_v29  ;;  %v6272_v29 = vunpack.c.h.bf16 %v6647_v24 }
 0x2ee   :  { %7525 = vmatprep.subr.mxu0 %v8342_v46 }
 0x386   :  { %v7417_v37 = vpop.f32.mrf.mxu0 }
 0x387   :  { %v8594_v38 = vadd.f32 %v7417_v37, %v8537_v11  ;;  %v6248_v11 = vunpack.c.h.bf16 %v6641_v4  ;;  %v6263_v37 = vunpack.c.l.bf16 %v6645_v33  ;;  %v6649_v4 = vld [vmem:[%s10216_s29 + $0x70] sm:$0xff]  }
 0x388   :  { %v909_v39 = vpop.f32.mrf.mxu0 }
 0x389   :  { %v8597_v40 = vadd.f32 %v909_v39, %v8539_v15 }
 0x38a   :  { %v7420_v41 = vpop.f32.mrf.mxu0 }
 0x38b   :  { %v8601_v43 = vadd.f32 %v7420_v41, %v8541_v18 }
 0x38c   :  { %v919_v44 = vpop.f32.mrf.mxu0 }
 0x38d   :  { %v8603_v45 = vadd.f32 %v919_v44, %v720_v42 }
 0x3a6   :  { %v7455_v47 = vpop.f32.mrf.mxu0 }
 0x3a8   :  { %v1007_v48 = vpop.f32.mrf.mxu0 }
 0x3a9   :  { %7467 = vmatprep.mubr.msk.f32.mxu1 %vm533_vm2, %v1007_v48 }
 0x3aa   :  { %v7458_v52 = vpop.f32.mrf.mxu0  ;;  %7468 = vmatmul.mubr.msk.f32.vlgmr.msra.gmra.mxu1 %vm533_vm2, %v7455_v47 }
 0x3ab   :  { %7474 = vmatpush3.msra.mxu1 %v8342_v46 }
 0x3ac   :  { %7475 = vmatprep.subr.mxu1 %v8346_v49  ;;  %v1017_v56 = vpop.f32.mrf.mxu0 }
 0x3ad   :  { %7476 = vmatpush3.msra.mxu1 %v8346_v49  ;;  %7470 = vmatprep.mubr.msk.f32.mxu1 %vm533_vm2, %v1017_v56 }
 0x3ae   :  { %7477 = vmatprep.subr.mxu1 %v8353_v51  ;;  %7471 = vmatmul.mubr.msk.f32.gmra.mxu1 %vm533_vm2, %v7458_v52 }
 0x3af   :  { %7478 = vmatpush3.msra.mxu1 %v8353_v51  ;;  %7505 = vmatprep.mubr.f32.mxu1 %v6223_v54  ;;  %v6255_v54 = vunpack.c.l.bf16 %v6643_v50 }
 0x3b0   :  { %7479 = vmatprep.subr.mxu1 %v8360_v53 }
 0x3b1   :  { %7480 = vmatpush3.msra.mxu1 %v8360_v53 }
 0x3b2   :  { %7481 = vmatprep.subr.mxu1 %v8367_v55 }
 0x3b3   :  { %7482 = vmatpush3.msra.mxu1 %v8367_v55 }
 0x3b4   :  { %7483 = vmatprep.subr.mxu1 %v8374_v57 }
 0x3b5   :  { %7484 = vmatpush3.msra.mxu1 %v8374_v57 }
 0x3b6   :  { %7485 = vmatprep.subr.mxu1 %v8381_v59 }
 0x3b7   :  { %7486 = vmatpush3.msra.mxu1 %v8381_v59 }
 0x3b8   :  { %7487 = vmatprep.subr.mxu1 %v8388_v61 }
 0x3b9   :  { %7488 = vmatpush3.msra.mxu1 %v8388_v61 }
 0x3ba   :  { %7489 = vmatprep.subr.mxu1 %v8395_v63 }
 0x3bb   :  { %7490 = vmatpush3.msra.mxu1 %v8395_v63 }
 0x3bc   :  { %7491 = vmatprep.subr.mxu1 %v8403_v1 }
 0x3bd   :  { %7492 = vmatpush3.msra.mxu1 %v8403_v1 }
 0x3be   :  { %7493 = vmatprep.subr.mxu1 %v8411_v3 }
 0x3bf   :  { %7494 = vmatpush3.msra.mxu1 %v8411_v3 }
 0x3c0   :  { %7495 = vmatprep.subr.mxu1 %v8419_v5 }
 0x3c1   :  { %7496 = vmatpush3.msra.mxu1 %v8419_v5 }
 0x3c2   :  { %7497 = vmatprep.subr.mxu1 %v8427_v7 }
 0x3c3   :  { %7498 = vmatpush3.msra.mxu1 %v8427_v7 }
 0x3c4   :  { %7499 = vmatprep.subr.mxu1 %v8435_v9 }
 0x3c5   :  { %7500 = vmatpush3.msra.mxu1 %v8435_v9 }
 0x3c6   :  { %7501 = vmatprep.subr.mxu1 %v8441_v10 }
 0x3c7   :  { %7502 = vmatpush3.msra.mxu1 %v8441_v10 }
 0x3c8   :  { %7503 = vmatprep.subr.mxu1 %v8456_v14 }
 0x3c9   :  { %7504 = vmatpush3.msra.mxu1 %v8456_v14 }
 0x3ca   :  { %7506 = vmatmul.mubr.f32.vlgmr.msra.gmra.mxu1 %v6224_v62  ;;  %7563 = vmatprep.subr.mxu1 %v6252_v0  ;;  %v6256_v62 = vunpack.c.h.bf16 %v6643_v50 }
 0x3cb   :  { %7564 = vmatpush3.msra.mxu1 %v6252_v0  ;;  %7508 = vmatprep.mubr.f32.mxu1 %v6227_v2  ;;  %v6284_v0 = vunpack.c.h.bf16 %v6650_v58  ;;  %v6259_v2 = vunpack.c.l.bf16 %v6644_v60 }
 0x3cc   :  { %7565 = vmatprep.subr.mxu1 %v6251_v6 }
 0x3cd   :  { %7566 = vmatpush3.msra.mxu1 %v6251_v6  ;;  %v6283_v6 = vunpack.c.l.bf16 %v6650_v58  ;;  %v8102_v58 = vmov 0.0  }
 0x3ce   :  { %7509 = vmatmul.mubr.f32.gmra.mxu1 %v6228_v8  ;;  %7567 = vmatprep.subr.mxu1 %v6248_v11  ;;  %v6260_v8 = vunpack.c.h.bf16 %v6644_v60  ;;  %v6657_v60 = vld [vmem:[%s10217_s9 + $0x18] sm:$0xff]  }
 0x3cf   :  { %7568 = vmatpush3.msra.mxu1 %v6248_v11  ;;  %v6280_v11 = vunpack.c.h.bf16 %v6649_v4 }
 0x3d0   :  { %7569 = vmatprep.subr.mxu1 %v6247_v12 }
 0x3d1   :  { %7570 = vmatpush3.msra.mxu1 %v6247_v12  ;;  %v6279_v12 = vunpack.c.l.bf16 %v6649_v4 }
 0x3d2   :  { %7577 = vmatprep.subr.mxu1 %v8342_v46 }
 0x46a   :  { %v7469_v13 = vpop.f32.mrf.mxu1 }
 0x46b   :  { %v8654_v15 = vadd.f32 %v7469_v13, %v8594_v38 }
 0x46c   :  { %v1113_v16 = vpop.f32.mrf.mxu1 }
 0x46d   :  { %v8657_v17 = vadd.f32 %v1113_v16, %v8597_v40 }
 0x46e   :  { %v7472_v18 = vpop.f32.mrf.mxu1 }
 0x46f   :  { %v8660_v19 = vadd.f32 %v7472_v18, %v8601_v43 }
 0x470   :  { %v1123_v20 = vpop.f32.mrf.mxu1 }
 0x471   :  { %v8663_v21 = vadd.f32 %v1123_v20, %v8603_v45 }
 0x48a   :  { %v7507_v22 = vpop.f32.mrf.mxu1 }
 0x48c   :  { %v1211_v23 = vpop.f32.mrf.mxu1 }
 0x48d   :  { %7519 = vmatprep.mubr.msk.f32.mxu0 %vm533_vm2, %v1211_v23 }
 0x48e   :  { %v7510_v25 = vpop.f32.mrf.mxu1  ;;  %7520 = vmatmul.mubr.msk.f32.vlgmr.msra.gmra.mxu0 %vm533_vm2, %v7507_v22 }
 0x48f   :  { %7526 = vmatpush3.msra.mxu0 %v8342_v46 }
 0x490   :  { %7527 = vmatprep.subr.mxu0 %v8346_v49  ;;  %v1221_v27 = vpop.f32.mrf.mxu1 }
 0x491   :  { %7528 = vmatpush3.msra.mxu0 %v8346_v49  ;;  %7522 = vmatprep.mubr.msk.f32.mxu0 %vm533_vm2, %v1221_v27 }
 0x492   :  { %7529 = vmatprep.subr.mxu0 %v8353_v51  ;;  %7523 = vmatmul.mubr.msk.f32.gmra.mxu0 %vm533_vm2, %v7510_v25 }
 0x493   :  { %7530 = vmatpush3.msra.mxu0 %v8353_v51  ;;  %7557 = vmatprep.mubr.f32.mxu0 %v6239_v26  ;;  %v6271_v26 = vunpack.c.l.bf16 %v6647_v24 }
 0x494   :  { %7531 = vmatprep.subr.mxu0 %v8360_v53 }
 0x495   :  { %7532 = vmatpush3.msra.mxu0 %v8360_v53 }
 0x496   :  { %7533 = vmatprep.subr.mxu0 %v8367_v55 }
 0x497   :  { %7534 = vmatpush3.msra.mxu0 %v8367_v55 }
 0x498   :  { %7535 = vmatprep.subr.mxu0 %v8374_v57 }
 0x499   :  { %7536 = vmatpush3.msra.mxu0 %v8374_v57 }
 0x49a   :  { %7537 = vmatprep.subr.mxu0 %v8381_v59 }
 0x49b   :  { %7538 = vmatpush3.msra.mxu0 %v8381_v59 }
 0x49c   :  { %7539 = vmatprep.subr.mxu0 %v8388_v61 }
 0x49d   :  { %7540 = vmatpush3.msra.mxu0 %v8388_v61 }
 0x49e   :  { %7541 = vmatprep.subr.mxu0 %v8395_v63 }
 0x49f   :  { %7542 = vmatpush3.msra.mxu0 %v8395_v63 }
 0x4a0   :  { %7543 = vmatprep.subr.mxu0 %v8403_v1 }
 0x4a1   :  { %7544 = vmatpush3.msra.mxu0 %v8403_v1 }
 0x4a2   :  { %7545 = vmatprep.subr.mxu0 %v8411_v3 }
 0x4a3   :  { %7546 = vmatpush3.msra.mxu0 %v8411_v3 }
 0x4a4   :  { %7547 = vmatprep.subr.mxu0 %v8419_v5 }
 0x4a5   :  { %7548 = vmatpush3.msra.mxu0 %v8419_v5 }
 0x4a6   :  { %7549 = vmatprep.subr.mxu0 %v8427_v7 }
 0x4a7   :  { %7550 = vmatpush3.msra.mxu0 %v8427_v7 }
 0x4a8   :  { %7551 = vmatprep.subr.mxu0 %v8435_v9 }
 0x4a9   :  { %7552 = vmatpush3.msra.mxu0 %v8435_v9 }
 0x4aa   :  { %7553 = vmatprep.subr.mxu0 %v8441_v10 }
 0x4ab   :  { %7554 = vmatpush3.msra.mxu0 %v8441_v10 }
 0x4ac   :  { %7555 = vmatprep.subr.mxu0 %v8456_v14 }
 0x4ad   :  { %7556 = vmatpush3.msra.mxu0 %v8456_v14 }
 0x4ae   :  { %7558 = vmatmul.mubr.f32.vlgmr.msra.gmra.mxu0 %v6240_v30  ;;  %7615 = vmatprep.subr.mxu0 %v6268_v31  ;;  %v6275_v30 = vunpack.c.l.bf16 %v6648_v28 }
 0x4af   :  { %7616 = vmatpush3.msra.mxu0 %v6268_v31  ;;  %7560 = vmatprep.mubr.f32.mxu0 %v6243_v32  ;;  %v6276_v31 = vunpack.c.h.bf16 %v6648_v28 }
 0x4b0   :  { %7617 = vmatprep.subr.mxu0 %v6267_v34 }
 0x4b1   :  { %7618 = vmatpush3.msra.mxu0 %v6267_v34 }
 0x4b2   :  { %7561 = vmatmul.mubr.f32.gmra.mxu0 %v6244_v35  ;;  %7619 = vmatprep.subr.mxu0 %v6264_v36 }
 0x4b3   :  { %7620 = vmatpush3.msra.mxu0 %v6264_v36 }
 0x4b4   :  { %7621 = vmatprep.subr.mxu0 %v6263_v37 }
 0x4b5   :  { %7622 = vmatpush3.msra.mxu0 %v6263_v37 }
 0x4b6   :  { %7629 = vmatprep.subr.mxu0 %v8342_v46 }
 0x54e   :  { %v7521_v38 = vpop.f32.mrf.mxu0 }
 0x54f   :  { %v8714_v39 = vadd.f32 %v7521_v38, %v8654_v15 }
 0x550   :  { %v1317_v40 = vpop.f32.mrf.mxu0 }
 0x551   :  { %v8717_v41 = vadd.f32 %v1317_v40, %v8657_v17 }
 0x552   :  { %v7524_v42 = vpop.f32.mrf.mxu0 }
 0x553   :  { %v8720_v43 = vadd.f32 %v7524_v42, %v8660_v19  ;;  %v6651_v42 = vld [vmem:[%s10214_s1 + $0x80] sm:$0xff]  }
 0x554   :  { %v1327_v44 = vpop.f32.mrf.mxu0 }
 0x555   :  { %v8723_v45 = vadd.f32 %v1327_v44, %v8663_v21  ;;  %v6287_v44 = vunpack.c.l.bf16 %v6651_v42 }
 0x56e   :  { %v7559_v47 = vpop.f32.mrf.mxu0 }
 0x570   :  { %v1415_v48 = vpop.f32.mrf.mxu0 }
 0x571   :  { %7571 = vmatprep.mubr.msk.f32.mxu1 %vm533_vm2, %v1415_v48 }
 0x572   :  { %v7562_v52 = vpop.f32.mrf.mxu0  ;;  %7572 = vmatmul.mubr.msk.f32.vlgmr.msra.gmra.mxu1 %vm533_vm2, %v7559_v47 }
 0x573   :  { %7578 = vmatpush3.msra.mxu1 %v8342_v46 }
 0x574   :  { %7579 = vmatprep.subr.mxu1 %v8346_v49  ;;  %v1425_v56 = vpop.f32.mrf.mxu0 }
 0x575   :  { %7580 = vmatpush3.msra.mxu1 %v8346_v49  ;;  %7574 = vmatprep.mubr.msk.f32.mxu1 %vm533_vm2, %v1425_v56 }
 0x576   :  { %7581 = vmatprep.subr.mxu1 %v8353_v51  ;;  %7575 = vmatmul.mubr.msk.f32.gmra.mxu1 %vm533_vm2, %v7562_v52 }
 0x577   :  { %7582 = vmatpush3.msra.mxu1 %v8353_v51  ;;  %7609 = vmatprep.mubr.f32.mxu1 %v6255_v54 }
 0x578   :  { %7583 = vmatprep.subr.mxu1 %v8360_v53 }
 0x579   :  { %7584 = vmatpush3.msra.mxu1 %v8360_v53 }
 0x57a   :  { %7585 = vmatprep.subr.mxu1 %v8367_v55 }
 0x57b   :  { %7586 = vmatpush3.msra.mxu1 %v8367_v55 }
 0x57c   :  { %7587 = vmatprep.subr.mxu1 %v8374_v57 }
 0x57d   :  { %7588 = vmatpush3.msra.mxu1 %v8374_v57 }
 0x57e   :  { %7589 = vmatprep.subr.mxu1 %v8381_v59 }
 0x57f   :  { %7590 = vmatpush3.msra.mxu1 %v8381_v59 }
 0x580   :  { %7591 = vmatprep.subr.mxu1 %v8388_v61 }
 0x581   :  { %7592 = vmatpush3.msra.mxu1 %v8388_v61 }
 0x582   :  { %7593 = vmatprep.subr.mxu1 %v8395_v63 }
 0x583   :  { %7594 = vmatpush3.msra.mxu1 %v8395_v63 }
 0x584   :  { %7595 = vmatprep.subr.mxu1 %v8403_v1 }
 0x585   :  { %7596 = vmatpush3.msra.mxu1 %v8403_v1 }
 0x586   :  { %7597 = vmatprep.subr.mxu1 %v8411_v3 }
 0x587   :  { %7598 = vmatpush3.msra.mxu1 %v8411_v3 }
 0x588   :  { %7599 = vmatprep.subr.mxu1 %v8419_v5 }
 0x589   :  { %7600 = vmatpush3.msra.mxu1 %v8419_v5 }
 0x58a   :  { %7601 = vmatprep.subr.mxu1 %v8427_v7 }
 0x58b   :  { %7602 = vmatpush3.msra.mxu1 %v8427_v7 }
 0x58c   :  { %7603 = vmatprep.subr.mxu1 %v8435_v9 }
 0x58d   :  { %7604 = vmatpush3.msra.mxu1 %v8435_v9 }
 0x58e   :  { %7605 = vmatprep.subr.mxu1 %v8441_v10 }
 0x58f   :  { %7606 = vmatpush3.msra.mxu1 %v8441_v10 }
 0x590   :  { %7607 = vmatprep.subr.mxu1 %v8456_v14 }
 0x591   :  { %7608 = vmatpush3.msra.mxu1 %v8456_v14 }
 0x592   :  { %7610 = vmatmul.mubr.f32.vlgmr.msra.gmra.mxu1 %v6256_v62  ;;  %7667 = vmatprep.subr.mxu1 %v6284_v0  ;;  %v6656_v62 = vld [vmem:[%s10217_s9 + $0x10] sm:$0xff]  }
 0x593   :  { %7668 = vmatpush3.msra.mxu1 %v6284_v0  ;;  %7612 = vmatprep.mubr.f32.mxu1 %v6259_v2  ;;  %v6316_v0 = vunpack.c.h.bf16 %v6657_v60  ;;  %v6315_v2 = vunpack.c.l.bf16 %v6657_v60  ;;  %v6312_v4 = vunpack.c.h.bf16 %v6656_v62  ;;  %v6662_v60 = vld [vmem:[%s10217_s9 + $0x40] sm:$0xff]  }
 0x594   :  { %7669 = vmatprep.subr.mxu1 %v6283_v6 }
 0x595   :  { %7670 = vmatpush3.msra.mxu1 %v6283_v6  ;;  %v6655_v6 = vld [vmem:[%s10217_s9 + $0x8] sm:$0xff]  }
 0x596   :  { %7613 = vmatmul.mubr.f32.gmra.mxu1 %v6260_v8  ;;  %7671 = vmatprep.subr.mxu1 %v6280_v11  ;;  %v6311_v8 = vunpack.c.l.bf16 %v6656_v62  ;;  %v6668_v62 = vld [vmem:[%s10217_s9 + $0x70] sm:$0xff]  }
 0x597   :  { %7672 = vmatpush3.msra.mxu1 %v6280_v11  ;;  %v6308_v11 = vunpack.c.h.bf16 %v6655_v6 }
 0x598   :  { %7673 = vmatprep.subr.mxu1 %v6279_v12 }
 0x599   :  { %7674 = vmatpush3.msra.mxu1 %v6279_v12  ;;  %v8902_v12 = vld [vmem:[%s10217_s9] sm:$0xff]  }
 0x59a   :  { %7681 = vmatprep.subr.mxu1 %v8342_v46 }
 0x632   :  { %v7573_v13 = vpop.f32.mrf.mxu1 }
 0x633   :  { %v1541_v15 = vadd.f32 %v7573_v13, %v8714_v39  ;;  %v6307_v13 = vunpack.c.l.bf16 %v6655_v6  ;;  %v6359_v6 = vunpack.c.l.bf16 %v6668_v62 }
 0x634   :  { %v1521_v16 = vpop.f32.mrf.mxu1 }
 0x635   :  { %v1540_v17 = vadd.f32 %v1521_v16, %v8717_v41 }
 0x636   :  { %v7576_v18 = vpop.f32.mrf.mxu1 }
 0x637   :  { %v1543_v19 = vadd.f32 %v7576_v18, %v8720_v43 }
 0x638   :  { %v1531_v20 = vpop.f32.mrf.mxu1 }
 0x639   :  { %v1542_v21 = vadd.f32 %v1531_v20, %v8723_v45 }
 0x652   :  { %v7611_v22 = vpop.f32.mrf.mxu1 }
 0x654   :  { %v1619_v23 = vpop.f32.mrf.mxu1 }
 0x655   :  { %7623 = vmatprep.mubr.msk.f32.mxu0 %vm533_vm2, %v1619_v23 }
 0x656   :  { %v7614_v25 = vpop.f32.mrf.mxu1  ;;  %7624 = vmatmul.mubr.msk.f32.vlgmr.msra.gmra.mxu0 %vm533_vm2, %v7611_v22 }
 0x657   :  { %7630 = vmatpush3.msra.mxu0 %v8342_v46 }
 0x658   :  { %7631 = vmatprep.subr.mxu0 %v8346_v49  ;;  %v1629_v27 = vpop.f32.mrf.mxu1 }
 0x659   :  { %7632 = vmatpush3.msra.mxu0 %v8346_v49  ;;  %7626 = vmatprep.mubr.msk.f32.mxu0 %vm533_vm2, %v1629_v27 }
 0x65a   :  { %7633 = vmatprep.subr.mxu0 %v8353_v51  ;;  %7627 = vmatmul.mubr.msk.f32.gmra.mxu0 %vm533_vm2, %v7614_v25 }
 0x65b   :  { %7634 = vmatpush3.msra.mxu0 %v8353_v51  ;;  %7661 = vmatprep.mubr.f32.mxu0 %v6271_v26 }
 0x65c   :  { %7635 = vmatprep.subr.mxu0 %v8360_v53 }
 0x65d   :  { %7636 = vmatpush3.msra.mxu0 %v8360_v53 }
 0x65e   :  { %7637 = vmatprep.subr.mxu0 %v8367_v55 }
 0x65f   :  { %7638 = vmatpush3.msra.mxu0 %v8367_v55 }
 0x660   :  { %7639 = vmatprep.subr.mxu0 %v8374_v57 }
 0x661   :  { %7640 = vmatpush3.msra.mxu0 %v8374_v57 }
 0x662   :  { %7641 = vmatprep.subr.mxu0 %v8381_v59 }
 0x663   :  { %7642 = vmatpush3.msra.mxu0 %v8381_v59 }
 0x664   :  { %7643 = vmatprep.subr.mxu0 %v8388_v61 }
 0x665   :  { %7644 = vmatpush3.msra.mxu0 %v8388_v61 }
 0x666   :  { %7645 = vmatprep.subr.mxu0 %v8395_v63 }
 0x667   :  { %7646 = vmatpush3.msra.mxu0 %v8395_v63 }
 0x668   :  { %7647 = vmatprep.subr.mxu0 %v8403_v1 }
 0x669   :  { %7648 = vmatpush3.msra.mxu0 %v8403_v1 }
 0x66a   :  { %7649 = vmatprep.subr.mxu0 %v8411_v3 }
 0x66b   :  { %7650 = vmatpush3.msra.mxu0 %v8411_v3 }
 0x66c   :  { %7651 = vmatprep.subr.mxu0 %v8419_v5 }
 0x66d   :  { %7652 = vmatpush3.msra.mxu0 %v8419_v5 }
 0x66e   :  { %7653 = vmatprep.subr.mxu0 %v8427_v7 }
 0x66f   :  { %7654 = vmatpush3.msra.mxu0 %v8427_v7 }
 0x670   :  { %7655 = vmatprep.subr.mxu0 %v8435_v9 }
 0x671   :  { %7656 = vmatpush3.msra.mxu0 %v8435_v9 }
 0x672   :  { %7657 = vmatprep.subr.mxu0 %v8441_v10 }
 0x673   :  { %7658 = vmatpush3.msra.mxu0 %v8441_v10 }
 0x674   :  { %7659 = vmatprep.subr.mxu0 %v8456_v14 }
 0x675   :  { %7660 = vmatpush3.msra.mxu0 %v8456_v14 }
 0x676   :  { %7662 = vmatmul.mubr.f32.vlgmr.msra.gmra.mxu0 %v6272_v29 }
 0x677   :  { %7664 = vmatprep.mubr.f32.mxu0 %v6275_v30 }
 0x67a   :  { %7665 = vmatmul.mubr.f32.gmra.mxu0 %v6276_v31  ;;  %v2171_v31 = vld [vmem:[%s10219_s4] sm:$0xff]  }
 0x716   :  { %v7625_v32 = vpop.f32.mrf.mxu0 }
 0x717   :  { %v8818_v33 = vadd.f32 %v7625_v32, %v1541_v15  ;;  %v6304_v15 = vunpack.c.h.bf16 %v8902_v12 }
 0x718   :  { %v1725_v34 = vpop.f32.mrf.mxu0 }
 0x719   :  { %v8820_v35 = vadd.f32 %v1725_v34, %v1540_v17 }
 0x71a   :  { %v7628_v36 = vpop.f32.mrf.mxu0 }
 0x71b   :  { %v8822_v37 = vadd.f32 %v7628_v36, %v1543_v19  ;;  %v2264_v36 = vunpack.c.h.bf16 %v2171_v31 }
 0x71c   :  { %v1735_v38 = vpop.f32.mrf.mxu0 }
 0x71d   :  { %v8824_v39 = vadd.f32 %v1735_v38, %v1542_v21  ;;  %v6002_v21 = vld [vmem:[%s10218_s28] ss:$0 sm:$0xff]  ;;  %v6660_v38 = vld [vmem:[%s10217_s9 + $0x30] sm:$0xff]   ;;  %s10221_s28 = sld [smem:[#allocation13_spill]] }
 0x736   :  { %v7663_v40 = vpop.f32.mrf.mxu0 }
 0x738   :  { %v1823_v41 = vpop.f32.mrf.mxu0 }
 0x739   :  { %7675 = vmatprep.mubr.msk.f32.mxu1 %vm533_vm2, %v1823_v41  ;;  %v6327_v41 = vunpack.c.l.bf16 %v6660_v38 }
 0x73a   :  { %v7666_v43 = vpop.f32.mrf.mxu0  ;;  %7676 = vmatmul.mubr.msk.f32.vlgmr.msra.gmra.mxu1 %vm533_vm2, %v7663_v40  ;;  %v6328_v40 = vunpack.c.h.bf16 %v6660_v38 }
 0x73b   :  { %7682 = vmatpush3.msra.mxu1 %v8342_v46  ;;  %v6652_v46 = vld [vmem:[%s10214_s1 + $0x88] sm:$0xff]  }
 0x73c   :  { %7683 = vmatprep.subr.mxu1 %v8346_v49  ;;  %v1833_v45 = vpop.f32.mrf.mxu0 }
 0x73d   :  { %7684 = vmatpush3.msra.mxu1 %v8346_v49  ;;  %7678 = vmatprep.mubr.msk.f32.mxu1 %vm533_vm2, %v1833_v45  ;;  %v6288_v49 = vunpack.c.h.bf16 %v6651_v42  ;;  %v6303_v42 = vunpack.c.l.bf16 %v8902_v12 }
 0x73e   :  { %7685 = vmatprep.subr.mxu1 %v8353_v51  ;;  %7679 = vmatmul.mubr.msk.f32.gmra.mxu1 %vm533_vm2, %v7666_v43  ;;  %v6659_v43 = vld [vmem:[%s10217_s9 + $0x28] sm:$0xff]  }
 0x73f   :  { %7686 = vmatpush3.msra.mxu1 %v8353_v51  ;;  %7713 = vmatprep.mubr.f32.mxu1 %v6287_v44  ;;  %v6291_v51 = vunpack.c.l.bf16 %v6652_v46  ;;  %v6324_v44 = vunpack.c.h.bf16 %v6659_v43  ;;  %v6323_v45 = vunpack.c.l.bf16 %v6659_v43 }
 0x740   :  { %7687 = vmatprep.subr.mxu1 %v8360_v53 }
 0x741   :  { %7688 = vmatpush3.msra.mxu1 %v8360_v53  ;;  %v6292_v53 = vunpack.c.h.bf16 %v6652_v46  ;;  %v6658_v46 = vld [vmem:[%s10217_s9 + $0x20] sm:$0xff]  }
 0x742   :  { %7689 = vmatprep.subr.mxu1 %v8367_v55 }
 0x743   :  { %7690 = vmatpush3.msra.mxu1 %v8367_v55  ;;  %v6654_v55 = vld [vmem:[%s10216_s29 + $0x88] sm:$0xff]  }
 0x744   :  { %7691 = vmatprep.subr.mxu1 %v8374_v57 }
 0x745   :  { %7692 = vmatpush3.msra.mxu1 %v8374_v57  ;;  %v6300_v57 = vunpack.c.h.bf16 %v6654_v55 }
 0x746   :  { %7693 = vmatprep.subr.mxu1 %v8381_v59 }
 0x747   :  { %7694 = vmatpush3.msra.mxu1 %v8381_v59  ;;  %v6299_v59 = vunpack.c.l.bf16 %v6654_v55  ;;  %7719 = vmatprep.subr.mxu0 %v6300_v57 }
 0x748   :  { %7695 = vmatprep.subr.mxu1 %v8388_v61  ;;  %7720 = vmatpush3.msra.mxu0 %v6300_v57 }
 0x749   :  { %7696 = vmatpush3.msra.mxu1 %v8388_v61  ;;  %7721 = vmatprep.subr.mxu0 %v6299_v59  ;;  %v6653_v61 = vld [vmem:[%s10216_s29 + $0x80] sm:$0xff]   ;;  %s10222_s29 = sld [smem:[#allocation14_spill]] }
 0x74a   :  { %7697 = vmatprep.subr.mxu1 %v8395_v63  ;;  %7722 = vmatpush3.msra.mxu0 %v6299_v59 }
 0x74b   :  { %7698 = vmatpush3.msra.mxu1 %v8395_v63  ;;  %v6296_v63 = vunpack.c.h.bf16 %v6653_v61 }
 0x74c   :  { %7699 = vmatprep.subr.mxu1 %v8403_v1 }
 0x74d   :  { %7700 = vmatpush3.msra.mxu1 %v8403_v1  ;;  %7723 = vmatprep.subr.mxu0 %v6296_v63  ;;  %v6295_v1 = vunpack.c.l.bf16 %v6653_v61  ;;  %v6016_v61 = vld [vmem:[%s10219_s4 + $0x8] sm:$0xff]  }
 0x74e   :  { %7701 = vmatprep.subr.mxu1 %v8411_v3  ;;  %7724 = vmatpush3.msra.mxu0 %v6296_v63  ;;  %v2504_v63 = vunpack.c.l.bf16 %v6016_v61 }
 0x74f   :  { %7702 = vmatpush3.msra.mxu1 %v8411_v3  ;;  %7725 = vmatprep.subr.mxu0 %v6295_v1 }
 0x750   :  { %7703 = vmatprep.subr.mxu1 %v8419_v5  ;;  %7726 = vmatpush3.msra.mxu0 %v6295_v1  ;;  %v2671_v1 = vunpack.c.h.bf16 %v6016_v61 }
 0x751   :  { %7704 = vmatpush3.msra.mxu1 %v8419_v5  ;;  %7733 = vmatprep.subr.mxu0 %v8102_v58 }
 0x752   :  { %7705 = vmatprep.subr.mxu1 %v8427_v7 }
 0x753   :  { %7706 = vmatpush3.msra.mxu1 %v8427_v7 }
 0x754   :  { %7707 = vmatprep.subr.mxu1 %v8435_v9 }
 0x755   :  { %7708 = vmatpush3.msra.mxu1 %v8435_v9 }
 0x756   :  { %7709 = vmatprep.subr.mxu1 %v8441_v10 }
 0x757   :  { %7710 = vmatpush3.msra.mxu1 %v8441_v10 }
 0x758   :  { %7711 = vmatprep.subr.mxu1 %v8456_v14 }
 0x759   :  { %7712 = vmatpush3.msra.mxu1 %v8456_v14 }
 0x75a   :  { %7714 = vmatmul.mubr.f32.vlgmr.msra.gmra.mxu1 %v6288_v49  ;;  %7774 = vmatprep.subr.mxu1 %v8102_v58  ;;  %v6320_v49 = vunpack.c.h.bf16 %v6658_v46 }
 0x75b   :  { %7716 = vmatprep.mubr.f32.mxu1 %v6291_v51  ;;  %7775 = vmatpush3.msra.mxu1 %v6316_v0  ;;  %v6319_v51 = vunpack.c.l.bf16 %v6658_v46  ;;  %v6336_v0 = vunpack.c.h.bf16 %v6662_v60  ;;  %v6676_v46 = vld [vmem:[%s10217_s9 + $0xb0] sm:$0xff]  }
 0x75c   :  { %7776 = vmatprep.subr.mxu1 %v8102_v58 }
 0x75d   :  { %7777 = vmatpush3.msra.mxu1 %v6315_v2  ;;  %v6360_v2 = vunpack.c.h.bf16 %v6668_v62 }
 0x75e   :  { %7717 = vmatmul.mubr.f32.gmra.mxu1 %v6292_v53  ;;  %7778 = vmatprep.subr.mxu1 %v8102_v58 }
 0x75f   :  { %7790 = vmatprep.mubr.msk.f32.mxu1 %vm8103_vm3, %v8102_v58  ;;  %7779 = vmatpush3.msra.mxu1 %v6312_v4  ;;  %v6335_v4 = vunpack.c.l.bf16 %v6662_v60 }
 0x760   :  { %7780 = vmatprep.subr.mxu1 %v8102_v58 }
 0x761   :  { %7781 = vmatpush3.msra.mxu1 %v6311_v8  ;;  %v6667_v8 = vld [vmem:[%s10217_s9 + $0x68] sm:$0xff]  }
 0x762   :  { %7782 = vmatprep.subr.mxu1 %v8102_v58  ;;  %v6355_v12 = vunpack.c.l.bf16 %v6667_v8 }
 0x763   :  { %7783 = vmatpush3.msra.mxu1 %v6308_v11  ;;  %v6356_v11 = vunpack.c.h.bf16 %v6667_v8 }
 0x764   :  { %7784 = vmatprep.subr.mxu1 %v8102_v58 }
 0x765   :  { %7785 = vmatpush3.msra.mxu1 %v6307_v13  ;;  %v6666_v13 = vld [vmem:[%s10217_s9 + $0x60] sm:$0xff]  }
 0x766   :  { %7786 = vmatprep.subr.mxu1 %v8102_v58 }
 0x767   :  { %7787 = vmatpush3.msra.mxu1 %v6304_v15  ;;  %v6352_v15 = vunpack.c.h.bf16 %v6666_v13 }
 0x768   :  { %7788 = vmatprep.subr.mxu1 %v8102_v58 }
 0x769   :  { %7789 = vmatpush3.msra.mxu1 %v6303_v42 }
 0x76a   :  { %7804 = vmatprep.subr.mxu1 %v8102_v58 }
 0x7fa   :  { %v7677_v3 = vpop.f32.mrf.mxu1 }
 0x7fb   :  { %v1949_v5 = vadd.f32 %v7677_v3, %v8818_v33  ;;  %v2172_v33 = vunpack.c.l.bf16 %v2171_v31  ;;  %v6665_v3 = vld [vmem:[%s10217_s9 + $0x58] sm:$0xff]   ;;  %v6672_v31 = vld [vmem:[%s10217_s9 + $0x90] sm:$0xff]  }
 0x7fc   :  { %v1929_v7 = vpop.f32.mrf.mxu1  ;;  %v6375_v38 = vunpack.c.l.bf16 %v6672_v31 }
 0x7fd   :  { %v1948_v9 = vadd.f32 %v1929_v7, %v8820_v35  ;;  %v6661_v35 = vld [vmem:[%s10217_s9 + $0x38] sm:$0xff]   ;;  %v6347_v7 = vunpack.c.l.bf16 %v6665_v3 }
 0x7fe   :  { %v7680_v10 = vpop.f32.mrf.mxu1 }
 0x7ff   :  { %v1951_v14 = vadd.f32 %v7680_v10, %v8822_v37  ;;  %v6332_v37 = vunpack.c.h.bf16 %v6661_v35 }
 0x800   :  { %v1939_v47 = vpop.f32.mrf.mxu1 }
 0x801   :  { %v1950_v48 = vadd.f32 %v1939_v47, %v8824_v39  ;;  %v6331_v39 = vunpack.c.l.bf16 %v6661_v35  ;;  %v6663_v47 = vld [vmem:[%s10217_s9 + $0x48] sm:$0xff]  }
 0x81a   :  { %v7715_v50 = vpop.f32.mrf.mxu1 }
 0x81c   :  { %v2027_v52 = vpop.f32.mrf.mxu1 }
 0x81d   :  { %7727 = vmatprep.mubr.msk.f32.mxu0 %vm533_vm2, %v2027_v52 }
 0x81e   :  { %v7718_v54 = vpop.f32.mrf.mxu1  ;;  %7728 = vmatmul.mubr.msk.f32.vlgmr.msra.gmra.mxu0 %vm533_vm2, %v7715_v50  ;;  %v6340_v50 = vunpack.c.h.bf16 %v6663_v47 }
 0x820   :  { %v2037_v56 = vpop.f32.mrf.mxu1 }
 0x821   :  { %7730 = vmatprep.mubr.msk.f32.mxu0 %vm533_vm2, %v2037_v56 }
 0x822   :  { %7731 = vmatmul.mubr.msk.f32.gmra.mxu0 %vm533_vm2, %v7718_v54  ;;  %v6339_v54 = vunpack.c.l.bf16 %v6663_v47 }
 0x823   :  { %7741 = vmatprep.mubr.msk.f32.mxu0 %vm8103_vm3, %v8102_v58 }
 0x8de   :  { %v7729_v16 = vpop.f32.mrf.mxu0 }
 0x8df   :  { %v2153_v19 = vadd.f32 %v7729_v16, %v1949_v5  ;;  %v6348_v5 = vunpack.c.h.bf16 %v6665_v3  ;;  %v6351_v16 = vunpack.c.l.bf16 %v6666_v13 }
 0x8e0   :  { %v2133_v17 = vpop.f32.mrf.mxu0 }
 0x8e1   :  { %v2152_v23 = vadd.f32 %v2133_v17, %v1948_v9  ;;  %v2164_v26 = vadd.f32 %v6002_v21, %v2153_v19  ;;  %v6664_v9 = vld [vmem:[%s10217_s9 + $0x50] sm:$0xff]  }
 0x8e2   :  { %v7732_v18 = vpop.f32.mrf.mxu0  ;;  %v6344_v10 = vunpack.c.h.bf16 %v6664_v9 }
 0x8e3   :  { %v2155_v20 = vadd.f32 %v7732_v18, %v1951_v14  ;;  %v2163_v29 = vadd.f32 %v6002_v21, %v2152_v23  ;;  %v8921_v32 = vmax.f32 %v2164_v26, 0.0  ;;  %v6343_v14 = vunpack.c.l.bf16 %v6664_v9  ;;  %v6673_v26 = vld [vmem:[%s10217_s9 + $0x98] sm:$0xff]  }
 0x8e4   :  { %v2143_v22 = vpop.f32.mrf.mxu0 }
 0x8e5   :  { %v2166_v24 = vadd.f32 %v6002_v21, %v2155_v20  ;;  %v2154_v25 = vadd.f32 %v2143_v22, %v1950_v48  ;;  %v8925_v34 = vmax.f32 %v2163_v29, 0.0  ;;  %v6669_v48 = vld [vmem:[%s10217_s9 + $0x78] sm:$0xff]   ;;  %v6380_v29 = vunpack.c.h.bf16 %v6673_v26 }
 0x8e6   :  { %v6364_v52 = vunpack.c.h.bf16 %v6669_v48  ;;  %v6363_v56 = vunpack.c.l.bf16 %v6669_v48 }
 0x8e7   :  { %v8912_v27 = vmax.f32 %v2166_v24, 0.0  ;;  %v2165_v28 = vadd.f32 %v6002_v21, %v2154_v25  ;;  %v6038_v24 = vld [vmem:[%s10219_s4 + $0x10] sm:$0xff]  }
 0x8e8   :  { %v2838_v25 = vunpack.c.l.bf16 %v6038_v24 }
 0x8e9   :  { %v8914_v30 = vmax.f32 %v2165_v28, 0.0  ;;  %7734 = vmatpush3.msra.mxu0 %v8912_v27 }
 0x8ea   :  { %7735 = vmatprep.subr.mxu0 %v8102_v58 }
 0x8eb   :  { %7736 = vmatpush3.msra.mxu0 %v8914_v30 }
 0x8ec   :  { %7737 = vmatprep.subr.mxu0 %v8102_v58 }
 0x8ed   :  { %7738 = vmatpush3.msra.mxu0 %v8921_v32 }
 0x8ee   :  { %7739 = vmatprep.subr.mxu0 %v8102_v58 }
 0x8ef   :  { %7740 = vmatpush3.msra.mxu0 %v8925_v34 }
 0x8f0   :  { %7742 = vmatmul.mubr.msk.f32.vlgmr.msra.gmra.mxu0 %vm533_vm2, %v2172_v33  ;;  %7744 = vmatprep.subr.mxu0 %v8102_v58  ;;  %v6379_v33 = vunpack.c.l.bf16 %v6673_v26 }
 0x8f1   :  { %7745 = vmatpush3.msra.mxu0 %v8912_v27  ;;  %7752 = vmatprep.mubr.msk.f32.mxu0 %vm8103_vm3, %v8102_v58 }
 0x8f2   :  { %7746 = vmatprep.subr.mxu0 %v8102_v58 }
 0x8f3   :  { %7747 = vmatpush3.msra.mxu0 %v8914_v30 }
 0x8f4   :  { %7748 = vmatprep.subr.mxu0 %v8102_v58 }
 0x8f5   :  { %7749 = vmatpush3.msra.mxu0 %v8921_v32 }
 0x8f6   :  { %7750 = vmatprep.subr.mxu0 %v8102_v58 }
 0x8f7   :  { %7751 = vmatpush3.msra.mxu0 %v8925_v34 }
 0x8f8   :  { %7753 = vmatmul.mubr.msk.f32.vlgmr.msra.gmra.mxu0 %vm533_vm2, %v2264_v36  ;;  %7755 = vmatprep.subr.mxu0 %v8102_v58  ;;  %v6376_v36 = vunpack.c.h.bf16 %v6672_v31 }
 0x8f9   :  { %7756 = vmatpush3.msra.mxu0 %v6332_v37  ;;  %7771 = vmatprep.mubr.msk.f32.mxu0 %vm8103_vm3, %v8102_v58  ;;  %v3005_v37 = vunpack.c.h.bf16 %v6038_v24 }
 0x8fa   :  { %7757 = vmatprep.subr.mxu0 %v8102_v58 }
 0x8fb   :  { %7758 = vmatpush3.msra.mxu0 %v6331_v39  ;;  %v6671_v39 = vld [vmem:[%s10217_s9 + $0x88] sm:$0xff]  }
 0x8fc   :  { %7759 = vmatprep.subr.mxu0 %v8102_v58  ;;  %v6371_v43 = vunpack.c.l.bf16 %v6671_v39 }
 0x8fd   :  { %7760 = vmatpush3.msra.mxu0 %v6328_v40  ;;  %v6677_v40 = vld [vmem:[%s10217_s9 + $0xb8] sm:$0xff]  }
 0x8fe   :  { %7761 = vmatprep.subr.mxu0 %v8102_v58  ;;  %v6396_v42 = vunpack.c.h.bf16 %v6677_v40 }
 0x8ff   :  { %7762 = vmatpush3.msra.mxu0 %v6327_v41  ;;  %v6372_v41 = vunpack.c.h.bf16 %v6671_v39 }
 0x900   :  { %7763 = vmatprep.subr.mxu0 %v8102_v58 }
 0x901   :  { %7764 = vmatpush3.msra.mxu0 %v6324_v44  ;;  %v6395_v44 = vunpack.c.l.bf16 %v6677_v40 }
 0x902   :  { %7765 = vmatprep.subr.mxu0 %v8102_v58 }
 0x903   :  { %7766 = vmatpush3.msra.mxu0 %v6323_v45  ;;  %v6670_v45 = vld [vmem:[%s10217_s9 + $0x80] sm:$0xff]  }
 0x904   :  { %7767 = vmatprep.subr.mxu0 %v8102_v58 }
 0x905   :  { %7768 = vmatpush3.msra.mxu0 %v6320_v49  ;;  %v6368_v49 = vunpack.c.h.bf16 %v6670_v45 }
 0x906   :  { %7769 = vmatprep.subr.mxu0 %v8102_v58 }
 0x907   :  { %7770 = vmatpush3.msra.mxu0 %v6319_v51  ;;  %v6392_v51 = vunpack.c.h.bf16 %v6676_v46 }
 0x908   :  { %7793 = vmatprep.subr.mxu0 %v8102_v58 }
 0x9b0   :  { %v2242_v53 = vpop.f32.mrf.mxu0 }
 0x9b1   :  { %7791 = vmatmul.mubr.msk.f32.vlgmr.msra.gmra.mxu1 %vm2355_vm4, %v2242_v53  ;;  %v6367_v53 = vunpack.c.l.bf16 %v6670_v45 }
 0x9b2   :  { %v7743_v55 = vpop.f32.mrf.mxu0  ;;  %7820 = vmatprep.mubr.msk.f32.mxu1 %vm8103_vm3, %v8102_v58  ;;  %7805 = vmatpush3.msra.mxu1 %v6348_v5 }
 0x9b3   :  { %7806 = vmatprep.subr.mxu1 %v8102_v58  ;;  %v6391_v55 = vunpack.c.l.bf16 %v6676_v46 }
 0x9b4   :  { %7807 = vmatpush3.msra.mxu1 %v6347_v7 }
 0x9b5   :  { %7808 = vmatprep.subr.mxu1 %v8102_v58 }
 0x9b6   :  { %7809 = vmatpush3.msra.mxu1 %v6344_v10 }
 0x9b7   :  { %7810 = vmatprep.subr.mxu1 %v8102_v58 }
 0x9b8   :  { %v2334_v57 = vpop.f32.mrf.mxu0  ;;  %7811 = vmatpush3.msra.mxu1 %v6343_v14 }
 0x9b9   :  { %7772 = vmatmul.mubr.msk.f32.vlgmr.msra.gmra.mxu0 %vm2355_vm4, %v2334_v57  ;;  %7812 = vmatprep.subr.mxu1 %v8102_v58  ;;  %v6675_v57 = vld [vmem:[%s10217_s9 + $0xa8] sm:$0xff]  }
 0x9ba   :  { %7794 = vmatpush3.msra.mxu0 %v8912_v27  ;;  %v7754_v59 = vpop.f32.mrf.mxu0  ;;  %7801 = vmatprep.mubr.msk.f32.mxu0 %vm8103_vm3, %v8102_v58  ;;  %v6387_v61 = vunpack.c.l.bf16 %v6675_v57 }
 0x9bb   :  { %7795 = vmatprep.subr.mxu0 %v8102_v58  ;;  %7813 = vmatpush3.msra.mxu1 %v6340_v50  ;;  %v6388_v59 = vunpack.c.h.bf16 %v6675_v57 }
 0x9bc   :  { %7796 = vmatpush3.msra.mxu0 %v8914_v30  ;;  %7814 = vmatprep.subr.mxu1 %v8102_v58 }
 0x9bd   :  { %7797 = vmatprep.subr.mxu0 %v8102_v58  ;;  %7815 = vmatpush3.msra.mxu1 %v6339_v54 }
 0x9be   :  { %7798 = vmatpush3.msra.mxu0 %v8921_v32  ;;  %7816 = vmatprep.subr.mxu1 %v8102_v58 }
 0x9bf   :  { %7799 = vmatprep.subr.mxu0 %v8102_v58  ;;  %7817 = vmatpush3.msra.mxu1 %v6336_v0  ;;  %v6680_v0 = vld [vmem:[%s10217_s9 + $0xd0] sm:$0xff]  }
 0x9c0   :  { %7800 = vmatpush3.msra.mxu0 %v8925_v34  ;;  %7818 = vmatprep.subr.mxu1 %v8102_v58 }
 0x9c1   :  { %7802 = vmatmul.mubr.msk.f32.vlgmr.msra.gmra.mxu0 %vm533_vm2, %v2504_v63  ;;  %7823 = vmatprep.subr.mxu0 %v8102_v58  ;;  %v6674_v63 = vld [vmem:[%s10217_s9 + $0xa0] sm:$0xff]  }
 0x9c2   :  { %7824 = vmatpush3.msra.mxu0 %v8912_v27  ;;  %7831 = vmatprep.mubr.msk.f32.mxu0 %vm8103_vm3, %v8102_v58  ;;  %v6383_v3 = vunpack.c.l.bf16 %v6674_v63 }
 0x9c3   :  { %7825 = vmatprep.subr.mxu0 %v8102_v58  ;;  %7819 = vmatpush3.msra.mxu1 %v6335_v4 }
 0x9c4   :  { %7826 = vmatpush3.msra.mxu0 %v8914_v30  ;;  %7853 = vmatprep.subr.mxu1 %v8102_v58 }
 0x9c5   :  { %7827 = vmatprep.subr.mxu0 %v8102_v58 }
 0x9c6   :  { %7828 = vmatpush3.msra.mxu0 %v8921_v32 }
 0x9c7   :  { %7829 = vmatprep.subr.mxu0 %v8102_v58 }
 0x9c8   :  { %7830 = vmatpush3.msra.mxu0 %v8925_v34 }
 0x9c9   :  { %7832 = vmatmul.mubr.msk.f32.vlgmr.msra.gmra.mxu0 %vm533_vm2, %v2671_v1  ;;  %7834 = vmatprep.subr.mxu0 %v8102_v58  ;;  %v6384_v1 = vunpack.c.h.bf16 %v6674_v63 }
 0x9ca   :  { %7850 = vmatprep.mubr.msk.f32.mxu0 %vm8103_vm3, %v8102_v58  ;;  %7835 = vmatpush3.msra.mxu0 %v6364_v52  ;;  %v6060_v52 = vld [vmem:[%s10219_s4 + $0x18] sm:$0xff]  }
 0x9cb   :  { %7836 = vmatprep.subr.mxu0 %v8102_v58  ;;  %v3172_v54 = vunpack.c.l.bf16 %v6060_v52  ;;  %v3339_v8 = vunpack.c.h.bf16 %v6060_v52 }
 0x9cc   :  { %7837 = vmatpush3.msra.mxu0 %v6363_v56  ;;  %v6681_v56 = vld [vmem:[%s10217_s9 + $0xd8] sm:$0xff]  }
 0x9cd   :  { %7838 = vmatprep.subr.mxu0 %v8102_v58  ;;  %v6412_v62 = vunpack.c.h.bf16 %v6681_v56 }
 0x9ce   :  { %7839 = vmatpush3.msra.mxu0 %v6360_v2  ;;  %v6411_v2 = vunpack.c.l.bf16 %v6681_v56 }
 0x9cf   :  { %7840 = vmatprep.subr.mxu0 %v8102_v58 }
 0x9d0   :  { %7841 = vmatpush3.msra.mxu0 %v6359_v6  ;;  %v6408_v6 = vunpack.c.h.bf16 %v6680_v0 }
 0x9d1   :  { %7842 = vmatprep.subr.mxu0 %v8102_v58 }
 0x9d2   :  { %7843 = vmatpush3.msra.mxu0 %v6356_v11  ;;  %v6407_v11 = vunpack.c.l.bf16 %v6680_v0 }
 0x9d3   :  { %7844 = vmatprep.subr.mxu0 %v8102_v58 }
 0x9d4   :  { %7845 = vmatpush3.msra.mxu0 %v6355_v12  ;;  %v6679_v12 = vld [vmem:[%s10217_s9 + $0xc8] sm:$0xff]  }
 0x9d5   :  { %7846 = vmatprep.subr.mxu0 %v8102_v58  ;;  %v6404_v13 = vunpack.c.h.bf16 %v6679_v12 }
 0x9d6   :  { %7847 = vmatpush3.msra.mxu0 %v6352_v15  ;;  %v6685_v15 = vld [vmem:[%s10217_s9 + $0xf8] sm:$0xff]  }
 0x9d7   :  { %7848 = vmatprep.subr.mxu0 %v8102_v58 }
 0x9d8   :  { %7849 = vmatpush3.msra.mxu0 %v6351_v16  ;;  %v6428_v16 = vunpack.c.h.bf16 %v6685_v15 }
 0x9d9   :  { %7883 = vmatprep.subr.mxu0 %v8102_v58 }
 0xa71   :  { %v2498_v17 = vpop.f32.mrf.mxu1 }
 0xa73   :  { %v7792_v18 = vpop.f32.mrf.mxu1 }
 0xa74   :  { %v6427_v18 = vunpack.c.l.bf16 %v6685_v15  ;;  %v3766_v15 = vld [vmem:[%s10220_s3 + $0x50] sm:$0xff] }
 0xa79   :  { %v2425_v19 = vpop.f32.mrf.mxu0 }
 0xa7a   :  { %v9038_v20 = vadd.f32 %v2498_v17, %v2425_v19  ;;  %v6403_v17 = vunpack.c.l.bf16 %v6679_v12  ;;  %v6678_v19 = vld [vmem:[%s10217_s9 + $0xc0] sm:$0xff]  }
 0xa7b   :  { %v7773_v21 = vpop.f32.mrf.mxu0 }
 0xa7c   :  { %v6400_v21 = vunpack.c.h.bf16 %v6678_v19 }
 0xa81   :  { %v2574_v22 = vpop.f32.mrf.mxu0 }
 0xa82   :  { %7821 = vmatmul.mubr.msk.f32.vlgmr.msra.gmra.mxu1 %vm2355_vm4, %v2574_v22 }
 0xa83   :  { %7854 = vmatpush3.msra.mxu1 %v8912_v27  ;;  %v7803_v23 = vpop.f32.mrf.mxu0  ;;  %7861 = vmatprep.mubr.msk.f32.mxu1 %vm8103_vm3, %v8102_v58 }
 0xa84   :  { %7855 = vmatprep.subr.mxu1 %v8102_v58  ;;  %v6399_v23 = vunpack.c.l.bf16 %v6678_v19 }
 0xa85   :  { %7856 = vmatpush3.msra.mxu1 %v8914_v30 }
 0xa86   :  { %7857 = vmatprep.subr.mxu1 %v8102_v58 }
 0xa87   :  { %7858 = vmatpush3.msra.mxu1 %v8921_v32 }
 0xa88   :  { %7859 = vmatprep.subr.mxu1 %v8102_v58 }
 0xa89   :  { %7860 = vmatpush3.msra.mxu1 %v8925_v34  ;;  %v2741_v28 = vpop.f32.mrf.mxu0 }
 0xa8a   :  { %7862 = vmatmul.mubr.msk.f32.vlgmr.msra.gmra.mxu1 %vm533_vm2, %v2838_v25  ;;  %7851 = vmatmul.mubr.msk.f32.vlgmr.msra.gmra.mxu0 %vm2355_vm4, %v2741_v28  ;;  %v6683_v25 = vld [vmem:[%s10217_s9 + $0xe8] sm:$0xff]  }
 0xa8b   :  { %7884 = vmatpush3.msra.mxu0 %v8912_v27  ;;  %7891 = vmatprep.mubr.msk.f32.mxu0 %vm8103_vm3, %v8102_v58  ;;  %v7833_v35 = vpop.f32.mrf.mxu0  ;;  %v6420_v26 = vunpack.c.h.bf16 %v6683_v25  ;;  %v6419_v28 = vunpack.c.l.bf16 %v6683_v25 }
 0xa8c   :  { %7885 = vmatprep.subr.mxu0 %v8102_v58  ;;  %7864 = vmatprep.subr.mxu1 %v8102_v58 }
 0xa8d   :  { %7886 = vmatpush3.msra.mxu0 %v8914_v30  ;;  %7865 = vmatpush3.msra.mxu1 %v6380_v29  ;;  %v6682_v29 = vld [vmem:[%s10217_s9 + $0xe0] sm:$0xff]  }
 0xa8e   :  { %7887 = vmatprep.subr.mxu0 %v8102_v58  ;;  %7866 = vmatprep.subr.mxu1 %v8102_v58  ;;  %v6416_v31 = vunpack.c.h.bf16 %v6682_v29 }
 0xa8f   :  { %7888 = vmatpush3.msra.mxu0 %v8921_v32  ;;  %7867 = vmatpush3.msra.mxu1 %v6379_v33  ;;  %v6415_v33 = vunpack.c.l.bf16 %v6682_v29 }
 0xa90   :  { %7889 = vmatprep.subr.mxu0 %v8102_v58  ;;  %7868 = vmatprep.subr.mxu1 %v8102_v58 }
 0xa91   :  { %7890 = vmatpush3.msra.mxu0 %v8925_v34  ;;  %7869 = vmatpush3.msra.mxu1 %v6376_v36 }
 0xa92   :  { %7892 = vmatmul.mubr.msk.f32.vlgmr.msra.gmra.mxu0 %vm533_vm2, %v3005_v37  ;;  %7870 = vmatprep.subr.mxu1 %v8102_v58 }
 0xa93   :  { %7871 = vmatpush3.msra.mxu1 %v6375_v38  ;;  %7894 = vmatprep.subr.mxu0 %v8102_v58 }
 0xa94   :  { %7872 = vmatprep.subr.mxu1 %v8102_v58  ;;  %7880 = vmatprep.mubr.msk.f32.mxu1 %vm8103_vm3, %v8102_v58 }
 0xa95   :  { %7910 = vmatprep.mubr.msk.f32.mxu0 %vm8103_vm3, %v8102_v58  ;;  %7873 = vmatpush3.msra.mxu1 %v6372_v41 }
 0xa96   :  { %7895 = vmatpush3.msra.mxu0 %v6396_v42  ;;  %7874 = vmatprep.subr.mxu1 %v8102_v58 }
 0xa97   :  { %7896 = vmatprep.subr.mxu0 %v8102_v58  ;;  %7875 = vmatpush3.msra.mxu1 %v6371_v43  ;;  %v6082_v43 = vld [vmem:[%s10219_s4 + $0x20] sm:$0xf] }
 0xa98   :  { %7897 = vmatpush3.msra.mxu0 %v6395_v44  ;;  %7876 = vmatprep.subr.mxu1 %v8102_v58  ;;  %v6689_v44 = vld [vmem:[%s10217_s9 + $0x118] sm:$0xff]  }
 0xa99   :  { %7898 = vmatprep.subr.mxu0 %v8102_v58  ;;  %7877 = vmatpush3.msra.mxu1 %v6368_v49  ;;  %v6444_v45 = vunpack.c.h.bf16 %v6689_v44  ;;  %v6688_v49 = vld [vmem:[%s10217_s9 + $0x110] sm:$0xff]  }
 0xa9a   :  { %7899 = vmatpush3.msra.mxu0 %v6392_v51  ;;  %7878 = vmatprep.subr.mxu1 %v8102_v58 }
 0xa9b   :  { %7900 = vmatprep.subr.mxu0 %v8102_v58  ;;  %7879 = vmatpush3.msra.mxu1 %v6367_v53  ;;  %v6687_v53 = vld [vmem:[%s10217_s9 + $0x108] sm:$0xff]  }
 0xa9c   :  { %7901 = vmatpush3.msra.mxu0 %v6391_v55  ;;  %7913 = vmatprep.subr.mxu1 %v8102_v58  ;;  %v6436_v55 = vunpack.c.h.bf16 %v6687_v53  ;;  %v6435_v57 = vunpack.c.l.bf16 %v6687_v53 }
 0xa9d   :  { %7902 = vmatprep.subr.mxu0 %v8102_v58 }
 0xa9e   :  { %7903 = vmatpush3.msra.mxu0 %v6388_v59  ;;  %v6686_v59 = vld [vmem:[%s10217_s9 + $0x100] sm:$0xff]  }
 0xa9f   :  { %7904 = vmatprep.subr.mxu0 %v8102_v58  ;;  %v6431_v63 = vunpack.c.l.bf16 %v6686_v59 }
 0xaa0   :  { %7905 = vmatpush3.msra.mxu0 %v6387_v61  ;;  %v6432_v61 = vunpack.c.h.bf16 %v6686_v59 }
 0xaa1   :  { %7906 = vmatprep.subr.mxu0 %v8102_v58 }
 0xaa2   :  { %7907 = vmatpush3.msra.mxu0 %v6384_v1 }
 0xaa3   :  { %7908 = vmatprep.subr.mxu0 %v8102_v58 }
 0xaa4   :  { %7909 = vmatpush3.msra.mxu0 %v6383_v3 }
 0xaa5   :  { %7943 = vmatprep.subr.mxu0 %v8102_v58 }
 0xb42   :  { %v2664_v5 = vpop.f32.mrf.mxu1 }
 0xb43   :  { %v2668_v7 = vadd.f32 %v2664_v5, %v9038_v20  ;;  %v6684_v20 = vld [vmem:[%s10217_s9 + $0xf0] sm:$0xff]  }
 0xb44   :  { %v7822_v9 = vpop.f32.mrf.mxu1  ;;  %v6424_v22 = vunpack.c.h.bf16 %v6684_v20  ;;  %v6423_v24 = vunpack.c.l.bf16 %v6684_v20 }
 0xb4a   :  { %v2908_v10 = vpop.f32.mrf.mxu1  ;;  %v2831_v14 = vpop.f32.mrf.mxu0 }
 0xb4b   :  { %v9112_v47 = vadd.f32 %v2831_v14, %v2668_v7  ;;  %7881 = vmatmul.mubr.msk.f32.vlgmr.msra.gmra.mxu1 %vm2355_vm4, %v2908_v10 }
 0xb4c   :  { %7914 = vmatpush3.msra.mxu1 %v8912_v27  ;;  %v7863_v48 = vpop.f32.mrf.mxu1  ;;  %v7852_v50 = vpop.f32.mrf.mxu0  ;;  %7921 = vmatprep.mubr.msk.f32.mxu1 %vm8103_vm3, %v8102_v58 }
 0xb4d   :  { %7915 = vmatprep.subr.mxu1 %v8102_v58  ;;  %v3771_v48 = vld [vmem:[%s10220_s3 + $0x78] sm:$0xff]  ;;  %v3770_v50 = vld [vmem:[%s10220_s3 + $0x70] sm:$0xff] }
 0xb4e   :  { %7916 = vmatpush3.msra.mxu1 %v8914_v30  ;;  %v3802_v52 = vunpack.c.l.bf16 %v3771_v48  ;;  %v3800_v56 = vunpack.c.l.bf16 %v3770_v50 }
 0xb4f   :  { %7917 = vmatprep.subr.mxu1 %v8102_v58 }
 0xb50   :  { %7918 = vmatpush3.msra.mxu1 %v8921_v32 }
 0xb51   :  { %7919 = vmatprep.subr.mxu1 %v8102_v58 }
 0xb52   :  { %7920 = vmatpush3.msra.mxu1 %v8925_v34  ;;  %v3075_v60 = vpop.f32.mrf.mxu0 }
 0xb53   :  { %7922 = vmatmul.mubr.msk.f32.vlgmr.msra.gmra.mxu1 %vm533_vm2, %v3172_v54  ;;  %7911 = vmatmul.mubr.msk.f32.vlgmr.msra.gmra.mxu0 %vm2355_vm4, %v3075_v60  ;;  %v3803_v54 = vunpack.c.h.bf16 %v3771_v48  ;;  %v3801_v60 = vunpack.c.h.bf16 %v3770_v50 }
 0xb54   :  { %7944 = vmatpush3.msra.mxu0 %v8912_v27  ;;  %7951 = vmatprep.mubr.msk.f32.mxu0 %vm8103_vm3, %v8102_v58  ;;  %v7893_v4 = vpop.f32.mrf.mxu0 }
 0xb55   :  { %7945 = vmatprep.subr.mxu0 %v8102_v58  ;;  %7924 = vmatprep.subr.mxu1 %v8102_v58  ;;  %v3768_v4 = vld [vmem:[%s10220_s3 + $0x60] sm:$0xff] }
 0xb56   :  { %7946 = vmatpush3.msra.mxu0 %v8914_v30  ;;  %7925 = vmatpush3.msra.mxu1 %v6412_v62  ;;  %v3769_v62 = vld [vmem:[%s10220_s3 + $0x68] sm:$0xff] }
 0xb57   :  { %7947 = vmatprep.subr.mxu0 %v8102_v58  ;;  %7926 = vmatprep.subr.mxu1 %v8102_v58  ;;  %v3799_v0 = vunpack.c.h.bf16 %v3769_v62 }
 0xb58   :  { %7948 = vmatpush3.msra.mxu0 %v8921_v32  ;;  %7927 = vmatpush3.msra.mxu1 %v6411_v2  ;;  %v3798_v2 = vunpack.c.l.bf16 %v3769_v62 }
 0xb59   :  { %7949 = vmatprep.subr.mxu0 %v8102_v58  ;;  %7928 = vmatprep.subr.mxu1 %v8102_v58 }
 0xb5a   :  { %7950 = vmatpush3.msra.mxu0 %v8925_v34  ;;  %7929 = vmatpush3.msra.mxu1 %v6408_v6  ;;  %v3797_v6 = vunpack.c.h.bf16 %v3768_v4 }
 0xb5b   :  { %7952 = vmatmul.mubr.msk.f32.vlgmr.msra.gmra.mxu0 %vm533_vm2, %v3339_v8  ;;  %7930 = vmatprep.subr.mxu1 %v8102_v58  ;;  %v3796_v8 = vunpack.c.l.bf16 %v3768_v4 }
 0xb5c   :  { %7931 = vmatpush3.msra.mxu1 %v6407_v11  ;;  %7954 = vmatprep.subr.mxu0 %v8102_v58  ;;  %v3767_v11 = vld [vmem:[%s10220_s3 + $0x58] sm:$0xff] }
 0xb5d   :  { %7932 = vmatprep.subr.mxu1 %v8102_v58  ;;  %7940 = vmatprep.mubr.msk.f32.mxu1 %vm8103_vm3, %v8102_v58  ;;  %v3795_v12 = vunpack.c.h.bf16 %v3767_v11 }
 0xb5e   :  { %7970 = vmatprep.mubr.msk.f32.mxu0 %vm8103_vm3, %v8102_v58  ;;  %7933 = vmatpush3.msra.mxu1 %v6404_v13  ;;  %v3794_v13 = vunpack.c.l.bf16 %v3767_v11 }
 0xb5f   :  { %7934 = vmatprep.subr.mxu1 %v8102_v58  ;;  %7955 = vmatpush3.msra.mxu0 %v6428_v16  ;;  %v3793_v16 = vunpack.c.h.bf16 %v3766_v15 }
 0xb60   :  { %7935 = vmatpush3.msra.mxu1 %v6403_v17  ;;  %7956 = vmatprep.subr.mxu0 %v8102_v58  ;;  %v3792_v17 = vunpack.c.l.bf16 %v3766_v15 }
 0xb61   :  { %7936 = vmatprep.subr.mxu1 %v8102_v58  ;;  %7957 = vmatpush3.msra.mxu0 %v6427_v18  ;;  %v3765_v18 = vld [vmem:[%s10220_s3 + $0x48] sm:$0xff] }
 0xb62   :  { %7937 = vmatpush3.msra.mxu1 %v6400_v21  ;;  %7958 = vmatprep.subr.mxu0 %v8102_v58  ;;  %v3791_v19 = vunpack.c.h.bf16 %v3765_v18  ;;  %v3790_v20 = vunpack.c.l.bf16 %v3765_v18  ;;  %v3764_v21 = vld [vmem:[%s10220_s3 + $0x40] sm:$0xff] }
 0xb63   :  { %7938 = vmatprep.subr.mxu1 %v8102_v58  ;;  %7959 = vmatpush3.msra.mxu0 %v6424_v22  ;;  %v3789_v22 = vunpack.c.h.bf16 %v3764_v21 }
 0xb64   :  { %7939 = vmatpush3.msra.mxu1 %v6399_v23  ;;  %7960 = vmatprep.subr.mxu0 %v8102_v58  ;;  %v3788_v23 = vunpack.c.l.bf16 %v3764_v21 }
 0xb65   :  { %7961 = vmatpush3.msra.mxu0 %v6423_v24  ;;  %7973 = vmatprep.subr.mxu1 %v8102_v58  ;;  %v3763_v24 = vld [vmem:[%s10220_s3 + $0x38] sm:$0xff] }
 0xb66   :  { %7962 = vmatprep.subr.mxu0 %v8102_v58  ;;  %v3787_v25 = vunpack.c.h.bf16 %v3763_v24 }
 0xb67   :  { %7963 = vmatpush3.msra.mxu0 %v6420_v26  ;;  %v3786_v26 = vunpack.c.l.bf16 %v3763_v24 }
 0xb68   :  { %7964 = vmatprep.subr.mxu0 %v8102_v58 }
 0xb69   :  { %7965 = vmatpush3.msra.mxu0 %v6419_v28  ;;  %v3762_v28 = vld [vmem:[%s10220_s3 + $0x30] sm:$0xff] }
 0xb6a   :  { %7966 = vmatprep.subr.mxu0 %v8102_v58  ;;  %v3785_v29 = vunpack.c.h.bf16 %v3762_v28 }
 0xb6b   :  { %7967 = vmatpush3.msra.mxu0 %v6416_v31  ;;  %v3784_v31 = vunpack.c.l.bf16 %v3762_v28 }
 0xb6c   :  { %7968 = vmatprep.subr.mxu0 %v8102_v58 }
 0xb6d   :  { %7969 = vmatpush3.msra.mxu0 %v6415_v33  ;;  %v3761_v33 = vld [vmem:[%s10220_s3 + $0x28] sm:$0xff] }
 0xb6e   :  { %8003 = vmatprep.subr.mxu0 %v8102_v58 }
 0xc0b   :  { %v2998_v35 = vpop.f32.mrf.mxu1 }
 0xc0c   :  { %v3002_v36 = vadd.f32 %v2998_v35, %v9112_v47  ;;  %v3783_v35 = vunpack.c.h.bf16 %v3761_v33 }
 0xc0d   :  { %v7882_v37 = vpop.f32.mrf.mxu1 }
 0xc0e   :  { %v3760_v37 = vld [vmem:[%s10220_s3 + $0x20] sm:$0xff] }
 0xc13   :  { %v3242_v38 = vpop.f32.mrf.mxu1  ;;  %v3165_v39 = vpop.f32.mrf.mxu0 }
 0xc14   :  { %v3169_v40 = vadd.f32 %v3165_v39, %v3002_v36  ;;  %7941 = vmatmul.mubr.msk.f32.vlgmr.msra.gmra.mxu1 %vm2355_vm4, %v3242_v38  ;;  %v3782_v36 = vunpack.c.l.bf16 %v3761_v33  ;;  %v3781_v38 = vunpack.c.h.bf16 %v3760_v37  ;;  %v3780_v39 = vunpack.c.l.bf16 %v3760_v37 }
 0xc15   :  { %7974 = vmatpush3.msra.mxu1 %v8912_v27  ;;  %v7923_v41 = vpop.f32.mrf.mxu1  ;;  %v7912_v42 = vpop.f32.mrf.mxu0  ;;  %7981 = vmatprep.mubr.msk.f32.mxu1 %vm8103_vm3, %v8102_v58  ;;  %v3506_v27 = vunpack.c.l.bf16 %v6082_v43  ;;  %v3758_v43 = vld [vmem:[%s10220_s3 + $0x10] sm:$0xff] }
 0xc16   :  { %7975 = vmatprep.subr.mxu1 %v8102_v58 }
 0xc17   :  { %7976 = vmatpush3.msra.mxu1 %v8914_v30  ;;  %v6443_v30 = vunpack.c.l.bf16 %v6689_v44  ;;  %v3777_v44 = vunpack.c.h.bf16 %v3758_v43 }
 0xc18   :  { %7977 = vmatprep.subr.mxu1 %v8102_v58 }
 0xc19   :  { %7978 = vmatpush3.msra.mxu1 %v8921_v32  ;;  %v6440_v32 = vunpack.c.h.bf16 %v6688_v49 }
 0xc1a   :  { %7979 = vmatprep.subr.mxu1 %v8102_v58 }
 0xc1b   :  { %7980 = vmatpush3.msra.mxu1 %v8925_v34  ;;  %v3409_v46 = vpop.f32.mrf.mxu0  ;;  %v6439_v34 = vunpack.c.l.bf16 %v6688_v49 }
 0xc1c   :  { %7982 = vmatmul.mubr.msk.f32.vlgmr.msra.gmra.mxu1 %vm533_vm2, %v3506_v27  ;;  %7971 = vmatmul.mubr.msk.f32.vlgmr.msra.gmra.mxu0 %vm2355_vm4, %v3409_v46  ;;  %v3776_v27 = vunpack.c.l.bf16 %v3758_v43 }
 0xc1d   :  { %7984 = vmatprep.subr.mxu1 %v8102_v58  ;;  %v7953_v51 = vpop.f32.mrf.mxu0  ;;  %8000 = vmatprep.mubr.msk.f32.mxu1 %vm8103_vm3, %v8102_v58 }
 0xc1e   :  { %7985 = vmatpush3.msra.mxu1 %v6444_v45  ;;  %8005 = vmatprep.mubr.msk.f32.mxu0 %vm8103_vm3, %v8102_v58  ;;  %v3757_v45 = vld [vmem:[%s10220_s3 + $0x8] sm:$0xff]  ;;  %v6093_v51 = vld [vmem:[%s10221_s28] ss:$0 sm:$0xff] }
 0xc1f   :  { %7986 = vmatprep.subr.mxu1 %v8102_v58  ;;  %v3775_v46 = vunpack.c.h.bf16 %v3757_v45  ;;  %v3774_v49 = vunpack.c.l.bf16 %v3757_v45 }
 0xc20   :  { %7987 = vmatpush3.msra.mxu1 %v6443_v30 }
 0xc21   :  { %7988 = vmatprep.subr.mxu1 %v8102_v58 }
 0xc22   :  { %7989 = vmatpush3.msra.mxu1 %v6440_v32 }
 0xc23   :  { %7990 = vmatprep.subr.mxu1 %v8102_v58 }
 0xc24   :  { %7991 = vmatpush3.msra.mxu1 %v6439_v34  ;;  %v3680_v34 = vld [vmem:[%s10222_s29] sm:$0x1] }
 0xc25   :  { %7992 = vmatprep.subr.mxu1 %v8102_v58  ;;  %v3681_v59 = vunpack.c.l.bf16 %v3680_v34 }
 0xc26   :  { %7993 = vmatpush3.msra.mxu1 %v6436_v55 }
 0xc27   :  { %7994 = vmatprep.subr.mxu1 %v8102_v58 }
 0xc28   :  { %7995 = vmatpush3.msra.mxu1 %v6435_v57  ;;  %v6112_v57 = vld [vmem:[%s10220_s3 + $0xf8] sm:$0xff] }
 0xc29   :  { %7996 = vmatprep.subr.mxu1 %v8102_v58 }
 0xc2a   :  { %7997 = vmatpush3.msra.mxu1 %v6432_v61 }
 0xc2b   :  { %7998 = vmatprep.subr.mxu1 %v8102_v58 }
 0xc2c   :  { %7999 = vmatpush3.msra.mxu1 %v6431_v63  ;;  %v6095_v63 = vld [vmem:[%s10222_s29 + $0x1] sm:$0x1] }
 0xc2d   :  { %4000 = vmatprep.subr.mxu1 %v3803_v54 }
 0xcd4   :  { %v3332_v1 = vpop.f32.mrf.mxu1 }
 0xcd5   :  { %v3336_v3 = vadd.f32 %v3332_v1, %v3169_v40  ;;  %v3759_v40 = vld [vmem:[%s10220_s3 + $0x18] sm:$0xff]  ;;  %v3928_v1 = vunpack.c.h.bf16 %v6112_v57 }
 0xcd6   :  { %v7942_v5 = vpop.f32.mrf.mxu1  ;;  %v3779_v41 = vunpack.c.h.bf16 %v3759_v40  ;;  %v3778_v42 = vunpack.c.l.bf16 %v3759_v40 }
 0xcd7   :  { %v3806_v5 = vunpack.c.l.bf16 %v6095_v63 }
 0xcdc   :  { %v3576_v7 = vpop.f32.mrf.mxu1  ;;  %v3499_v9 = vpop.f32.mrf.mxu0 }
 0xcdd   :  { %v9225_v10 = vadd.f32 %v3499_v9, %v3336_v3  ;;  %8001 = vmatmul.mubr.msk.f32.vlgmr.msra.gmra.mxu1 %vm2355_vm4, %v3576_v7  ;;  %v6111_v3 = vld [vmem:[%s10220_s3 + $0xf0] sm:$0xff]  ;;  %v3927_v7 = vunpack.c.l.bf16 %v6112_v57  ;;  %v6110_v9 = vld [vmem:[%s10220_s3 + $0xe8] sm:$0xff] }
 0xcde   :  { %v7983_v14 = vpop.f32.mrf.mxu1  ;;  %v7972_v47 = vpop.f32.mrf.mxu0  ;;  %4064 = vmatprep.mubr.f32.mxu1 %v8102_v58  ;;  %4001 = vmatpush1.msra.mxu1 %v3802_v52  ;;  %v3924_v48 = vunpack.c.h.bf16 %v6110_v9  ;;  %v3923_v50 = vunpack.c.l.bf16 %v6110_v9  ;;  %v6108_v52 = vld [vmem:[%s10220_s3 + $0xd8] sm:$0xff] }
 0xcdf   :  { %4002 = vmatprep.subr.mxu1 %v3801_v60  ;;  %v3925_v14 = vunpack.c.l.bf16 %v6111_v3  ;;  %v6109_v47 = vld [vmem:[%s10220_s3 + $0xe0] sm:$0xff]  ;;  %v6107_v60 = vld [vmem:[%s10220_s3 + $0xd0] sm:$0xff]  ;;  %v3920_v62 = vunpack.c.h.bf16 %v6108_v52 }
 0xce0   :  { %4003 = vmatpush1.msra.mxu1 %v3800_v56  ;;  %v3922_v54 = vunpack.c.h.bf16 %v6109_v47  ;;  %v3921_v56 = vunpack.c.l.bf16 %v6109_v47  ;;  %v3918_v4 = vunpack.c.h.bf16 %v6107_v60 }
 0xce1   :  { %4004 = vmatprep.subr.mxu1 %v3799_v0  ;;  %v3919_v0 = vunpack.c.l.bf16 %v6108_v52  ;;  %v6125_v52 = vld [vmem:[%s10220_s3 + $0x150] sm:$0xff] }
 0xce2   :  { %4005 = vmatpush1.msra.mxu1 %v3798_v2  ;;  %v6106_v2 = vld [vmem:[%s10220_s3 + $0xc8] sm:$0xff] }
 0xce3   :  { %4006 = vmatprep.subr.mxu1 %v3797_v6  ;;  %v3917_v6 = vunpack.c.l.bf16 %v6107_v60  ;;  %v3916_v11 = vunpack.c.h.bf16 %v6106_v2  ;;  %v6147_v60 = vld [vmem:[%s10220_s3 + $0x1f0] sm:$0xff] }
 0xce4   :  { %4007 = vmatpush1.msra.mxu1 %v3796_v8  ;;  %v6105_v8 = vld [vmem:[%s10220_s3 + $0xc0] sm:$0xff] }
 0xce5   :  { %4008 = vmatprep.subr.mxu1 %v3795_v12  ;;  %v3915_v12 = vunpack.c.l.bf16 %v6106_v2  ;;  %v3914_v15 = vunpack.c.h.bf16 %v6105_v8 }
 0xce6   :  { %4009 = vmatpush1.msra.mxu1 %v3794_v13  ;;  %v6104_v13 = vld [vmem:[%s10220_s3 + $0xb8] sm:$0xff] }
 0xce7   :  { %4010 = vmatprep.subr.mxu1 %v3793_v16  ;;  %v3913_v16 = vunpack.c.l.bf16 %v6105_v8  ;;  %v3912_v18 = vunpack.c.h.bf16 %v6104_v13  ;;  %v6146_v8 = vld [vmem:[%s10220_s3 + $0x1e8] sm:$0xff] }
 0xce8   :  { %4011 = vmatpush1.msra.mxu1 %v3792_v17  ;;  %v6103_v17 = vld [vmem:[%s10220_s3 + $0xb0] sm:$0xff] }
 0xce9   :  { %4012 = vmatprep.subr.mxu1 %v3791_v19  ;;  %v3911_v19 = vunpack.c.l.bf16 %v6104_v13  ;;  %v3910_v21 = vunpack.c.h.bf16 %v6103_v17  ;;  %v4391_v13 = vunpack.c.h.bf16 %v6147_v60 }
 0xcea   :  { %4013 = vmatpush1.msra.mxu1 %v3790_v20  ;;  %v6102_v20 = vld [vmem:[%s10220_s3 + $0xa8] sm:$0xff] }
 0xceb   :  { %4014 = vmatprep.subr.mxu1 %v3789_v22  ;;  %v3909_v22 = vunpack.c.l.bf16 %v6103_v17  ;;  %v3908_v24 = vunpack.c.h.bf16 %v6102_v20 }
 0xcec   :  { %4015 = vmatpush1.msra.mxu1 %v3788_v23  ;;  %v6101_v23 = vld [vmem:[%s10220_s3 + $0xa0] sm:$0xff] }
 0xced   :  { %4016 = vmatprep.subr.mxu1 %v3787_v25  ;;  %v3907_v25 = vunpack.c.l.bf16 %v6102_v20  ;;  %v3906_v28 = vunpack.c.h.bf16 %v6101_v23 }
 0xcee   :  { %4017 = vmatpush1.msra.mxu1 %v3786_v26  ;;  %v6100_v26 = vld [vmem:[%s10220_s3 + $0x98] sm:$0xff] }
 0xcef   :  { %4018 = vmatprep.subr.mxu1 %v3785_v29  ;;  %v3905_v29 = vunpack.c.l.bf16 %v6101_v23  ;;  %v3904_v33 = vunpack.c.h.bf16 %v6100_v26 }
 0xcf0   :  { %4019 = vmatpush1.msra.mxu1 %v3784_v31  ;;  %v6099_v31 = vld [vmem:[%s10220_s3 + $0x90] sm:$0xff] }
 0xcf1   :  { %4020 = vmatprep.subr.mxu1 %v3783_v35  ;;  %v3903_v35 = vunpack.c.l.bf16 %v6100_v26  ;;  %v3901_v37 = vunpack.c.l.bf16 %v6099_v31 }
 0xcf2   :  { %4021 = vmatpush1.msra.mxu1 %v3782_v36  ;;  %v3902_v36 = vunpack.c.h.bf16 %v6099_v31 }
 0xcf3   :  { %4022 = vmatprep.subr.mxu1 %v3781_v38  ;;  %v3756_v38 = vld [vmem:[%s10220_s3] sm:$0xff] }
 0xcf4   :  { %4023 = vmatpush1.msra.mxu1 %v3780_v39  ;;  %v6098_v39 = vld [vmem:[%s10220_s3 + $0x88] sm:$0xff]  ;;  %v3773_v40 = vunpack.c.h.bf16 %v3756_v38 }
 0xcf5   :  { %4024 = vmatprep.subr.mxu1 %v3779_v41  ;;  %v3900_v41 = vunpack.c.h.bf16 %v6098_v39  ;;  %v3899_v43 = vunpack.c.l.bf16 %v6098_v39 }
 0xcf6   :  { %4025 = vmatpush1.msra.mxu1 %v3778_v42  ;;  %v3772_v42 = vunpack.c.l.bf16 %v3756_v38  ;;  %v6142_v38 = vld [vmem:[%s10220_s3 + $0x1c8] sm:$0xff] }
 0xcf7   :  { %4026 = vmatprep.subr.mxu1 %v3777_v44  ;;  %v6097_v44 = vld [vmem:[%s10220_s3 + $0x80] sm:$0xff] }
 0xcf8   :  { %4027 = vmatpush1.msra.mxu1 %v3776_v27  ;;  %v3898_v27 = vunpack.c.h.bf16 %v6097_v44  ;;  %v3897_v45 = vunpack.c.l.bf16 %v6097_v44  ;;  %v6141_v44 = vld [vmem:[%s10220_s3 + $0x1c0] sm:$0xff] }
 0xcf9   :  { %4028 = vmatprep.subr.mxu1 %v3775_v46  ;;  %v6130_v46 = vld [vmem:[%s10220_s3 + $0x178] sm:$0xff] }
 0xcfa   :  { %4029 = vmatpush1.msra.mxu1 %v3774_v49  ;;  %v4195_v49 = vunpack.c.h.bf16 %v6130_v46 }
 0xcfb   :  { %4030 = vmatprep.subr.mxu1 %v3773_v40  ;;  %v6119_v40 = vld [vmem:[%s10220_s3 + $0x120] sm:$0xff] }
 0xcfc   :  { %4031 = vmatpush1.msra.mxu1 %v3772_v42 }
 0xcfd   :  { %4196 = vmatprep.subr.mxu1 %v4195_v49  ;;  %v4380_v49 = vunpack.c.l.bf16 %v6142_v38 }
 0xd9d   :  { %v3666_v30 = vpop.f32.mrf.mxu1 }
 0xd9e   :  { %v3670_v32 = vadd.f32 %v3666_v30, %v9225_v10  ;;  %v3926_v10 = vunpack.c.h.bf16 %v6111_v3  ;;  %v6129_v30 = vld [vmem:[%s10220_s3 + $0x170] sm:$0xff] }
 0xd9f   :  { %v8002_v53 = vpop.f32.mrf.mxu1  ;;  %v4193_v34 = vunpack.c.h.bf16 %v6129_v30 }
 0xda0   :  { %v3678_v55 = vadd.f32 %v6093_v51, %v3670_v32  ;;  %v4194_v51 = vunpack.c.l.bf16 %v6130_v46  ;;  %v6128_v32 = vld [vmem:[%s10220_s3 + $0x168] sm:$0xff]  ;;  %v4173_v46 = vunpack.c.h.bf16 %v6119_v40 }
 0xda1   :  { %v4191_v57 = vunpack.c.h.bf16 %v6128_v32  ;;  %v4190_v3 = vunpack.c.l.bf16 %v6128_v32  ;;  %v4379_v32 = vunpack.c.h.bf16 %v6141_v44 }
 0xda2   :  { %v9284_v61 = vmax.f32 %v3678_v55, 0.0  ;;  %v4192_v55 = vunpack.c.l.bf16 %v6129_v30  ;;  %v6140_v30 = vld [vmem:[%s10220_s3 + $0x1b8] sm:$0xff] }
 0xda4   :  { %8004 = vmatpush3.msra.mxu0 %v9284_v61 }
 0xda5   :  { %8006 = vmatmul.mubr.msk.f32.vlgmr.msra.gmra.mxu0 %vm3682_vm5, %v3681_v59  ;;  %8008 = vmatprep.subr.mxu0 %v8102_v58  ;;  %v6127_v59 = vld [vmem:[%s10220_s3 + $0x160] sm:$0xff] }
 0xda6   :  { %8009 = vmatpush3.msra.mxu0 %v9284_v61  ;;  %8010 = vmatprep.mubr.msk.f32.mxu0 %vm8103_vm3, %v8102_v58  ;;  %v4189_v9 = vunpack.c.h.bf16 %v6127_v59  ;;  %v4188_v47 = vunpack.c.l.bf16 %v6127_v59 }
 0xda7   :  { %3929 = vmatprep.subr.mxu0 %v3928_v1  ;;  %v6113_v1 = vld [vmem:[%s10222_s29 + $0x2] sm:$0x1] }
 0xda9   :  { %8011 = vmatmul.mubr.msk.f32.vlgmr.msra.gmra.mxu0 %vm3682_vm5, %v3806_v5 }
 0xdaa   :  { %3930 = vmatpush1.msra.mxu0 %v3927_v7  ;;  %3993 = vmatprep.mubr.f32.mxu0 %v8102_v58  ;;  %v6148_v7 = vld [vmem:[%s10220_s3 + $0x1f8] sm:$0xff] }
 0xdab   :  { %3931 = vmatprep.subr.mxu0 %v3926_v10  ;;  %v6126_v10 = vld [vmem:[%s10220_s3 + $0x158] sm:$0xff] }
 0xdac   :  { %3932 = vmatpush1.msra.mxu0 %v3925_v14  ;;  %v4073_v14 = vunpack.c.l.bf16 %v6113_v1  ;;  %v6118_v1 = vld [vmem:[%s10220_s3 + $0x118] sm:$0xff] }
 0xdad   :  { %3933 = vmatprep.subr.mxu0 %v3924_v48 }
 0xdae   :  { %3934 = vmatpush1.msra.mxu0 %v3923_v50  ;;  %v6131_v50 = vld [vmem:[%s10222_s29 + $0x3] sm:$0x1] }
 0xdaf   :  { %3935 = vmatprep.subr.mxu0 %v3922_v54  ;;  %v4393_v54 = vunpack.c.h.bf16 %v6148_v7  ;;  %v4271_v2 = vunpack.c.l.bf16 %v6131_v50 }
 0xdb0   :  { %3936 = vmatpush1.msra.mxu0 %v3921_v56  ;;  %v4187_v56 = vunpack.c.h.bf16 %v6126_v10 }
 0xdb1   :  { %3937 = vmatprep.subr.mxu0 %v3920_v62  ;;  %v4186_v62 = vunpack.c.l.bf16 %v6126_v10 }
 0xdb2   :  { %3938 = vmatpush1.msra.mxu0 %v3919_v0  ;;  %v6124_v0 = vld [vmem:[%s10220_s3 + $0x148] sm:$0xff] }
 0xdb3   :  { %3939 = vmatprep.subr.mxu0 %v3918_v4  ;;  %v4185_v4 = vunpack.c.h.bf16 %v6125_v52  ;;  %v4182_v17 = vunpack.c.l.bf16 %v6124_v0 }
 0xdb4   :  { %3940 = vmatpush1.msra.mxu0 %v3917_v6  ;;  %v4392_v6 = vunpack.c.l.bf16 %v6148_v7  ;;  %v4171_v7 = vunpack.c.h.bf16 %v6118_v1 }
 0xdb5   :  { %3941 = vmatprep.subr.mxu0 %v3916_v11  ;;  %v4184_v11 = vunpack.c.l.bf16 %v6125_v52 }
 0xdb6   :  { %3942 = vmatpush1.msra.mxu0 %v3915_v12  ;;  %v6123_v12 = vld [vmem:[%s10220_s3 + $0x140] sm:$0xff] }
 0xdb7   :  { %3943 = vmatprep.subr.mxu0 %v3914_v15  ;;  %v4183_v15 = vunpack.c.h.bf16 %v6124_v0  ;;  %v4181_v20 = vunpack.c.h.bf16 %v6123_v12  ;;  %v4180_v23 = vunpack.c.l.bf16 %v6123_v12 }
 0xdb8   :  { %3944 = vmatpush1.msra.mxu0 %v3913_v16  ;;  %v4390_v16 = vunpack.c.l.bf16 %v6147_v60  ;;  %v6136_v60 = vld [vmem:[%s10220_s3 + $0x198] sm:$0xff] }
 0xdb9   :  { %3945 = vmatprep.subr.mxu0 %v3912_v18  ;;  %v6122_v18 = vld [vmem:[%s10220_s3 + $0x138] sm:$0xff]  ;;  %v4369_v0 = vunpack.c.h.bf16 %v6136_v60 }
 0xdba   :  { %3946 = vmatpush1.msra.mxu0 %v3911_v19  ;;  %v4389_v19 = vunpack.c.h.bf16 %v6146_v8  ;;  %v4179_v26 = vunpack.c.h.bf16 %v6122_v18  ;;  %v4178_v31 = vunpack.c.l.bf16 %v6122_v18  ;;  %v6133_v18 = vld [vmem:[%s10220_s3 + $0x180] sm:$0xff] }
 0xdbb   :  { %3947 = vmatprep.subr.mxu0 %v3910_v21  ;;  %v4388_v21 = vunpack.c.l.bf16 %v6146_v8  ;;  %v6135_v8 = vld [vmem:[%s10220_s3 + $0x190] sm:$0xff] }
 0xdbc   :  { %3948 = vmatpush1.msra.mxu0 %v3909_v22  ;;  %v6144_v22 = vld [vmem:[%s10220_s3 + $0x1d8] sm:$0xff]  ;;  %v4367_v12 = vunpack.c.h.bf16 %v6135_v8 }
 0xdbd   :  { %3949 = vmatprep.subr.mxu0 %v3908_v24  ;;  %v6121_v24 = vld [vmem:[%s10220_s3 + $0x130] sm:$0xff] }
 0xdbe   :  { %3950 = vmatpush1.msra.mxu0 %v3907_v25  ;;  %v4176_v39 = vunpack.c.l.bf16 %v6121_v24 }
 0xdbf   :  { %3951 = vmatprep.subr.mxu0 %v3906_v28 }
 0xdc0   :  { %3952 = vmatpush1.msra.mxu0 %v3905_v29  ;;  %v6143_v29 = vld [vmem:[%s10220_s3 + $0x1d0] sm:$0xff] }
 0xdc1   :  { %3953 = vmatprep.subr.mxu0 %v3904_v33  ;;  %v6120_v33 = vld [vmem:[%s10220_s3 + $0x128] sm:$0xff] }
 0xdc2   :  { %3954 = vmatpush1.msra.mxu0 %v3903_v35  ;;  %v4385_v35 = vunpack.c.h.bf16 %v6144_v22  ;;  %v4175_v42 = vunpack.c.h.bf16 %v6120_v33 }
 0xdc3   :  { %3955 = vmatprep.subr.mxu0 %v3902_v36  ;;  %v4177_v36 = vunpack.c.h.bf16 %v6121_v24  ;;  %v4497_v24 = vld [vmem:[%s10178_s12 + $0x70] sm:$0xff] }
 0xdc4   :  { %3956 = vmatpush1.msra.mxu0 %v3901_v37  ;;  %v4384_v37 = vunpack.c.l.bf16 %v6144_v22 }
 0xdc5   :  { %3957 = vmatprep.subr.mxu0 %v3900_v41  ;;  %v4383_v41 = vunpack.c.h.bf16 %v6143_v29 }
 0xdc6   :  { %3958 = vmatpush1.msra.mxu0 %v3899_v43  ;;  %v4382_v43 = vunpack.c.l.bf16 %v6143_v29  ;;  %v4544_v29 = vunpack.c.h.bf16 %v4497_v24 }
 0xdc7   :  { %3959 = vmatprep.subr.mxu0 %v3898_v27  ;;  %v4174_v27 = vunpack.c.l.bf16 %v6120_v33  ;;  %v4543_v33 = vunpack.c.l.bf16 %v4497_v24 }
 0xdc8   :  { %3960 = vmatpush1.msra.mxu0 %v3897_v45  ;;  %v4381_v45 = vunpack.c.h.bf16 %v6142_v38 }
 0xdc9   :  { %8013 = vmatprep.subr.mxu0 %v8102_v58 }
 0xe65   :  { %v3752_v53 = vpop.f32.mrf.mxu0 }
 0xe66   :  { %4065 = vmatmul.mubr.f32.vlgmr.msra.gmra.mxu1 %v3752_v53  ;;  %v6139_v53 = vld [vmem:[%s10220_s3 + $0x1b0] sm:$0xff] }
 0xe67   :  { %v8007_v63 = vpop.f32.mrf.mxu0  ;;  %4197 = vmatpush1.msra.mxu1 %v4194_v51  ;;  %4260 = vmatprep.mubr.f32.mxu1 %v8102_v58  ;;  %v4172_v51 = vunpack.c.l.bf16 %v6119_v40  ;;  %v4375_v59 = vunpack.c.h.bf16 %v6139_v53 }
 0xe68   :  { %4198 = vmatprep.subr.mxu1 %v4193_v34  ;;  %v4378_v34 = vunpack.c.l.bf16 %v6141_v44  ;;  %v4374_v63 = vunpack.c.l.bf16 %v6139_v53  ;;  %v4490_v53 = vld [vmem:[%s10178_s12 + $0x38] sm:$0xff] }
 0xe69   :  { %v3876_v5 = vpop.f32.mrf.mxu0  ;;  %4199 = vmatpush1.msra.mxu1 %v4192_v55  ;;  %v4377_v55 = vunpack.c.h.bf16 %v6140_v30 }
 0xe6a   :  { %3994 = vmatmul.mubr.f32.vlgmr.msra.gmra.mxu0 %v3876_v5  ;;  %4200 = vmatprep.subr.mxu1 %v4191_v57  ;;  %v4376_v57 = vunpack.c.l.bf16 %v6140_v30  ;;  %v4170_v5 = vunpack.c.l.bf16 %v6118_v1  ;;  %v4529_v1 = vunpack.c.l.bf16 %v4490_v53 }
 0xe6b   :  { %8014 = vmatpush3.msra.mxu0 %v9284_v61  ;;  %v8012_v48 = vpop.f32.mrf.mxu0  ;;  %8015 = vmatprep.mubr.msk.f32.mxu0 %vm8103_vm3, %v8102_v58 }
 0xe6c   :  { %8018 = vmatprep.subr.mxu0 %v8102_v58  ;;  %4201 = vmatpush1.msra.mxu1 %v4190_v3  ;;  %v6138_v3 = vld [vmem:[%s10220_s3 + $0x1a8] sm:$0xff] }
 0xe6d   :  { %4202 = vmatprep.subr.mxu1 %v4189_v9  ;;  %v4372_v9 = vunpack.c.l.bf16 %v6138_v3  ;;  %v4373_v10 = vunpack.c.h.bf16 %v6138_v3  ;;  %v4488_v3 = vld [vmem:[%s10178_s12 + $0x28] sm:$0xff] }
 0xe6e   :  { %8016 = vmatmul.mubr.msk.f32.vlgmr.msra.gmra.mxu0 %vm3682_vm5, %v4073_v14  ;;  %4203 = vmatpush1.msra.mxu1 %v4188_v47  ;;  %v6117_v14 = vld [vmem:[%s10220_s3 + $0x110] sm:$0xff]  ;;  %v6137_v47 = vld [vmem:[%s10220_s3 + $0x1a0] sm:$0xff] }
 0xe6f   :  { %8019 = vmatpush3.msra.mxu0 %v9284_v61  ;;  %8020 = vmatprep.mubr.msk.f32.mxu0 %vm8103_vm3, %v8102_v58  ;;  %v6145_v61 = vld [vmem:[%s10220_s3 + $0x1e0] sm:$0xff]  ;;  %v4168_v48 = vunpack.c.l.bf16 %v6117_v14  ;;  %v4169_v50 = vunpack.c.h.bf16 %v6117_v14  ;;  %v4370_v52 = vunpack.c.l.bf16 %v6137_v47  ;;  %v4525_v14 = vunpack.c.l.bf16 %v4488_v3 }
 0xe70   :  { %4394 = vmatprep.subr.mxu0 %v4393_v54  ;;  %4204 = vmatprep.subr.mxu1 %v4187_v56  ;;  %v4387_v25 = vunpack.c.h.bf16 %v6145_v61  ;;  %v4386_v28 = vunpack.c.l.bf16 %v6145_v61  ;;  %v4371_v54 = vunpack.c.h.bf16 %v6137_v47  ;;  %v6116_v56 = vld [vmem:[%s10220_s3 + $0x108] sm:$0xff]  ;;  %v4486_v47 = vld [vmem:[%s10178_s12 + $0x18] sm:$0xff] }
 0xe71   :  { %4205 = vmatpush1.msra.mxu1 %v4186_v62  ;;  %v4167_v62 = vunpack.c.h.bf16 %v6116_v56 }
 0xe72   :  { %8021 = vmatmul.mubr.msk.f32.vlgmr.msra.gmra.mxu0 %vm3682_vm5, %v4271_v2  ;;  %4206 = vmatprep.subr.mxu1 %v4185_v4  ;;  %v4166_v2 = vunpack.c.l.bf16 %v6116_v56  ;;  %v4368_v4 = vunpack.c.l.bf16 %v6136_v60  ;;  %v4521_v56 = vunpack.c.l.bf16 %v4486_v47  ;;  %v4484_v60 = vld [vmem:[%s10178_s12 + $0x8] sm:$0xff] }
 0xe73   :  { %4395 = vmatpush1.msra.mxu0 %v4392_v6  ;;  %4207 = vmatpush1.msra.mxu1 %v4184_v11  ;;  %v6115_v6 = vld [vmem:[%s10220_s3 + $0x100] sm:$0xff] }
 0xe74   :  { %4396 = vmatprep.subr.mxu0 %v4391_v13  ;;  %4208 = vmatprep.subr.mxu1 %v4183_v15  ;;  %v4165_v11 = vunpack.c.h.bf16 %v6115_v6  ;;  %v4164_v13 = vunpack.c.l.bf16 %v6115_v6  ;;  %v4366_v15 = vunpack.c.l.bf16 %v6135_v8  ;;  %v4517_v6 = vunpack.c.l.bf16 %v4484_v60  ;;  %v4514_v8 = vld [vmem:[%s10178_s12 + $0xf8] sm:$0xff] }
 0xe75   :  { %4397 = vmatpush1.msra.mxu0 %v4390_v16  ;;  %4209 = vmatpush1.msra.mxu1 %v4182_v17  ;;  %v6134_v16 = vld [vmem:[%s10220_s3 + $0x188] sm:$0xff] }
 0xe76   :  { %4398 = vmatprep.subr.mxu0 %v4389_v19  ;;  %4210 = vmatprep.subr.mxu1 %v4181_v20  ;;  %v4365_v61 = vunpack.c.h.bf16 %v6134_v16  ;;  %v4364_v17 = vunpack.c.l.bf16 %v6134_v16  ;;  %v4362_v19 = vunpack.c.l.bf16 %v6133_v18  ;;  %v4363_v20 = vunpack.c.h.bf16 %v6133_v18 }
 0xe77   :  { %4399 = vmatpush1.msra.mxu0 %v4388_v21  ;;  %4211 = vmatpush1.msra.mxu1 %v4180_v23  ;;  %v4498_v21 = vld [vmem:[%s10178_s12 + $0x78] sm:$0xff]  ;;  %v4577_v16 = vunpack.c.l.bf16 %v4514_v8 }
 0xe78   :  { %4400 = vmatprep.subr.mxu0 %v4387_v25  ;;  %4212 = vmatprep.subr.mxu1 %v4179_v26  ;;  %v4546_v22 = vunpack.c.h.bf16 %v4498_v21  ;;  %v4545_v26 = vunpack.c.l.bf16 %v4498_v21 }
 0xe79   :  { %4401 = vmatpush1.msra.mxu0 %v4386_v28  ;;  %4213 = vmatpush1.msra.mxu1 %v4178_v31  ;;  %v4496_v28 = vld [vmem:[%s10178_s12 + $0x68] sm:$0xff] }
 0xe7a   :  { %4402 = vmatprep.subr.mxu0 %v4385_v35  ;;  %4214 = vmatprep.subr.mxu1 %v4177_v36  ;;  %v4495_v35 = vld [vmem:[%s10178_s12 + $0x60] sm:$0xff]  ;;  %v4542_v36 = vunpack.c.h.bf16 %v4496_v28  ;;  %v4541_v38 = vunpack.c.l.bf16 %v4496_v28  ;;  %v4509_v28 = vld [vmem:[%s10178_s12 + $0xd0] sm:$0xff] }
 0xe7b   :  { %4403 = vmatpush1.msra.mxu0 %v4384_v37  ;;  %4215 = vmatpush1.msra.mxu1 %v4176_v39  ;;  %v4494_v39 = vld [vmem:[%s10178_s12 + $0x58] sm:$0xff]  ;;  %v4540_v40 = vunpack.c.h.bf16 %v4495_v35 }
 0xe7c   :  { %4404 = vmatprep.subr.mxu0 %v4383_v41  ;;  %4216 = vmatprep.subr.mxu1 %v4175_v42  ;;  %v4539_v42 = vunpack.c.l.bf16 %v4495_v35  ;;  %v4538_v44 = vunpack.c.h.bf16 %v4494_v39  ;;  %v4568_v35 = vunpack.c.h.bf16 %v4509_v28 }
 0xe7d   :  { %4405 = vmatpush1.msra.mxu0 %v4382_v43  ;;  %4217 = vmatpush1.msra.mxu1 %v4174_v27  ;;  %v4493_v43 = vld [vmem:[%s10178_s12 + $0x50] sm:$0xff] }
 0xe7e   :  { %4406 = vmatprep.subr.mxu0 %v4381_v45  ;;  %4218 = vmatprep.subr.mxu1 %v4173_v46  ;;  %v4537_v45 = vunpack.c.l.bf16 %v4494_v39  ;;  %v4492_v46 = vld [vmem:[%s10178_s12 + $0x48] sm:$0xff]  ;;  %v4535_v30 = vunpack.c.l.bf16 %v4493_v43 }
 0xe7f   :  { %4407 = vmatpush1.msra.mxu0 %v4380_v49  ;;  %4219 = vmatpush1.msra.mxu1 %v4172_v51  ;;  %v4536_v49 = vunpack.c.h.bf16 %v4493_v43  ;;  %v4491_v51 = vld [vmem:[%s10178_s12 + $0x40] sm:$0xff] }
 0xe80   :  { %4408 = vmatprep.subr.mxu0 %v4379_v32  ;;  %4458 = vmatprep.mubr.f32.mxu0 %v8102_v58  ;;  %v4534_v32 = vunpack.c.h.bf16 %v4492_v46 }
 0xe81   :  { %4409 = vmatpush1.msra.mxu0 %v4378_v34  ;;  %4220 = vmatprep.subr.mxu1 %v4171_v7  ;;  %v4533_v34 = vunpack.c.l.bf16 %v4492_v46 }
 0xe82   :  { %4410 = vmatprep.subr.mxu0 %v4377_v55  ;;  %4221 = vmatpush1.msra.mxu1 %v4170_v5  ;;  %v4532_v55 = vunpack.c.h.bf16 %v4491_v51 }
 0xe83   :  { %4411 = vmatpush1.msra.mxu0 %v4376_v57  ;;  %4222 = vmatprep.subr.mxu1 %v4169_v50  ;;  %v4531_v57 = vunpack.c.l.bf16 %v4491_v51 }
 0xe84   :  { %4412 = vmatprep.subr.mxu0 %v4375_v59  ;;  %4223 = vmatpush1.msra.mxu1 %v4168_v48  ;;  %v4489_v59 = vld [vmem:[%s10178_s12 + $0x30] sm:$0xff] }
 0xe85   :  { %4413 = vmatpush1.msra.mxu0 %v4374_v63  ;;  %4224 = vmatprep.subr.mxu1 %v4167_v62  ;;  %v4530_v63 = vunpack.c.h.bf16 %v4490_v53  ;;  %v4528_v5 = vunpack.c.h.bf16 %v4489_v59  ;;  %v4527_v7 = vunpack.c.l.bf16 %v4489_v59 }
 0xe86   :  { %4414 = vmatprep.subr.mxu0 %v4373_v10  ;;  %4225 = vmatpush1.msra.mxu1 %v4166_v2  ;;  %v4526_v10 = vunpack.c.h.bf16 %v4488_v3  ;;  %v4483_v2 = vld [vmem:[%s10178_s12] sm:$0xff] }
 0xe87   :  { %4415 = vmatpush1.msra.mxu0 %v4372_v9  ;;  %4226 = vmatprep.subr.mxu1 %v4165_v11  ;;  %v4487_v9 = vld [vmem:[%s10178_s12 + $0x20] sm:$0xff]  ;;  %v4516_v11 = vunpack.c.h.bf16 %v4483_v2 }
 0xe88   :  { %4416 = vmatprep.subr.mxu0 %v4371_v54  ;;  %4227 = vmatpush1.msra.mxu1 %v4164_v13  ;;  %v4524_v48 = vunpack.c.h.bf16 %v4487_v9  ;;  %v4523_v50 = vunpack.c.l.bf16 %v4487_v9  ;;  %v4522_v54 = vunpack.c.h.bf16 %v4486_v47  ;;  %v4513_v13 = vld [vmem:[%s10178_s12 + $0xf0] sm:$0xff] }
 0xe89   :  { %4417 = vmatpush1.msra.mxu0 %v4370_v52  ;;  %4591 = vmatprep.subr.mxu1 %v4546_v22  ;;  %v4485_v52 = vld [vmem:[%s10178_s12 + $0x10] sm:$0xff]  ;;  %v4575_v18 = vunpack.c.l.bf16 %v4513_v13  ;;  %v4510_v22 = vld [vmem:[%s10178_s12 + $0xd8] sm:$0xff] }
 0xe8a   :  { %4418 = vmatprep.subr.mxu0 %v4369_v0  ;;  %v4520_v62 = vunpack.c.h.bf16 %v4485_v52  ;;  %v4519_v0 = vunpack.c.l.bf16 %v4485_v52  ;;  %v4677_v52 = vld [vmem:[%s10180_s14 + $0x68] sm:$0xff] }
 0xe8b   :  { %4419 = vmatpush1.msra.mxu0 %v4368_v4  ;;  %v4518_v4 = vunpack.c.h.bf16 %v4484_v60 }
 0xe8c   :  { %4420 = vmatprep.subr.mxu0 %v4367_v12  ;;  %v4515_v12 = vunpack.c.l.bf16 %v4483_v2  ;;  %v4723_v2 = vunpack.c.h.bf16 %v4677_v52 }
 0xe8d   :  { %4421 = vmatpush1.msra.mxu0 %v4366_v15  ;;  %v4578_v15 = vunpack.c.h.bf16 %v4514_v8 }
 0xe8e   :  { %4422 = vmatprep.subr.mxu0 %v4365_v61  ;;  %v4512_v61 = vld [vmem:[%s10178_s12 + $0xe8] sm:$0xff] }
 0xe8f   :  { %4423 = vmatpush1.msra.mxu0 %v4364_v17  ;;  %v4576_v17 = vunpack.c.h.bf16 %v4513_v13  ;;  %v4573_v21 = vunpack.c.l.bf16 %v4512_v61 }
 0xe90   :  { %4424 = vmatprep.subr.mxu0 %v4363_v20  ;;  %v4574_v20 = vunpack.c.h.bf16 %v4512_v61 }
 0xe91   :  { %4425 = vmatpush1.msra.mxu0 %v4362_v19  ;;  %v4511_v19 = vld [vmem:[%s10178_s12 + $0xe0] sm:$0xff] }
 0xe92   :  { %v4572_v24 = vunpack.c.h.bf16 %v4511_v19 }
 0xf2a   :  { %v9462_v23 = vpop.f32.mrf.mxu0 }
 0xf2c   :  { %v9467_v25 = vpop.f32.mrf.mxu0 }
 0xf2e   :  { %v4143_v31 = vpop.f32.mrf.mxu0 }
 0xf2f   :  { %4261 = vmatmul.mubr.f32.vlgmr.msra.gmra.mxu1 %v4143_v31  ;;  %v4569_v31 = vunpack.c.l.bf16 %v4510_v22 }
 0xf30   :  { %v8017_v37 = vpop.f32.mrf.mxu0  ;;  %4592 = vmatpush1.msra.mxu1 %v4545_v26  ;;  %v4571_v26 = vunpack.c.l.bf16 %v4511_v19 }
 0xf31   :  { %4593 = vmatprep.subr.mxu1 %v4544_v29  ;;  %v4570_v29 = vunpack.c.h.bf16 %v4510_v22  ;;  %v4507_v37 = vld [vmem:[%s10178_s12 + $0xc0] sm:$0xff] }
 0xf32   :  { %v4341_v41 = vpop.f32.mrf.mxu0  ;;  %4594 = vmatpush1.msra.mxu1 %v4543_v33  ;;  %v4508_v33 = vld [vmem:[%s10178_s12 + $0xc8] sm:$0xff] }
 0xf33   :  { %4459 = vmatmul.mubr.f32.vlgmr.msra.gmra.mxu0 %v4341_v41  ;;  %4595 = vmatprep.subr.mxu1 %v4542_v36  ;;  %v4567_v36 = vunpack.c.l.bf16 %v4509_v28  ;;  %v4565_v39 = vunpack.c.l.bf16 %v4508_v33  ;;  %v4564_v41 = vunpack.c.h.bf16 %v4507_v37 }
 0xf34   :  { %v8022_v27 = vpop.f32.mrf.mxu0  ;;  %4596 = vmatpush1.msra.mxu1 %v4541_v38  ;;  %v4566_v38 = vunpack.c.h.bf16 %v4508_v33 }
 0xf35   :  { %4597 = vmatprep.subr.mxu1 %v4540_v40  ;;  %v4506_v40 = vld [vmem:[%s10178_s12 + $0xb8] sm:$0xff]  ;;  %v4505_v27 = vld [vmem:[%s10178_s12 + $0xb0] sm:$0xff] }
 0xf36   :  { %4598 = vmatpush1.msra.mxu1 %v4539_v42  ;;  %v4563_v42 = vunpack.c.l.bf16 %v4507_v37  ;;  %v4562_v43 = vunpack.c.h.bf16 %v4506_v40  ;;  %v4559_v46 = vunpack.c.l.bf16 %v4505_v27 }
 0xf37   :  { %4599 = vmatprep.subr.mxu1 %v4538_v44  ;;  %v4561_v44 = vunpack.c.l.bf16 %v4506_v40 }
 0xf38   :  { %4600 = vmatpush1.msra.mxu1 %v4537_v45  ;;  %v4560_v45 = vunpack.c.h.bf16 %v4505_v27  ;;  %v4665_v27 = vld [vmem:[%s10180_s14 + $0x8] sm:$0xff] }
 0xf39   :  { %4601 = vmatprep.subr.mxu1 %v4536_v49  ;;  %v4504_v49 = vld [vmem:[%s10178_s12 + $0xa8] sm:$0xff] }
 0xf3a   :  { %4602 = vmatpush1.msra.mxu1 %v4535_v30  ;;  %v4558_v30 = vunpack.c.h.bf16 %v4504_v49  ;;  %v4557_v51 = vunpack.c.l.bf16 %v4504_v49  ;;  %v4664_v49 = vld [vmem:[%s10180_s14] sm:$0xff] }
 0xf3b   :  { %4603 = vmatprep.subr.mxu1 %v4534_v32  ;;  %v4503_v32 = vld [vmem:[%s10178_s12 + $0xa0] sm:$0xff] }
 0xf3c   :  { %4604 = vmatpush1.msra.mxu1 %v4533_v34  ;;  %v4556_v34 = vunpack.c.h.bf16 %v4503_v32  ;;  %v4555_v53 = vunpack.c.l.bf16 %v4503_v32  ;;  %v4695_v32 = vld [vmem:[%s10180_s14 + $0xf8] sm:$0xff] }
 0xf3d   :  { %4605 = vmatprep.subr.mxu1 %v4532_v55  ;;  %v4502_v55 = vld [vmem:[%s10178_s12 + $0x98] sm:$0xff] }
 0xf3e   :  { %4606 = vmatpush1.msra.mxu1 %v4531_v57  ;;  %v4554_v57 = vunpack.c.h.bf16 %v4502_v55  ;;  %v4553_v59 = vunpack.c.l.bf16 %v4502_v55  ;;  %v4694_v55 = vld [vmem:[%s10180_s14 + $0xf0] sm:$0xff] }
 0xf3f   :  { %4607 = vmatprep.subr.mxu1 %v4530_v63  ;;  %v4501_v63 = vld [vmem:[%s10178_s12 + $0x90] sm:$0xff] }
 0xf40   :  { %4608 = vmatpush1.msra.mxu1 %v4529_v1  ;;  %v4552_v1 = vunpack.c.h.bf16 %v4501_v63  ;;  %v4551_v3 = vunpack.c.l.bf16 %v4501_v63  ;;  %v4693_v63 = vld [vmem:[%s10180_s14 + $0xe8] sm:$0xff] }
 0xf41   :  { %4609 = vmatprep.subr.mxu1 %v4528_v5  ;;  %v4500_v5 = vld [vmem:[%s10178_s12 + $0x88] sm:$0xff] }
 0xf42   :  { %4610 = vmatpush1.msra.mxu1 %v4527_v7  ;;  %v4550_v7 = vunpack.c.h.bf16 %v4500_v5  ;;  %v4549_v9 = vunpack.c.l.bf16 %v4500_v5  ;;  %v4692_v5 = vld [vmem:[%s10180_s14 + $0xe0] sm:$0xff] }
 0xf43   :  { %4611 = vmatprep.subr.mxu1 %v4526_v10  ;;  %v4499_v10 = vld [vmem:[%s10178_s12 + $0x80] sm:$0xff] }
 0xf44   :  { %4612 = vmatpush1.msra.mxu1 %v4525_v14  ;;  %v4547_v14 = vunpack.c.l.bf16 %v4499_v10  ;;  %v4548_v47 = vunpack.c.h.bf16 %v4499_v10  ;;  %v4691_v10 = vld [vmem:[%s10180_s14 + $0xd8] sm:$0xff] }
 0xf45   :  { %4613 = vmatprep.subr.mxu1 %v4524_v48  ;;  %v4679_v48 = vld [vmem:[%s10180_s14 + $0x78] sm:$0xff] }
 0xf46   :  { %4614 = vmatpush1.msra.mxu1 %v4523_v50  ;;  %v4678_v50 = vld [vmem:[%s10180_s14 + $0x70] sm:$0xff] }
 0xf47   :  { %4615 = vmatprep.subr.mxu1 %v4522_v54  ;;  %v4726_v54 = vunpack.c.l.bf16 %v4679_v48  ;;  %v4725_v60 = vunpack.c.h.bf16 %v4678_v50 }
 0xf48   :  { %4616 = vmatpush1.msra.mxu1 %v4521_v56  ;;  %v4727_v56 = vunpack.c.h.bf16 %v4679_v48  ;;  %v4690_v48 = vld [vmem:[%s10180_s14 + $0xd0] sm:$0xff] }
 0xf49   :  { %4617 = vmatprep.subr.mxu1 %v4520_v62  ;;  %v4724_v62 = vunpack.c.l.bf16 %v4678_v50  ;;  %v4751_v50 = vunpack.c.h.bf16 %v4691_v10 }
 0xf4a   :  { %4618 = vmatpush1.msra.mxu1 %v4519_v0  ;;  %v4676_v0 = vld [vmem:[%s10180_s14 + $0x60] sm:$0xff]  ;;  %4772 = vmatprep.subr.mxu0 %v4727_v56  ;;  %v4749_v56 = vunpack.c.h.bf16 %v4690_v48 }
 0xf4b   :  { %4619 = vmatprep.subr.mxu1 %v4518_v4  ;;  %4773 = vmatpush1.msra.mxu0 %v4726_v54  ;;  %v4722_v4 = vunpack.c.l.bf16 %v4677_v52  ;;  %v4721_v8 = vunpack.c.h.bf16 %v4676_v0  ;;  %v4750_v52 = vunpack.c.l.bf16 %v4691_v10  ;;  %v4689_v54 = vld [vmem:[%s10180_s14 + $0xc8] sm:$0xff] }
 0xf4c   :  { %4620 = vmatpush1.msra.mxu1 %v4517_v6  ;;  %v4675_v6 = vld [vmem:[%s10180_s14 + $0x58] sm:$0xff]  ;;  %4774 = vmatprep.subr.mxu0 %v4725_v60  ;;  %v4748_v60 = vunpack.c.l.bf16 %v4690_v48  ;;  %v4858_v10 = vld [vmem:[%s10182_s16 + $0x68] sm:$0xff] }
 0xf4d   :  { %4621 = vmatprep.subr.mxu1 %v4516_v11  ;;  %4775 = vmatpush1.msra.mxu0 %v4724_v62  ;;  %v4720_v11 = vunpack.c.l.bf16 %v4676_v0  ;;  %v4719_v13 = vunpack.c.h.bf16 %v4675_v6  ;;  %v4688_v62 = vld [vmem:[%s10180_s14 + $0xc0] sm:$0xff]  ;;  %v4747_v0 = vunpack.c.h.bf16 %v4689_v54 }
 0xf4e   :  { %4622 = vmatpush1.msra.mxu1 %v4515_v12  ;;  %v4674_v12 = vld [vmem:[%s10180_s14 + $0x50] sm:$0xff]  ;;  %4776 = vmatprep.subr.mxu0 %v4723_v2  ;;  %v4746_v2 = vunpack.c.l.bf16 %v4689_v54  ;;  %v4904_v54 = vunpack.c.h.bf16 %v4858_v10 }
 0xf4f   :  { %4623 = vmatprep.subr.mxu1 %v4578_v15  ;;  %4777 = vmatpush1.msra.mxu0 %v4722_v4  ;;  %v4718_v15 = vunpack.c.l.bf16 %v4675_v6  ;;  %v4717_v61 = vunpack.c.h.bf16 %v4674_v12  ;;  %v4687_v4 = vld [vmem:[%s10180_s14 + $0xb8] sm:$0xff]  ;;  %v4745_v6 = vunpack.c.h.bf16 %v4688_v62 }
 0xf50   :  { %4624 = vmatpush2.msra.mxu1 %v4577_v16  ;;  %v4673_v16 = vld [vmem:[%s10180_s14 + $0x48] sm:$0xff]  ;;  %4778 = vmatprep.subr.mxu0 %v4721_v8  ;;  %v4744_v8 = vunpack.c.l.bf16 %v4688_v62 }
 0xf51   :  { %4625 = vmatprep.subr.mxu1 %v4576_v17  ;;  %4779 = vmatpush1.msra.mxu0 %v4720_v11  ;;  %v4716_v17 = vunpack.c.l.bf16 %v4674_v12  ;;  %v4715_v19 = vunpack.c.h.bf16 %v4673_v16  ;;  %v4686_v11 = vld [vmem:[%s10180_s14 + $0xb0] sm:$0xff]  ;;  %v4743_v12 = vunpack.c.h.bf16 %v4687_v4 }
 0xf52   :  { %4626 = vmatpush2.msra.mxu1 %v4575_v18  ;;  %v4672_v18 = vld [vmem:[%s10180_s14 + $0x40] sm:$0xff]  ;;  %4780 = vmatprep.subr.mxu0 %v4719_v13  ;;  %v4742_v13 = vunpack.c.l.bf16 %v4687_v4 }
 0xf53   :  { %4627 = vmatprep.subr.mxu1 %v4574_v20  ;;  %4781 = vmatpush1.msra.mxu0 %v4718_v15  ;;  %v4714_v20 = vunpack.c.l.bf16 %v4673_v16  ;;  %v4713_v22 = vunpack.c.h.bf16 %v4672_v18  ;;  %v4685_v15 = vld [vmem:[%s10180_s14 + $0xa8] sm:$0xff]  ;;  %v4741_v16 = vunpack.c.h.bf16 %v4686_v11 }
 0xf54   :  { %4628 = vmatpush2.msra.mxu1 %v4573_v21  ;;  %v4671_v21 = vld [vmem:[%s10180_s14 + $0x38] sm:$0xff]  ;;  %4782 = vmatprep.subr.mxu0 %v4717_v61  ;;  %v4740_v61 = vunpack.c.l.bf16 %v4686_v11 }
 0xf55   :  { %4629 = vmatprep.subr.mxu1 %v4572_v24  ;;  %4783 = vmatpush1.msra.mxu0 %v4716_v17  ;;  %v4712_v24 = vunpack.c.l.bf16 %v4672_v18  ;;  %v4711_v28 = vunpack.c.h.bf16 %v4671_v21  ;;  %v4684_v17 = vld [vmem:[%s10180_s14 + $0xa0] sm:$0xff]  ;;  %v4739_v18 = vunpack.c.h.bf16 %v4685_v15 }
 0xf56   :  { %4630 = vmatpush2.msra.mxu1 %v4571_v26  ;;  %v4670_v26 = vld [vmem:[%s10180_s14 + $0x30] sm:$0xff]  ;;  %4784 = vmatprep.subr.mxu0 %v4715_v19  ;;  %v4738_v19 = vunpack.c.l.bf16 %v4685_v15 }
 0xf57   :  { %4631 = vmatprep.subr.mxu1 %v4570_v29  ;;  %4785 = vmatpush1.msra.mxu0 %v4714_v20  ;;  %v4710_v29 = vunpack.c.l.bf16 %v4671_v21  ;;  %v4709_v33 = vunpack.c.h.bf16 %v4670_v26  ;;  %v4737_v20 = vunpack.c.h.bf16 %v4684_v17  ;;  %v4736_v21 = vunpack.c.l.bf16 %v4684_v17 }
 0xf58   :  { %4632 = vmatpush2.msra.mxu1 %v4569_v31  ;;  %v4669_v31 = vld [vmem:[%s10180_s14 + $0x28] sm:$0xff]  ;;  %4786 = vmatprep.subr.mxu0 %v4713_v22  ;;  %v4469_v22 = vlaneseq }
 0xf59   :  { %4633 = vmatprep.subr.mxu1 %v4568_v35  ;;  %4787 = vmatpush1.msra.mxu0 %v4712_v24  ;;  %v4708_v35 = vunpack.c.l.bf16 %v4670_v26  ;;  %v4707_v37 = vunpack.c.h.bf16 %v4669_v31  ;;  %v4066_v24 = vpop.f32.mrf.mxu1 }
 0xf5a   :  { %4634 = vmatpush2.msra.mxu1 %v4567_v36  ;;  %v4668_v36 = vld [vmem:[%s10180_s14 + $0x20] sm:$0xff]  ;;  %4788 = vmatprep.subr.mxu0 %v4711_v28  ;;  %v9643_v26 = vshrl.u32 %v4469_v22, 7  ;;  %v4850_v22 = vld [vmem:[%s10182_s16 + $0x28] sm:$0xff] }
 0xf5b   :  { %4635 = vmatprep.subr.mxu1 %v4566_v38  ;;  %4789 = vmatpush1.msra.mxu0 %v4710_v29  ;;  %v4706_v38 = vunpack.c.l.bf16 %v4669_v31  ;;  %v4705_v40 = vunpack.c.h.bf16 %v4668_v36  ;;  %v4068_v28 = vpop.f32.mrf.mxu1 }
 0xf5c   :  { %4636 = vmatpush2.msra.mxu1 %v4565_v39  ;;  %v4667_v39 = vld [vmem:[%s10180_s14 + $0x18] sm:$0xff]  ;;  %4790 = vmatprep.subr.mxu0 %v4709_v33  ;;  %v9646_v31 = vsub.s32 0, %v9643_v26  ;;  %v4067_v33 = vadd.f32 %v4066_v24, %v9462_v23 }
 0xf5d   :  { %4637 = vmatprep.subr.mxu1 %v4564_v41  ;;  %4791 = vmatpush1.msra.mxu0 %v4708_v35  ;;  %v4704_v41 = vunpack.c.l.bf16 %v4668_v36  ;;  %v4467_v35 = vld [vmem:[%s10177_s11] sm:$0x3]  ;;  %v9653_v36 = vsub.s32 1, %v9643_v26 }
 0xf5e   :  { %4638 = vmatpush2.msra.mxu1 %v4563_v42  ;;  %v4666_v42 = vld [vmem:[%s10180_s14 + $0x10] sm:$0xff]  ;;  %4792 = vmatprep.subr.mxu0 %v4707_v37 }
 0xf5f   :  { %4639 = vmatprep.subr.mxu1 %v4562_v43  ;;  %v4703_v43 = vunpack.c.h.bf16 %v4667_v39  ;;  %4793 = vmatpush1.msra.mxu0 %v4706_v38  ;;  %v4069_v38 = vadd.f32 %v4068_v28, %v9467_v25  ;;  %v4683_v25 = vld [vmem:[%s10180_s14 + $0x98] sm:$0xff] }
 0xf60   :  { %4640 = vmatpush2.msra.mxu1 %v4561_v44  ;;  %v4702_v44 = vunpack.c.l.bf16 %v4667_v39  ;;  %4794 = vmatprep.subr.mxu0 %v4705_v40 }
 0xf61   :  { %4641 = vmatprep.subr.mxu1 %v4560_v45  ;;  %v4701_v45 = vunpack.c.h.bf16 %v4666_v42  ;;  %4795 = vmatpush1.msra.mxu0 %v4704_v41  ;;  %v4472_v41 = vrot.slane %v4467_v35, %v9646_v31 }
 0xf62   :  { %4642 = vmatpush2.msra.mxu1 %v4559_v46  ;;  %v4700_v46 = vunpack.c.l.bf16 %v4666_v42  ;;  %4796 = vmatprep.subr.mxu0 %v4703_v43 }
 0xf63   :  { %4643 = vmatprep.subr.mxu1 %v4558_v30  ;;  %v4699_v30 = vunpack.c.h.bf16 %v4665_v27  ;;  %4797 = vmatpush1.msra.mxu0 %v4702_v44  ;;  %v4476_v44 = vrot.slane %v4467_v35, %v9653_v36  ;;  %v4887_v35 = vunpack.c.l.bf16 %v4850_v22 }
 0xf64   :  { %4644 = vmatpush2.msra.mxu1 %v4557_v51  ;;  %v4698_v51 = vunpack.c.l.bf16 %v4665_v27  ;;  %4798 = vmatprep.subr.mxu0 %v4701_v45 }
 0xf65   :  { %4645 = vmatprep.subr.mxu1 %v4556_v34  ;;  %v4697_v34 = vunpack.c.h.bf16 %v4664_v49  ;;  %4799 = vmatpush1.msra.mxu0 %v4700_v46 }
 0xf66   :  { %4646 = vmatpush2.msra.mxu1 %v4555_v53  ;;  %v4696_v53 = vunpack.c.l.bf16 %v4664_v49  ;;  %4800 = vmatprep.subr.mxu0 %v4699_v30 }
 0xf67   :  { %4647 = vmatprep.subr.mxu1 %v4554_v57  ;;  %v4759_v57 = vunpack.c.h.bf16 %v4695_v32  ;;  %4801 = vmatpush1.msra.mxu0 %v4698_v51  ;;  %v4735_v51 = vunpack.c.h.bf16 %v4683_v25 }
 0xf68   :  { %4648 = vmatpush2.msra.mxu1 %v4553_v59  ;;  %v4758_v59 = vunpack.c.l.bf16 %v4695_v32  ;;  %4802 = vmatprep.subr.mxu0 %v4697_v34  ;;  %v4734_v32 = vunpack.c.l.bf16 %v4683_v25  ;;  %v4682_v34 = vld [vmem:[%s10180_s14 + $0x90] sm:$0xff] }
 0xf69   :  { %4649 = vmatprep.subr.mxu1 %v4552_v1  ;;  %v4757_v1 = vunpack.c.h.bf16 %v4694_v55  ;;  %4803 = vmatpush1.msra.mxu0 %v4696_v53  ;;  %v4733_v53 = vunpack.c.h.bf16 %v4682_v34 }
 0xf6a   :  { %4650 = vmatpush2.msra.mxu1 %v4551_v3  ;;  %v4756_v3 = vunpack.c.l.bf16 %v4694_v55  ;;  %4804 = vmatprep.subr.mxu0 %v4759_v57  ;;  %v4732_v55 = vunpack.c.l.bf16 %v4682_v34  ;;  %v4681_v57 = vld [vmem:[%s10180_s14 + $0x88] sm:$0xff] }
 0xf6b   :  { %4651 = vmatprep.subr.mxu1 %v4550_v7  ;;  %v4755_v7 = vunpack.c.h.bf16 %v4693_v63  ;;  %4805 = vmatpush2.msra.mxu0 %v4758_v59  ;;  %v4731_v59 = vunpack.c.h.bf16 %v4681_v57 }
 0xf6c   :  { %4652 = vmatpush2.msra.mxu1 %v4549_v9  ;;  %v4754_v9 = vunpack.c.l.bf16 %v4693_v63  ;;  %4806 = vmatprep.subr.mxu0 %v4757_v1  ;;  %v4730_v63 = vunpack.c.l.bf16 %v4681_v57  ;;  %v4680_v1 = vld [vmem:[%s10180_s14 + $0x80] sm:$0xff] }
 0xf6d   :  { %4653 = vmatprep.subr.mxu1 %v4548_v47  ;;  %4807 = vmatpush2.msra.mxu0 %v4756_v3  ;;  %v4752_v47 = vunpack.c.l.bf16 %v4692_v5  ;;  %v4728_v3 = vunpack.c.l.bf16 %v4680_v1 }
 0xf6e   :  { %4654 = vmatpush2.msra.mxu1 %v4547_v14  ;;  %v4753_v14 = vunpack.c.h.bf16 %v4692_v5  ;;  %4808 = vmatprep.subr.mxu0 %v4755_v7  ;;  %v4729_v5 = vunpack.c.h.bf16 %v4680_v1  ;;  %v4860_v7 = vld [vmem:[%s10182_s16 + $0x78] sm:$0xff] }
 0xf6f   :  { %4809 = vmatpush2.msra.mxu0 %v4754_v9  ;;  %v4859_v9 = vld [vmem:[%s10182_s16 + $0x70] sm:$0xff] }
 0xf70   :  { %4810 = vmatprep.subr.mxu0 %v4753_v14  ;;  %v4907_v14 = vunpack.c.l.bf16 %v4860_v7  ;;  %v4906_v48 = vunpack.c.h.bf16 %v4859_v9 }
 0xf71   :  { %4811 = vmatpush2.msra.mxu0 %v4752_v47  ;;  %v4908_v47 = vunpack.c.h.bf16 %v4860_v7 }
 0xf72   :  { %4812 = vmatprep.subr.mxu0 %v4751_v50  ;;  %v4905_v50 = vunpack.c.l.bf16 %v4859_v9  ;;  %v4871_v9 = vld [vmem:[%s10182_s16 + $0xd0] sm:$0xff] }
 0xf73   :  { %4813 = vmatpush2.msra.mxu0 %v4750_v52  ;;  %v4857_v52 = vld [vmem:[%s10182_s16 + $0x60] sm:$0xff]  ;;  %4953 = vmatprep.subr.mxu1 %v4908_v47  ;;  %v4870_v47 = vld [vmem:[%s10182_s16 + $0xc8] sm:$0xff] }
 0xf74   :  { %4814 = vmatprep.subr.mxu0 %v4749_v56  ;;  %v4903_v56 = vunpack.c.l.bf16 %v4858_v10  ;;  %v4902_v62 = vunpack.c.h.bf16 %v4857_v52 }
 0xf75   :  { %4815 = vmatpush2.msra.mxu0 %v4748_v60  ;;  %v4856_v60 = vld [vmem:[%s10182_s16 + $0x58] sm:$0xff] }
 0xf76   :  { %4816 = vmatprep.subr.mxu0 %v4747_v0  ;;  %v4901_v0 = vunpack.c.l.bf16 %v4857_v52  ;;  %v4900_v4 = vunpack.c.h.bf16 %v4856_v60  ;;  %v4869_v52 = vld [vmem:[%s10182_s16 + $0xc0] sm:$0xff] }
 0xf77   :  { %4817 = vmatpush2.msra.mxu0 %v4746_v2  ;;  %v4855_v2 = vld [vmem:[%s10182_s16 + $0x50] sm:$0xff] }
 0xf78   :  { %4818 = vmatprep.subr.mxu0 %v4745_v6  ;;  %v4899_v6 = vunpack.c.l.bf16 %v4856_v60  ;;  %v4898_v11 = vunpack.c.h.bf16 %v4855_v2  ;;  %v4868_v60 = vld [vmem:[%s10182_s16 + $0xb8] sm:$0xff] }
 0xf79   :  { %4819 = vmatpush2.msra.mxu0 %v4744_v8  ;;  %v4854_v8 = vld [vmem:[%s10182_s16 + $0x48] sm:$0xff] }
 0xf7a   :  { %4820 = vmatprep.subr.mxu0 %v4743_v12  ;;  %v4897_v12 = vunpack.c.l.bf16 %v4855_v2  ;;  %v4896_v15 = vunpack.c.h.bf16 %v4854_v8  ;;  %v4867_v2 = vld [vmem:[%s10182_s16 + $0xb0] sm:$0xff] }
 0xf7b   :  { %4821 = vmatpush2.msra.mxu0 %v4742_v13  ;;  %v4853_v13 = vld [vmem:[%s10182_s16 + $0x40] sm:$0xff] }
 0xf7c   :  { %4822 = vmatprep.subr.mxu0 %v4741_v16  ;;  %v4895_v16 = vunpack.c.l.bf16 %v4854_v8  ;;  %v4894_v17 = vunpack.c.h.bf16 %v4853_v13  ;;  %v4866_v8 = vld [vmem:[%s10182_s16 + $0xa8] sm:$0xff] }
 0xf7d   :  { %4823 = vmatpush2.msra.mxu0 %v4740_v61  ;;  %v4852_v61 = vld [vmem:[%s10182_s16 + $0x38] sm:$0xff] }
 0xf7e   :  { %4824 = vmatprep.subr.mxu0 %v4739_v18  ;;  %v4893_v18 = vunpack.c.l.bf16 %v4853_v13  ;;  %v4865_v13 = vld [vmem:[%s10182_s16 + $0xa0] sm:$0xff] }
 0xf7f   :  { %4825 = vmatpush2.msra.mxu0 %v4738_v19  ;;  %v4851_v19 = vld [vmem:[%s10182_s16 + $0x30] sm:$0xff] }
 0xf80   :  { %4826 = vmatprep.subr.mxu0 %v4737_v20  ;;  %v4892_v20 = vunpack.c.h.bf16 %v4852_v61  ;;  %v4890_v24 = vunpack.c.h.bf16 %v4851_v19  ;;  %v4889_v28 = vunpack.c.l.bf16 %v4851_v19 }
 0xf81   :  { %4827 = vmatpush2.msra.mxu0 %v4736_v21  ;;  %v4891_v21 = vunpack.c.l.bf16 %v4852_v61  ;;  %v4918_v61 = vunpack.c.h.bf16 %v4865_v13 }
 0xf82   :  { %4828 = vmatprep.subr.mxu0 %v4735_v51  ;;  %v4875_v51 = vld [vmem:[%s10182_s16 + $0xf0] sm:$0xff] }
 0xf83   :  { %4829 = vmatpush2.msra.mxu0 %v4734_v32  ;;  %v4937_v57 = vunpack.c.l.bf16 %v4875_v51 }
 0xf84   :  { %4830 = vmatprep.subr.mxu0 %v4733_v53  ;;  %v4874_v53 = vld [vmem:[%s10182_s16 + $0xe8] sm:$0xff] }
 0xf85   :  { %4831 = vmatpush2.msra.mxu0 %v4732_v55  ;;  %v4938_v55 = vunpack.c.h.bf16 %v4875_v51  ;;  %v4935_v1 = vunpack.c.l.bf16 %v4874_v53 }
 0xf86   :  { %4832 = vmatprep.subr.mxu0 %v4731_v59  ;;  %v4873_v59 = vld [vmem:[%s10182_s16 + $0xe0] sm:$0xff] }
 0xf87   :  { %4833 = vmatpush2.msra.mxu0 %v4730_v63  ;;  %v4936_v63 = vunpack.c.h.bf16 %v4874_v53  ;;  %v4933_v7 = vunpack.c.l.bf16 %v4873_v59 }
 0xf88   :  { %4834 = vmatprep.subr.mxu0 %v4729_v5  ;;  %v4934_v5 = vunpack.c.h.bf16 %v4873_v59 }
 0xf89   :  { %4835 = vmatpush2.msra.mxu0 %v4728_v3  ;;  %v4872_v3 = vld [vmem:[%s10182_s16 + $0xd8] sm:$0xff] }
 0xf8a   :  { %v4932_v10 = vunpack.c.h.bf16 %v4872_v3 }
 0xfef   :  { %v4262_v29 = vpop.f32.mrf.mxu1 }
 0xff0   :  { %v4267_v39 = vadd.f32 %v4262_v29, %v4067_v33  ;;  %v4849_v29 = vld [vmem:[%s10182_s16 + $0x20] sm:$0xff]  ;;  %v4888_v33 = vunpack.c.h.bf16 %v4850_v22 }
 0xff1   :  { %v4264_v37 = vpop.f32.mrf.mxu1 }
 0xff2   :  { %v4268_v42 = vadd.f32 %v4264_v37, %v4069_v38  ;;  %v4848_v37 = vld [vmem:[%s10182_s16 + $0x18] sm:$0xff]  ;;  %v4886_v38 = vunpack.c.h.bf16 %v4849_v29 }
 0xff3   :  { %v4460_v40 = vpop.f32.mrf.mxu0 }
 0xff4   :  { %v4465_v43 = vadd.f32 %v4460_v40, %v4267_v39  ;;  %v4885_v39 = vunpack.c.l.bf16 %v4849_v29  ;;  %v4847_v40 = vld [vmem:[%s10182_s16 + $0x10] sm:$0xff] }
 0xff5   :  { %v4462_v27 = vpop.f32.mrf.mxu0 }
 0xff6   :  { %v4466_v23 = vadd.f32 %v4462_v27, %v4268_v42  ;;  %v4479_v45 = vadd.f32 %v4472_v41, %v4465_v43  ;;  %v4884_v41 = vunpack.c.h.bf16 %v4848_v37  ;;  %v4883_v42 = vunpack.c.l.bf16 %v4848_v37  ;;  %v4846_v43 = vld [vmem:[%s10182_s16 + $0x8] sm:$0xff] }
 0xff7   :  { %v4881_v27 = vunpack.c.l.bf16 %v4847_v40 }
 0xff8   :  { %v4480_v46 = vadd.f32 %v4476_v44, %v4466_v23  ;;  %v4481_v30 = vmax.f32 %v4479_v45, 0.0  ;;  %v4882_v44 = vunpack.c.h.bf16 %v4847_v40  ;;  %v4845_v23 = vld [vmem:[%s10182_s16] sm:$0xff]  ;;  %v4880_v45 = vunpack.c.h.bf16 %v4846_v43 }
 0xff9   :  { %v4877_v25 = vunpack.c.l.bf16 %v4845_v23 }
 0xffa   :  { %v4482_v49 = vmax.f32 %v4480_v46, 0.0  ;;  %v4879_v46 = vunpack.c.l.bf16 %v4846_v43 }
 0xffc   :  { %4655 = vmatprep.mubr.f32.mxu1 %v4482_v49  ;;  %v4876_v49 = vld [vmem:[%s10182_s16 + $0xf8] sm:$0xff] }
 0xffd   :  { %4656 = vmatmul.mubr.f32.vlgmr.msra.gmra.mxu1 %v4481_v30  ;;  %v4878_v30 = vunpack.c.h.bf16 %v4845_v23  ;;  %v4940_v32 = vunpack.c.h.bf16 %v4876_v49  ;;  %v4939_v34 = vunpack.c.l.bf16 %v4876_v49  ;;  %v9777_v49 = vld [vmem:[%s10184_s18 + $0xf8] sm:$0xff] }
 0xffe   :  { %4954 = vmatpush1.msra.mxu1 %v4907_v14  ;;  %v4931_v14 = vunpack.c.l.bf16 %v4872_v3  ;;  %v5153_v51 = vunpack.c.h.bf16 %v9777_v49 }
 0xfff   :  { %4955 = vmatprep.subr.mxu1 %v4906_v48  ;;  %v4930_v48 = vunpack.c.h.bf16 %v4871_v9 }
0x1000   :  { %4956 = vmatpush1.msra.mxu1 %v4905_v50  ;;  %v4929_v50 = vunpack.c.l.bf16 %v4871_v9 }
0x1001   :  { %4957 = vmatprep.subr.mxu1 %v4904_v54  ;;  %v4928_v54 = vunpack.c.h.bf16 %v4870_v47 }
0x1002   :  { %4958 = vmatpush1.msra.mxu1 %v4903_v56  ;;  %v4927_v56 = vunpack.c.l.bf16 %v4870_v47 }
0x1003   :  { %4959 = vmatprep.subr.mxu1 %v4902_v62  ;;  %v4926_v62 = vunpack.c.h.bf16 %v4869_v52 }
0x1004   :  { %4960 = vmatpush1.msra.mxu1 %v4901_v0  ;;  %v4925_v0 = vunpack.c.l.bf16 %v4869_v52 }
0x1005   :  { %4961 = vmatprep.subr.mxu1 %v4900_v4  ;;  %v4924_v4 = vunpack.c.h.bf16 %v4868_v60 }
0x1006   :  { %4962 = vmatpush1.msra.mxu1 %v4899_v6  ;;  %v4923_v6 = vunpack.c.l.bf16 %v4868_v60 }
0x1007   :  { %4963 = vmatprep.subr.mxu1 %v4898_v11  ;;  %v4922_v11 = vunpack.c.h.bf16 %v4867_v2 }
0x1008   :  { %4964 = vmatpush1.msra.mxu1 %v4897_v12  ;;  %v4921_v12 = vunpack.c.l.bf16 %v4867_v2 }
0x1009   :  { %4965 = vmatprep.subr.mxu1 %v4896_v15  ;;  %v4920_v15 = vunpack.c.h.bf16 %v4866_v8 }
0x100a   :  { %4966 = vmatpush1.msra.mxu1 %v4895_v16  ;;  %v4919_v16 = vunpack.c.l.bf16 %v4866_v8 }
0x100b   :  { %4967 = vmatprep.subr.mxu1 %v4894_v17  ;;  %v4917_v17 = vunpack.c.l.bf16 %v4865_v13 }
0x100c   :  { %4968 = vmatpush1.msra.mxu1 %v4893_v18  ;;  %v4579_v18 = vld [vmem:[%s10179_s13] sm:$0x3] }
0x100d   :  { %4969 = vmatprep.subr.mxu1 %v4892_v20  ;;  %v4584_v19 = vrot.slane %v4579_v18, %v9646_v31  ;;  %v4588_v20 = vrot.slane %v4579_v18, %v9653_v36 }
0x100e   :  { %4970 = vmatpush1.msra.mxu1 %v4891_v21 }
0x100f   :  { %4971 = vmatprep.subr.mxu1 %v4890_v24 }
0x1010   :  { %4972 = vmatpush1.msra.mxu1 %v4889_v28 }
0x1011   :  { %4973 = vmatprep.subr.mxu1 %v4888_v33 }
0x1012   :  { %4974 = vmatpush1.msra.mxu1 %v4887_v35  ;;  %v4864_v35 = vld [vmem:[%s10182_s16 + $0x98] sm:$0xff] }
0x1013   :  { %4975 = vmatprep.subr.mxu1 %v4886_v38  ;;  %v4916_v37 = vunpack.c.h.bf16 %v4864_v35  ;;  %v4915_v38 = vunpack.c.l.bf16 %v4864_v35 }
0x1014   :  { %4976 = vmatpush1.msra.mxu1 %v4885_v39  ;;  %v4863_v39 = vld [vmem:[%s10182_s16 + $0x90] sm:$0xff] }
0x1015   :  { %4977 = vmatprep.subr.mxu1 %v4884_v41  ;;  %v4914_v40 = vunpack.c.h.bf16 %v4863_v39  ;;  %v4913_v41 = vunpack.c.l.bf16 %v4863_v39 }
0x1016   :  { %4978 = vmatpush1.msra.mxu1 %v4883_v42  ;;  %v4862_v42 = vld [vmem:[%s10182_s16 + $0x88] sm:$0xff] }
0x1017   :  { %4979 = vmatprep.subr.mxu1 %v4882_v44  ;;  %v4912_v43 = vunpack.c.h.bf16 %v4862_v42  ;;  %v4911_v44 = vunpack.c.l.bf16 %v4862_v42 }
0x1018   :  { %4980 = vmatpush1.msra.mxu1 %v4881_v27  ;;  %v4861_v27 = vld [vmem:[%s10182_s16 + $0x80] sm:$0xff]  ;;  %s8104_s16 = smov [#allocation2]  }
0x1019   :  { %4981 = vmatprep.subr.mxu1 %v4880_v45  ;;  %v4909_v23 = vunpack.c.l.bf16 %v4861_v27  ;;  %v4910_v45 = vunpack.c.h.bf16 %v4861_v27  ;;  %s5876_s8 = sshll.u32 %s8104_s16, 4  ;;  %s5877_s8 = int_to_ptr.vmem [resolvable:$true] %s5876_s8 }
0x101a   :  { %4982 = vmatpush1.msra.mxu1 %v4879_v46  ;;  %v5056_v46 = vld [vmem:[%s10184_s18 + $0xf0] sm:$0xff]  ;;  %s8080_s1 = scalar_lea.vmem %s5877_s8, 32  ;;  %p8085_p1 = scmp.lt.s32.totalorder %s5877_s8, %s5877_s8 }
0x101b   :  { %4983 = vmatprep.subr.mxu1 %v4878_v30  ;;  %v5150_v30 = vunpack.c.l.bf16 %v5056_v46  ;;  %p8081_p0 = scmp.ne.s32.totalorder %s5877_s8, %s8080_s1  ;;  %p8086_p2 = scmp.lt.s32.totalorder %s8080_s1, %s8080_s1 }
0x101c   :  { %4984 = vmatpush1.msra.mxu1 %v4877_v25  ;;  %v5151_v25 = vunpack.c.h.bf16 %v5056_v46 }
0x101d   :  { %4985 = vmatprep.subr.mxu1 %v4940_v32  ;;  %v5054_v32 = vld [vmem:[%s10184_s18 + $0xe0] sm:$0xff]  ;;  %p8087_p3 = por %p8086_p2, %p8085_p1 }
0x101e   :  { %4986 = vmatpush2.msra.mxu1 %v4939_v34  ;;  %v5146_v34 = vunpack.c.l.bf16 %v5054_v32  ;;  %v5147_v53 = vunpack.c.h.bf16 %v5054_v32  ;;  %5240 = vmatprep.subr.mxu0 %v5151_v25  ;;  %v5080_v25 = vld [vmem:[%s10184_s18 + $0x1b0] sm:$0xff] }
0x101f   :  { %4987 = vmatprep.subr.mxu1 %v4938_v55  ;;  %v5052_v55 = vld [vmem:[%s10184_s18 + $0xd0] sm:$0xff]  ;;  %v5199_v32 = vunpack.c.h.bf16 %v5080_v25  ;;  %p8088_p4 = pnand %p8087_p3, %p8081_p0 }
0x1020   :  { %4988 = vmatpush2.msra.mxu1 %v4937_v57  ;;  %v5142_v57 = vunpack.c.l.bf16 %v5052_v55  ;;  %v5143_v59 = vunpack.c.h.bf16 %v5052_v55 }
0x1021   :  { %4989 = vmatprep.subr.mxu1 %v4936_v63  ;;  %v5050_v63 = vld [vmem:[%s10184_s18 + $0xc0] sm:$0xff] }
0x1022   :  { %4990 = vmatpush2.msra.mxu1 %v4935_v1  ;;  %v5138_v1 = vunpack.c.l.bf16 %v5050_v63  ;;  %v5139_v3 = vunpack.c.h.bf16 %v5050_v63 }
0x1023   :  { %4991 = vmatprep.subr.mxu1 %v4934_v5  ;;  %v5048_v5 = vld [vmem:[%s10184_s18 + $0xb0] sm:$0xff] }
0x1024   :  { %4992 = vmatpush2.msra.mxu1 %v4933_v7  ;;  %v5134_v7 = vunpack.c.l.bf16 %v5048_v5  ;;  %v5135_v9 = vunpack.c.h.bf16 %v5048_v5 }
0x1025   :  { %4993 = vmatprep.subr.mxu1 %v4932_v10  ;;  %v5046_v10 = vld [vmem:[%s10184_s18 + $0xa0] sm:$0xff] }
0x1026   :  { %4994 = vmatpush2.msra.mxu1 %v4931_v14  ;;  %v5130_v14 = vunpack.c.l.bf16 %v5046_v10  ;;  %v5131_v47 = vunpack.c.h.bf16 %v5046_v10 }
0x1027   :  { %4995 = vmatprep.subr.mxu1 %v4930_v48  ;;  %v5044_v48 = vld [vmem:[%s10184_s18 + $0x90] sm:$0xff] }
0x1028   :  { %4996 = vmatpush2.msra.mxu1 %v4929_v50  ;;  %v5126_v50 = vunpack.c.l.bf16 %v5044_v48  ;;  %v5127_v52 = vunpack.c.h.bf16 %v5044_v48 }
0x1029   :  { %4997 = vmatprep.subr.mxu1 %v4928_v54  ;;  %v5042_v54 = vld [vmem:[%s10184_s18 + $0x80] sm:$0xff] }
0x102a   :  { %4998 = vmatpush2.msra.mxu1 %v4927_v56  ;;  %v5122_v56 = vunpack.c.l.bf16 %v5042_v54  ;;  %v5123_v60 = vunpack.c.h.bf16 %v5042_v54 }
0x102b   :  { %4999 = vmatprep.subr.mxu1 %v4926_v62  ;;  %v5040_v62 = vld [vmem:[%s10184_s18 + $0x70] sm:$0xff] }
0x102c   :  { %5000 = vmatpush2.msra.mxu1 %v4925_v0  ;;  %v5118_v0 = vunpack.c.l.bf16 %v5040_v62  ;;  %v5119_v2 = vunpack.c.h.bf16 %v5040_v62 }
0x102d   :  { %5001 = vmatprep.subr.mxu1 %v4924_v4  ;;  %v5038_v4 = vld [vmem:[%s10184_s18 + $0x60] sm:$0xff] }
0x102e   :  { %5002 = vmatpush2.msra.mxu1 %v4923_v6  ;;  %v5114_v6 = vunpack.c.l.bf16 %v5038_v4  ;;  %v5115_v8 = vunpack.c.h.bf16 %v5038_v4 }
0x102f   :  { %5003 = vmatprep.subr.mxu1 %v4922_v11  ;;  %v5036_v11 = vld [vmem:[%s10184_s18 + $0x50] sm:$0xff] }
0x1030   :  { %5004 = vmatpush2.msra.mxu1 %v4921_v12  ;;  %v5110_v12 = vunpack.c.l.bf16 %v5036_v11  ;;  %v5111_v13 = vunpack.c.h.bf16 %v5036_v11 }
0x1031   :  { %5005 = vmatprep.subr.mxu1 %v4920_v15  ;;  %v5034_v15 = vld [vmem:[%s10184_s18 + $0x40] sm:$0xff] }
0x1032   :  { %5006 = vmatpush2.msra.mxu1 %v4919_v16  ;;  %v5106_v16 = vunpack.c.l.bf16 %v5034_v15 }
0x1033   :  { %5007 = vmatprep.subr.mxu1 %v4918_v61  ;;  %v5107_v61 = vunpack.c.h.bf16 %v5034_v15 }
0x1034   :  { %5008 = vmatpush2.msra.mxu1 %v4917_v17  ;;  %v5032_v17 = vld [vmem:[%s10184_s18 + $0x30] sm:$0xff] }
0x1035   :  { %5009 = vmatprep.subr.mxu1 %v4916_v37  ;;  %v5102_v18 = vunpack.c.l.bf16 %v5032_v17 }
0x1036   :  { %5010 = vmatpush2.msra.mxu1 %v4915_v38  ;;  %v5088_v38 = vld [vmem:[%s10184_s18 + $0x1f0] sm:$0xff] }
0x1037   :  { %5011 = vmatprep.subr.mxu1 %v4914_v40  ;;  %v5214_v39 = vunpack.c.l.bf16 %v5088_v38  ;;  %v5215_v40 = vunpack.c.h.bf16 %v5088_v38 }
0x1038   :  { %5012 = vmatpush2.msra.mxu1 %v4913_v41  ;;  %v5086_v41 = vld [vmem:[%s10184_s18 + $0x1e0] sm:$0xff] }
0x1039   :  { %5013 = vmatprep.subr.mxu1 %v4912_v43  ;;  %v5210_v42 = vunpack.c.l.bf16 %v5086_v41  ;;  %v5211_v43 = vunpack.c.h.bf16 %v5086_v41 }
0x103a   :  { %5014 = vmatpush2.msra.mxu1 %v4911_v44  ;;  %v5084_v44 = vld [vmem:[%s10184_s18 + $0x1d0] sm:$0xff] }
0x103b   :  { %5015 = vmatprep.subr.mxu1 %v4910_v45  ;;  %v5206_v27 = vunpack.c.l.bf16 %v5084_v44  ;;  %v5082_v45 = vld [vmem:[%s10184_s18 + $0x1c0] sm:$0xff] }
0x103c   :  { %5016 = vmatpush2.msra.mxu1 %v4909_v23  ;;  %v5207_v23 = vunpack.c.h.bf16 %v5084_v44  ;;  %v5202_v46 = vunpack.c.l.bf16 %v5082_v45 }
0x103d   :  { %5311 = vmatprep.subr.mxu1 %v5153_v51  ;;  %v5198_v51 = vunpack.c.l.bf16 %v5080_v25 }
0x10bd   :  { %v4657_v21 = vpop.f32.mrf.mxu1 }
0x10be   :  { %v4658_v22 = vadd.f32 %v4657_v21, %v4584_v19  ;;  %v5103_v19 = vunpack.c.h.bf16 %v5032_v17 }
0x10bf   :  { %v4659_v24 = vpop.f32.mrf.mxu1 }
0x10c0   :  { %v4660_v28 = vadd.f32 %v4659_v24, %v4588_v20  ;;  %v4662_v33 = vmax.f32 %v4658_v22, 0.0  ;;  %v5030_v20 = vld [vmem:[%s10184_s18 + $0x20] sm:$0xff]  ;;  %v5028_v24 = vld [vmem:[%s10184_s18 + $0x10] sm:$0xff] }
0x10c1   :  { %v5098_v21 = vunpack.c.l.bf16 %v5030_v20  ;;  %v5099_v22 = vunpack.c.h.bf16 %v5030_v20  ;;  %v5051_v20 = vld [vmem:[%s10184_s18 + $0xc8] sm:$0xff] }
0x10c2   :  { %v4663_v29 = vmax.f32 %v4660_v28, 0.0  ;;  %v5094_v28 = vunpack.c.l.bf16 %v5028_v24 }
0x10c4   :  { %4836 = vmatprep.mubr.f32.mxu0 %v4663_v29  ;;  %v5095_v29 = vunpack.c.h.bf16 %v5028_v24  ;;  %v5141_v24 = vunpack.c.h.bf16 %v5051_v20 }
0x10c5   :  { %4837 = vmatmul.mubr.f32.vlgmr.msra.gmra.mxu0 %v4662_v33  ;;  %v5026_v33 = vld [vmem:[%s10184_s18] sm:$0xff] }
0x10c6   :  { %5241 = vmatpush1.msra.mxu0 %v5150_v30  ;;  %v5090_v35 = vunpack.c.l.bf16 %v5026_v33  ;;  %v5091_v37 = vunpack.c.h.bf16 %v5026_v33  ;;  %v5203_v30 = vunpack.c.h.bf16 %v5082_v45 }
0x10c7   :  { %5242 = vmatprep.subr.mxu0 %v5147_v53 }
0x10c8   :  { %5243 = vmatpush1.msra.mxu0 %v5146_v34  ;;  %v5078_v34 = vld [vmem:[%s10184_s18 + $0x1a0] sm:$0xff] }
0x10c9   :  { %5244 = vmatprep.subr.mxu0 %v5143_v59  ;;  %v5194_v53 = vunpack.c.l.bf16 %v5078_v34  ;;  %v5195_v55 = vunpack.c.h.bf16 %v5078_v34 }
0x10ca   :  { %5245 = vmatpush1.msra.mxu0 %v5142_v57  ;;  %v5076_v57 = vld [vmem:[%s10184_s18 + $0x190] sm:$0xff] }
0x10cb   :  { %5246 = vmatprep.subr.mxu0 %v5139_v3  ;;  %v5190_v59 = vunpack.c.l.bf16 %v5076_v57  ;;  %v5191_v63 = vunpack.c.h.bf16 %v5076_v57 }
0x10cc   :  { %5247 = vmatpush1.msra.mxu0 %v5138_v1  ;;  %v5074_v1 = vld [vmem:[%s10184_s18 + $0x180] sm:$0xff] }
0x10cd   :  { %5248 = vmatprep.subr.mxu0 %v5135_v9  ;;  %v5186_v3 = vunpack.c.l.bf16 %v5074_v1  ;;  %v5187_v5 = vunpack.c.h.bf16 %v5074_v1 }
0x10ce   :  { %5249 = vmatpush1.msra.mxu0 %v5134_v7  ;;  %v5072_v7 = vld [vmem:[%s10184_s18 + $0x170] sm:$0xff] }
0x10cf   :  { %5250 = vmatprep.subr.mxu0 %v5131_v47  ;;  %v5182_v9 = vunpack.c.l.bf16 %v5072_v7  ;;  %v5183_v10 = vunpack.c.h.bf16 %v5072_v7 }
0x10d0   :  { %5251 = vmatpush1.msra.mxu0 %v5130_v14  ;;  %v5070_v14 = vld [vmem:[%s10184_s18 + $0x160] sm:$0xff] }
0x10d1   :  { %5252 = vmatprep.subr.mxu0 %v5127_v52  ;;  %v5178_v47 = vunpack.c.l.bf16 %v5070_v14  ;;  %v5179_v48 = vunpack.c.h.bf16 %v5070_v14 }
0x10d2   :  { %5253 = vmatpush1.msra.mxu0 %v5126_v50  ;;  %v5068_v50 = vld [vmem:[%s10184_s18 + $0x150] sm:$0xff] }
0x10d3   :  { %5254 = vmatprep.subr.mxu0 %v5123_v60  ;;  %v5174_v52 = vunpack.c.l.bf16 %v5068_v50  ;;  %v5175_v54 = vunpack.c.h.bf16 %v5068_v50 }
0x10d4   :  { %5255 = vmatpush1.msra.mxu0 %v5122_v56  ;;  %v5066_v56 = vld [vmem:[%s10184_s18 + $0x140] sm:$0xff] }
0x10d5   :  { %5256 = vmatprep.subr.mxu0 %v5119_v2  ;;  %v5170_v60 = vunpack.c.l.bf16 %v5066_v56  ;;  %v5171_v62 = vunpack.c.h.bf16 %v5066_v56 }
0x10d6   :  { %5257 = vmatpush1.msra.mxu0 %v5118_v0  ;;  %v4760_v0 = vld [vmem:[%s10181_s15] sm:$0x3] }
0x10d7   :  { %5258 = vmatprep.subr.mxu0 %v5115_v8  ;;  %v4765_v2 = vrot.slane %v4760_v0, %v9646_v31  ;;  %v4769_v4 = vrot.slane %v4760_v0, %v9653_v36 }
0x10d8   :  { %5259 = vmatpush1.msra.mxu0 %v5114_v6 }
0x10d9   :  { %5260 = vmatprep.subr.mxu0 %v5111_v13  ;;  %v5055_v13 = vld [vmem:[%s10184_s18 + $0xe8] sm:$0xff] }
0x10da   :  { %5261 = vmatpush1.msra.mxu0 %v5110_v12 }
0x10db   :  { %5262 = vmatprep.subr.mxu0 %v5107_v61  ;;  %v5053_v61 = vld [vmem:[%s10184_s18 + $0xd8] sm:$0xff] }
0x10dc   :  { %5263 = vmatpush1.msra.mxu0 %v5106_v16  ;;  %v5152_v16 = vunpack.c.l.bf16 %v9777_v49  ;;  %v5049_v49 = vld [vmem:[%s10184_s18 + $0xb8] sm:$0xff] }
0x10dd   :  { %5264 = vmatprep.subr.mxu0 %v5103_v19  ;;  %v5148_v19 = vunpack.c.l.bf16 %v5055_v13  ;;  %v5137_v33 = vunpack.c.h.bf16 %v5049_v49 }
0x10de   :  { %5265 = vmatpush1.msra.mxu0 %v5102_v18  ;;  %v5149_v18 = vunpack.c.h.bf16 %v5055_v13 }
0x10df   :  { %5266 = vmatprep.subr.mxu0 %v5099_v22  ;;  %v5144_v22 = vunpack.c.l.bf16 %v5053_v61 }
0x10e0   :  { %5267 = vmatpush1.msra.mxu0 %v5098_v21  ;;  %v5145_v21 = vunpack.c.h.bf16 %v5053_v61 }
0x10e1   :  { %5268 = vmatprep.subr.mxu0 %v5095_v29  ;;  %v5047_v29 = vld [vmem:[%s10184_s18 + $0xa8] sm:$0xff] }
0x10e2   :  { %5269 = vmatpush1.msra.mxu0 %v5094_v28  ;;  %v5140_v28 = vunpack.c.l.bf16 %v5051_v20  ;;  %v5133_v38 = vunpack.c.h.bf16 %v5047_v29  ;;  %v5075_v20 = vld [vmem:[%s10184_s18 + $0x188] sm:$0xff] }
0x10e3   :  { %5270 = vmatprep.subr.mxu0 %v5091_v37  ;;  %v5045_v37 = vld [vmem:[%s10184_s18 + $0x98] sm:$0xff] }
0x10e4   :  { %5271 = vmatpush1.msra.mxu0 %v5090_v35  ;;  %v5136_v35 = vunpack.c.l.bf16 %v5049_v49  ;;  %v5129_v41 = vunpack.c.h.bf16 %v5045_v37  ;;  %v5073_v49 = vld [vmem:[%s10184_s18 + $0x178] sm:$0xff] }
0x10e5   :  { %5272 = vmatprep.subr.mxu0 %v5215_v40  ;;  %v5043_v40 = vld [vmem:[%s10184_s18 + $0x88] sm:$0xff] }
0x10e6   :  { %5273 = vmatpush2.msra.mxu0 %v5214_v39  ;;  %v5132_v39 = vunpack.c.l.bf16 %v5047_v29  ;;  %v5125_v44 = vunpack.c.h.bf16 %v5043_v40  ;;  %v5071_v29 = vld [vmem:[%s10184_s18 + $0x168] sm:$0xff] }
0x10e7   :  { %5274 = vmatprep.subr.mxu0 %v5211_v43  ;;  %v5041_v43 = vld [vmem:[%s10184_s18 + $0x78] sm:$0xff] }
0x10e8   :  { %5275 = vmatpush2.msra.mxu0 %v5210_v42  ;;  %v5128_v42 = vunpack.c.l.bf16 %v5045_v37  ;;  %v5121_v45 = vunpack.c.h.bf16 %v5041_v43  ;;  %v5069_v37 = vld [vmem:[%s10184_s18 + $0x158] sm:$0xff] }
0x10e9   :  { %5276 = vmatprep.subr.mxu0 %v5207_v23  ;;  %v5039_v23 = vld [vmem:[%s10184_s18 + $0x68] sm:$0xff] }
0x10ea   :  { %5277 = vmatpush2.msra.mxu0 %v5206_v27  ;;  %v5124_v27 = vunpack.c.l.bf16 %v5043_v40  ;;  %v5117_v25 = vunpack.c.h.bf16 %v5039_v23  ;;  %v5067_v40 = vld [vmem:[%s10184_s18 + $0x148] sm:$0xff] }
0x10eb   :  { %5278 = vmatprep.subr.mxu0 %v5203_v30  ;;  %v5037_v30 = vld [vmem:[%s10184_s18 + $0x58] sm:$0xff] }
0x10ec   :  { %5279 = vmatpush2.msra.mxu0 %v5202_v46  ;;  %v5120_v46 = vunpack.c.l.bf16 %v5041_v43  ;;  %v5113_v34 = vunpack.c.h.bf16 %v5037_v30  ;;  %v5173_v43 = vunpack.c.h.bf16 %v5067_v40 }
0x10ed   :  { %5280 = vmatprep.subr.mxu0 %v5199_v32  ;;  %v5035_v32 = vld [vmem:[%s10184_s18 + $0x48] sm:$0xff] }
0x10ee   :  { %5281 = vmatpush2.msra.mxu0 %v5198_v51  ;;  %v5116_v51 = vunpack.c.l.bf16 %v5039_v23  ;;  %v5109_v57 = vunpack.c.h.bf16 %v5035_v32  ;;  %v5065_v23 = vld [vmem:[%s10184_s18 + $0x138] sm:$0xff] }
0x10ef   :  { %5282 = vmatprep.subr.mxu0 %v5195_v55  ;;  %v5033_v55 = vld [vmem:[%s10184_s18 + $0x38] sm:$0xff] }
0x10f0   :  { %5283 = vmatpush2.msra.mxu0 %v5194_v53  ;;  %v5112_v53 = vunpack.c.l.bf16 %v5037_v30  ;;  %v5105_v1 = vunpack.c.h.bf16 %v5033_v55 }
0x10f1   :  { %5284 = vmatprep.subr.mxu0 %v5191_v63  ;;  %v5031_v63 = vld [vmem:[%s10184_s18 + $0x28] sm:$0xff] }
0x10f2   :  { %5285 = vmatpush2.msra.mxu0 %v5190_v59  ;;  %v5108_v59 = vunpack.c.l.bf16 %v5035_v32  ;;  %v5101_v7 = vunpack.c.h.bf16 %v5031_v63  ;;  %v5063_v32 = vld [vmem:[%s10184_s18 + $0x128] sm:$0xff] }
0x10f3   :  { %5286 = vmatprep.subr.mxu0 %v5187_v5  ;;  %v5029_v5 = vld [vmem:[%s10184_s18 + $0x18] sm:$0xff] }
0x10f4   :  { %5287 = vmatpush2.msra.mxu0 %v5186_v3  ;;  %v5104_v3 = vunpack.c.l.bf16 %v5033_v55  ;;  %v5097_v14 = vunpack.c.h.bf16 %v5029_v5 }
0x10f5   :  { %5288 = vmatprep.subr.mxu0 %v5183_v10  ;;  %v5027_v10 = vld [vmem:[%s10184_s18 + $0x8] sm:$0xff] }
0x10f6   :  { %5289 = vmatpush2.msra.mxu0 %v5182_v9  ;;  %v5100_v9 = vunpack.c.l.bf16 %v5031_v63  ;;  %v5093_v50 = vunpack.c.h.bf16 %v5027_v10  ;;  %v5061_v63 = vld [vmem:[%s10184_s18 + $0x118] sm:$0xff] }
0x10f7   :  { %5290 = vmatprep.subr.mxu0 %v5179_v48  ;;  %v5089_v48 = vld [vmem:[%s10184_s18 + $0x1f8] sm:$0xff] }
0x10f8   :  { %5291 = vmatpush2.msra.mxu0 %v5178_v47  ;;  %v5096_v47 = vunpack.c.l.bf16 %v5029_v5  ;;  %v5217_v56 = vunpack.c.h.bf16 %v5089_v48 }
0x10f9   :  { %5292 = vmatprep.subr.mxu0 %v5175_v54  ;;  %v5087_v54 = vld [vmem:[%s10184_s18 + $0x1e8] sm:$0xff] }
0x10fa   :  { %5293 = vmatpush2.msra.mxu0 %v5174_v52  ;;  %v5092_v52 = vunpack.c.l.bf16 %v5027_v10  ;;  %v5213_v0 = vunpack.c.h.bf16 %v5087_v54  ;;  %v5059_v10 = vld [vmem:[%s10184_s18 + $0x108] sm:$0xff] }
0x10fb   :  { %5294 = vmatprep.subr.mxu0 %v5171_v62  ;;  %v5085_v62 = vld [vmem:[%s10184_s18 + $0x1d8] sm:$0xff] }
0x10fc   :  { %5295 = vmatpush2.msra.mxu0 %v5170_v60  ;;  %v5216_v60 = vunpack.c.l.bf16 %v5089_v48  ;;  %v5156_v48 = vunpack.c.l.bf16 %v5059_v10 }
0x1185   :  { %v4838_v6 = vpop.f32.mrf.mxu0 }
0x1186   :  { %v4839_v8 = vadd.f32 %v4838_v6, %v4765_v2  ;;  %v5212_v2 = vunpack.c.l.bf16 %v5087_v54  ;;  %v5209_v6 = vunpack.c.h.bf16 %v5085_v62 }
0x1187   :  { %v4840_v11 = vpop.f32.mrf.mxu0 }
0x1188   :  { %v4841_v12 = vadd.f32 %v4840_v11, %v4769_v4  ;;  %v4843_v17 = vmax.f32 %v4839_v8, 0.0  ;;  %v5083_v4 = vld [vmem:[%s10184_s18 + $0x1c8] sm:$0xff]  ;;  %v5208_v8 = vunpack.c.l.bf16 %v5085_v62  ;;  %v5081_v11 = vld [vmem:[%s10184_s18 + $0x1b8] sm:$0xff] }
0x1189   :  { %v5204_v13 = vunpack.c.l.bf16 %v5083_v4  ;;  %v5200_v61 = vunpack.c.l.bf16 %v5081_v11 }
0x118a   :  { %v4844_v15 = vmax.f32 %v4841_v12, 0.0  ;;  %v5205_v12 = vunpack.c.h.bf16 %v5083_v4 }
0x118c   :  { %5017 = vmatprep.mubr.f32.mxu1 %v4844_v15  ;;  %v5079_v15 = vld [vmem:[%s10184_s18 + $0x1a8] sm:$0xff] }
0x118d   :  { %5018 = vmatmul.mubr.f32.vlgmr.msra.gmra.mxu1 %v4843_v17  ;;  %v5077_v17 = vld [vmem:[%s10184_s18 + $0x198] sm:$0xff] }
0x118e   :  { %5312 = vmatpush1.msra.mxu1 %v5152_v16  ;;  %v5201_v16 = vunpack.c.h.bf16 %v5081_v11 }
0x118f   :  { %5313 = vmatprep.subr.mxu1 %v5149_v18  ;;  %v5197_v18 = vunpack.c.h.bf16 %v5079_v15 }
0x1190   :  { %5314 = vmatpush1.msra.mxu1 %v5148_v19  ;;  %v5196_v19 = vunpack.c.l.bf16 %v5079_v15 }
0x1191   :  { %5315 = vmatprep.subr.mxu1 %v5145_v21  ;;  %v5193_v21 = vunpack.c.h.bf16 %v5077_v17 }
0x1192   :  { %5316 = vmatpush1.msra.mxu1 %v5144_v22  ;;  %v5192_v22 = vunpack.c.l.bf16 %v5077_v17 }
0x1193   :  { %5317 = vmatprep.subr.mxu1 %v5141_v24  ;;  %v5189_v24 = vunpack.c.h.bf16 %v5075_v20 }
0x1194   :  { %5318 = vmatpush1.msra.mxu1 %v5140_v28  ;;  %v5188_v28 = vunpack.c.l.bf16 %v5075_v20  ;;  %v6702_v20 = vld [vmem:[%s10186_s20 + $0x68] sm:$0xff]  }
0x1195   :  { %5319 = vmatprep.subr.mxu1 %v5137_v33  ;;  %v5185_v33 = vunpack.c.h.bf16 %v5073_v49 }
0x1196   :  { %5320 = vmatpush1.msra.mxu1 %v5136_v35  ;;  %v5184_v35 = vunpack.c.l.bf16 %v5073_v49 }
0x1197   :  { %5321 = vmatprep.subr.mxu1 %v5133_v38  ;;  %v5181_v38 = vunpack.c.h.bf16 %v5071_v29 }
0x1198   :  { %5322 = vmatpush1.msra.mxu1 %v5132_v39  ;;  %v5180_v39 = vunpack.c.l.bf16 %v5071_v29  ;;  %v6701_v29 = vld [vmem:[%s10186_s20 + $0x60] sm:$0xff]  }
0x1199   :  { %5323 = vmatprep.subr.mxu1 %v5129_v41  ;;  %v5177_v41 = vunpack.c.h.bf16 %v5069_v37 }
0x119a   :  { %5324 = vmatpush1.msra.mxu1 %v5128_v42  ;;  %v5176_v42 = vunpack.c.l.bf16 %v5069_v37 }
0x119b   :  { %5325 = vmatprep.subr.mxu1 %v5125_v44  ;;  %v5172_v44 = vunpack.c.l.bf16 %v5067_v40  ;;  %v6700_v40 = vld [vmem:[%s10186_s20 + $0x58] sm:$0xff]  }
0x119c   :  { %5326 = vmatpush1.msra.mxu1 %v5124_v27  ;;  %v5064_v27 = vld [vmem:[%s10184_s18 + $0x130] sm:$0xff] }
0x119d   :  { %5327 = vmatprep.subr.mxu1 %v5121_v45  ;;  %v5167_v45 = vunpack.c.h.bf16 %v5064_v27  ;;  %v5166_v30 = vunpack.c.l.bf16 %v5064_v27 }
0x119e   :  { %5328 = vmatpush1.msra.mxu1 %v5120_v46  ;;  %v5169_v46 = vunpack.c.h.bf16 %v5065_v23 }
0x119f   :  { %5329 = vmatprep.subr.mxu1 %v5117_v25  ;;  %v5168_v25 = vunpack.c.l.bf16 %v5065_v23  ;;  %5296 = vmatprep.subr.mxu0 %v5167_v45  ;;  %v6699_v23 = vld [vmem:[%s10186_s20 + $0x50] sm:$0xff]   ;;  %v6491_v45 = vunpack.c.l.bf16 %v6700_v40 }
0x11a0   :  { %5330 = vmatpush1.msra.mxu1 %v5116_v51  ;;  %v5062_v51 = vld [vmem:[%s10184_s18 + $0x120] sm:$0xff]  ;;  %5297 = vmatpush2.msra.mxu0 %v5166_v30 }
0x11a1   :  { %5331 = vmatprep.subr.mxu1 %v5113_v34  ;;  %v5163_v34 = vunpack.c.h.bf16 %v5062_v51  ;;  %v5162_v55 = vunpack.c.l.bf16 %v5062_v51 }
0x11a2   :  { %5332 = vmatpush1.msra.mxu1 %v5112_v53  ;;  %v5165_v53 = vunpack.c.h.bf16 %v5063_v32 }
0x11a3   :  { %5333 = vmatprep.subr.mxu1 %v5109_v57  ;;  %v5164_v57 = vunpack.c.l.bf16 %v5063_v32  ;;  %5298 = vmatprep.subr.mxu0 %v5163_v34  ;;  %v6698_v32 = vld [vmem:[%s10186_s20 + $0x48] sm:$0xff]   ;;  %v6487_v34 = vunpack.c.l.bf16 %v6699_v23 }
0x11a4   :  { %5334 = vmatpush1.msra.mxu1 %v5108_v59  ;;  %v5060_v59 = vld [vmem:[%s10184_s18 + $0x110] sm:$0xff]  ;;  %5299 = vmatpush2.msra.mxu0 %v5162_v55  ;;  %v6484_v55 = vunpack.c.h.bf16 %v6698_v32 }
0x11a5   :  { %5335 = vmatprep.subr.mxu1 %v5105_v1  ;;  %v5159_v1 = vunpack.c.h.bf16 %v5060_v59  ;;  %v5158_v5 = vunpack.c.l.bf16 %v5060_v59 }
0x11a6   :  { %5336 = vmatpush1.msra.mxu1 %v5104_v3  ;;  %v5161_v3 = vunpack.c.h.bf16 %v5061_v63 }
0x11a7   :  { %5337 = vmatprep.subr.mxu1 %v5101_v7  ;;  %v5160_v7 = vunpack.c.l.bf16 %v5061_v63  ;;  %5300 = vmatprep.subr.mxu0 %v5159_v1  ;;  %v6483_v63 = vunpack.c.l.bf16 %v6698_v32 }
0x11a8   :  { %5338 = vmatpush1.msra.mxu1 %v5100_v9  ;;  %v5058_v9 = vld [vmem:[%s10184_s18 + $0x100] sm:$0xff]  ;;  %5301 = vmatpush2.msra.mxu0 %v5158_v5 }
0x11a9   :  { %5339 = vmatprep.subr.mxu1 %v5097_v14  ;;  %v5154_v14 = vunpack.c.l.bf16 %v5058_v9 }
0x11aa   :  { %5340 = vmatpush1.msra.mxu1 %v5096_v47  ;;  %v5155_v47 = vunpack.c.h.bf16 %v5058_v9 }
0x11ab   :  { %5341 = vmatprep.subr.mxu1 %v5093_v50  ;;  %v5157_v50 = vunpack.c.h.bf16 %v5059_v10 }
0x11ac   :  { %5342 = vmatpush1.msra.mxu1 %v5092_v52  ;;  %5302 = vmatprep.subr.mxu0 %v5155_v47  ;;  %v6704_v52 = vld [vmem:[%s10186_s20 + $0x78] sm:$0xff]  }
0x11ad   :  { %5343 = vmatprep.subr.mxu1 %v5217_v56  ;;  %5303 = vmatpush2.msra.mxu0 %v5154_v14  ;;  %v6508_v54 = vunpack.c.h.bf16 %v6704_v52  ;;  %v4941_v56 = vld [vmem:[%s10183_s17] sm:$0x3]  ;;  %v6720_v47 = vld [vmem:[%s10186_s20 + $0xf8] sm:$0xff]  }
0x11ae   :  { %5344 = vmatpush2.msra.mxu1 %v5216_v60  ;;  %v4946_v60 = vrot.slane %v4941_v56, %v9646_v31  ;;  %v4950_v62 = vrot.slane %v4941_v56, %v9653_v36 }
0x11af   :  { %5345 = vmatprep.subr.mxu1 %v5213_v0  ;;  %7137 = vmatprep.subr.mxu0 %v6508_v54 }
0x11b0   :  { %5346 = vmatpush2.msra.mxu1 %v5212_v2 }
0x11b1   :  { %5347 = vmatprep.subr.mxu1 %v5209_v6  ;;  %v6696_v6 = vld [vmem:[%s10186_s20 + $0x38] sm:$0xff]  }
0x11b2   :  { %5348 = vmatpush2.msra.mxu1 %v5208_v8  ;;  %v6475_v17 = vunpack.c.l.bf16 %v6696_v6 }
0x11b3   :  { %5349 = vmatprep.subr.mxu1 %v5205_v12  ;;  %v6476_v12 = vunpack.c.h.bf16 %v6696_v6 }
0x11b4   :  { %5350 = vmatpush2.msra.mxu1 %v5204_v13  ;;  %v6703_v13 = vld [vmem:[%s10186_s20 + $0x70] sm:$0xff]  }
0x11b5   :  { %5351 = vmatprep.subr.mxu1 %v5201_v16  ;;  %v6507_v16 = vunpack.c.l.bf16 %v6704_v52  ;;  %v5234_v52 = vsub.s32 3, %v9643_v26 }
0x11b6   :  { %5352 = vmatpush2.msra.mxu1 %v5200_v61  ;;  %v6695_v61 = vld [vmem:[%s10186_s20 + $0x30] sm:$0xff]  }
0x11b7   :  { %5353 = vmatprep.subr.mxu1 %v5197_v18  ;;  %v6504_v18 = vunpack.c.h.bf16 %v6703_v13  ;;  %v6471_v49 = vunpack.c.l.bf16 %v6695_v61 }
0x11b8   :  { %5354 = vmatpush2.msra.mxu1 %v5196_v19  ;;  %v6472_v19 = vunpack.c.h.bf16 %v6695_v61  ;;  %v6711_v61 = vld [vmem:[%s10186_s20 + $0xb0] sm:$0xff]  }
0x11b9   :  { %5355 = vmatprep.subr.mxu1 %v5193_v21  ;;  %v6503_v21 = vunpack.c.l.bf16 %v6703_v13 }
0x11ba   :  { %5356 = vmatpush2.msra.mxu1 %v5192_v22  ;;  %v6694_v22 = vld [vmem:[%s10186_s20 + $0x28] sm:$0xff]  }
0x11bb   :  { %5357 = vmatprep.subr.mxu1 %v5189_v24  ;;  %v6500_v24 = vunpack.c.h.bf16 %v6702_v20  ;;  %v6467_v37 = vunpack.c.l.bf16 %v6694_v22 }
0x11bc   :  { %5358 = vmatpush2.msra.mxu1 %v5188_v28  ;;  %v6468_v28 = vunpack.c.h.bf16 %v6694_v22 }
0x11bd   :  { %5359 = vmatprep.subr.mxu1 %v5185_v33  ;;  %v6499_v33 = vunpack.c.l.bf16 %v6702_v20  ;;  %v6536_v20 = vunpack.c.h.bf16 %v6711_v61 }
0x11be   :  { %5360 = vmatpush2.msra.mxu1 %v5184_v35  ;;  %v6693_v35 = vld [vmem:[%s10186_s20 + $0x20] sm:$0xff]  }
0x11bf   :  { %5361 = vmatprep.subr.mxu1 %v5181_v38  ;;  %v6496_v38 = vunpack.c.h.bf16 %v6701_v29 }
0x11c0   :  { %5362 = vmatpush2.msra.mxu1 %v5180_v39  ;;  %v6464_v39 = vunpack.c.h.bf16 %v6693_v35 }
0x11c1   :  { %5363 = vmatprep.subr.mxu1 %v5177_v41  ;;  %v6495_v41 = vunpack.c.l.bf16 %v6701_v29 }
0x11c2   :  { %5364 = vmatpush2.msra.mxu1 %v5176_v42  ;;  %v6692_v42 = vld [vmem:[%s10186_s20 + $0x18] sm:$0xff]  }
0x11c3   :  { %5365 = vmatprep.subr.mxu1 %v5173_v43  ;;  %v6463_v43 = vunpack.c.l.bf16 %v6693_v35  ;;  %v6460_v27 = vunpack.c.h.bf16 %v6692_v42  ;;  %v6459_v30 = vunpack.c.l.bf16 %v6692_v42 }
0x11c4   :  { %5366 = vmatpush2.msra.mxu1 %v5172_v44  ;;  %v6492_v44 = vunpack.c.h.bf16 %v6700_v40 }
0x11c5   :  { %5367 = vmatprep.subr.mxu1 %v5169_v46  ;;  %v6691_v46 = vld [vmem:[%s10186_s20 + $0x10] sm:$0xff]  }
0x11c6   :  { %5368 = vmatpush2.msra.mxu1 %v5168_v25  ;;  %v6488_v25 = vunpack.c.h.bf16 %v6699_v23  ;;  %v6456_v51 = vunpack.c.h.bf16 %v6691_v46 }
0x11c7   :  { %5369 = vmatprep.subr.mxu1 %v5165_v53  ;;  %v6455_v53 = vunpack.c.l.bf16 %v6691_v46 }
0x11c8   :  { %5370 = vmatpush2.msra.mxu1 %v5164_v57  ;;  %v6690_v57 = vld [vmem:[%s10186_s20 + $0x8] sm:$0xff]  }
0x11c9   :  { %5371 = vmatprep.subr.mxu1 %v5161_v3  ;;  %v6452_v59 = vunpack.c.h.bf16 %v6690_v57  ;;  %v6451_v1 = vunpack.c.l.bf16 %v6690_v57  ;;  %v6697_v3 = vld [vmem:[%s10186_s20 + $0x40] sm:$0xff]   ;;  %v6706_v57 = vld [vmem:[%s10186_s20 + $0x88] sm:$0xff]  }
0x11ca   :  { %5372 = vmatpush2.msra.mxu1 %v5160_v7  ;;  %v6480_v5 = vunpack.c.h.bf16 %v6697_v3  ;;  %v6446_v7 = vld [vmem:[%s10186_s20] sm:$0xff]   ;;  %v6479_v10 = vunpack.c.l.bf16 %v6697_v3 }
0x11cb   :  { %5373 = vmatprep.subr.mxu1 %v5157_v50  ;;  %v6448_v9 = vunpack.c.h.bf16 %v6446_v7  ;;  %v6447_v14 = vunpack.c.l.bf16 %v6446_v7  ;;  %v10034_v50 = vld [vmem:[%s10185_s19] sm:$0xf] }
0x11cc   :  { %5374 = vmatpush2.msra.mxu1 %v5156_v48  ;;  %v6572_v48 = vunpack.c.h.bf16 %v6720_v47  ;;  %v5223_v54 = vrot.slane %v10034_v50, %v9646_v31  ;;  %v5227_v56 = vrot.slane %v10034_v50, %v9653_v36  ;;  %v6719_v31 = vld [vmem:[%s10186_s20 + $0xf0] sm:$0xff]   ;;  %v6713_v3 = vld [vmem:[%s10186_s20 + $0xc0] sm:$0xff]  }
0x11cd   :  { %8023 = vmatprep.subr.mxu1 %v8102_v58  ;;  %v6567_v22 = vunpack.c.l.bf16 %v6719_v31  ;;  %v6705_v7 = vld [vmem:[%s10186_s20 + $0x80] sm:$0xff]  }
0x124d   :  { %v5019_v0 = vpop.f32.mrf.mxu1 }
0x124e   :  { %v5020_v2 = vadd.f32 %v5019_v0, %v4946_v60  ;;  %v5235_v60 = vrot.slane %v10034_v50, %v5234_v52  ;;  %v6511_v52 = vunpack.c.l.bf16 %v6705_v7 }
0x124f   :  { %v5021_v4 = vpop.f32.mrf.mxu1 }
0x1250   :  { %v5022_v8 = vadd.f32 %v5021_v4, %v4950_v62  ;;  %v5024_v15 = vmax.f32 %v5020_v2, 0.0 }
0x1252   :  { %v5025_v11 = vmax.f32 %v5022_v8, 0.0  ;;  %v6712_v8 = vld [vmem:[%s10186_s20 + $0xb8] sm:$0xff]  }
0x1254   :  { %5304 = vmatprep.mubr.f32.mxu0 %v5025_v11  ;;  %5375 = vmatprep.mubr.f32.mxu1 %v5025_v11 }
0x1255   :  { %5305 = vmatmul.mubr.f32.vlgmr.msra.gmra.mxu0 %v5024_v15  ;;  %5376 = vmatmul.mubr.f32.vlgmr.msra.gmra.mxu1 %v5024_v15  ;;  %v6540_v15 = vunpack.c.h.bf16 %v6712_v8 }
0x1256   :  { %7138 = vmatpush3.msra.mxu0 %v6476_v12  ;;  %8055 = vmatprep.mubr.msk.f32.mxu1 %vm8103_vm3, %v8102_v58 }
0x1257   :  { %7139 = vmatprep.subr.mxu0 %v6507_v16  ;;  %v6571_v16 = vunpack.c.l.bf16 %v6720_v47 }
0x1258   :  { %7140 = vmatpush3.msra.mxu0 %v6475_v17 }
0x1259   :  { %7141 = vmatprep.subr.mxu0 %v6504_v18  ;;  %v6539_v18 = vunpack.c.l.bf16 %v6712_v8  ;;  %v6724_v8 = vld [vmem:[%s10188_s22 + $0x20] sm:$0xff]  }
0x125a   :  { %7142 = vmatpush3.msra.mxu0 %v6472_v19  ;;  %v6568_v19 = vunpack.c.h.bf16 %v6719_v31 }
0x125b   :  { %7143 = vmatprep.subr.mxu0 %v6503_v21  ;;  %v6718_v21 = vld [vmem:[%s10186_s20 + $0xe8] sm:$0xff]  }
0x125c   :  { %7144 = vmatpush3.msra.mxu0 %v6471_v49  ;;  %v6710_v49 = vld [vmem:[%s10186_s20 + $0xa8] sm:$0xff]   ;;  %v6563_v35 = vunpack.c.l.bf16 %v6718_v21 }
0x125d   :  { %7145 = vmatprep.subr.mxu0 %v6500_v24  ;;  %v6535_v24 = vunpack.c.l.bf16 %v6711_v61  ;;  %v6532_v29 = vunpack.c.h.bf16 %v6710_v49 }
0x125e   :  { %7146 = vmatpush3.msra.mxu0 %v6468_v28  ;;  %v6564_v28 = vunpack.c.h.bf16 %v6718_v21  ;;  %v6574_v21 = vld [vmem:[%s10188_s22] sm:$0xff]  }
0x125f   :  { %7147 = vmatprep.subr.mxu0 %v6499_v33  ;;  %v6717_v33 = vld [vmem:[%s10186_s20 + $0xe0] sm:$0xff]  }
0x1260   :  { %7148 = vmatpush3.msra.mxu0 %v6467_v37  ;;  %v6709_v37 = vld [vmem:[%s10186_s20 + $0xa0] sm:$0xff]   ;;  %v6559_v42 = vunpack.c.l.bf16 %v6717_v33 }
0x1261   :  { %7149 = vmatprep.subr.mxu0 %v6496_v38  ;;  %v6531_v38 = vunpack.c.l.bf16 %v6710_v49  ;;  %v6528_v40 = vunpack.c.h.bf16 %v6709_v37  ;;  %v6575_v49 = vunpack.c.l.bf16 %v6574_v21 }
0x1262   :  { %7150 = vmatpush3.msra.mxu0 %v6464_v39  ;;  %v6560_v39 = vunpack.c.h.bf16 %v6717_v33 }
0x1263   :  { %7151 = vmatprep.subr.mxu0 %v6495_v41  ;;  %v6716_v41 = vld [vmem:[%s10186_s20 + $0xd8] sm:$0xff]  }
0x1264   :  { %7152 = vmatpush3.msra.mxu0 %v6463_v43  ;;  %v6708_v43 = vld [vmem:[%s10186_s20 + $0x98] sm:$0xff]   ;;  %v6555_v46 = vunpack.c.l.bf16 %v6716_v41 }
0x1265   :  { %7153 = vmatprep.subr.mxu0 %v6492_v44  ;;  %v6527_v44 = vunpack.c.l.bf16 %v6709_v37  ;;  %v6524_v23 = vunpack.c.h.bf16 %v6708_v43  ;;  %v6728_v37 = vld [vmem:[%s10190_s24 + $0x8] sm:$0xff]  }
0x1266   :  { %7154 = vmatpush3.msra.mxu0 %v6460_v27  ;;  %v6556_v27 = vunpack.c.h.bf16 %v6716_v41 }
0x1267   :  { %7155 = vmatprep.subr.mxu0 %v6491_v45  ;;  %v6715_v45 = vld [vmem:[%s10186_s20 + $0xd0] sm:$0xff]  }
0x1268   :  { %7156 = vmatpush3.msra.mxu0 %v6459_v30  ;;  %v6707_v30 = vld [vmem:[%s10186_s20 + $0x90] sm:$0xff]  }
0x1269   :  { %7157 = vmatprep.subr.mxu0 %v6488_v25  ;;  %v6523_v25 = vunpack.c.l.bf16 %v6708_v43  ;;  %v6520_v32 = vunpack.c.h.bf16 %v6707_v30  ;;  %v6149_v43 = vld [vmem:[%s10187_s21] ss:$0 sm:$0xff] }
0x126a   :  { %7158 = vmatpush3.msra.mxu0 %v6456_v51  ;;  %v6552_v51 = vunpack.c.h.bf16 %v6715_v45 }
0x126b   :  { %7159 = vmatprep.subr.mxu0 %v6487_v34  ;;  %v6714_v34 = vld [vmem:[%s10186_s20 + $0xc8] sm:$0xff]  }
0x126c   :  { %7160 = vmatpush3.msra.mxu0 %v6455_v53  ;;  %v5230_v53 = vsub.s32 2, %v9643_v26  ;;  %v6547_v26 = vunpack.c.l.bf16 %v6714_v34 }
0x126d   :  { %7161 = vmatprep.subr.mxu0 %v6484_v55  ;;  %v6551_v55 = vunpack.c.l.bf16 %v6715_v45 }
0x126e   :  { %7162 = vmatpush3.msra.mxu0 %v6452_v59  ;;  %v6519_v59 = vunpack.c.l.bf16 %v6707_v30 }
0x126f   :  { %7163 = vmatprep.subr.mxu0 %v6483_v63  ;;  %v6548_v63 = vunpack.c.h.bf16 %v6714_v34 }
0x1270   :  { %7164 = vmatpush3.msra.mxu0 %v6451_v1  ;;  %v6516_v1 = vunpack.c.h.bf16 %v6706_v57 }
0x1271   :  { %7165 = vmatprep.subr.mxu0 %v6480_v5  ;;  %v5231_v5 = vrot.slane %v10034_v50, %v5230_v53  ;;  %v6150_v53 = vld [vmem:[%s10189_s23] ss:$0 sm:$0xff] }
0x1272   :  { %7166 = vmatpush3.msra.mxu0 %v6448_v9  ;;  %v6515_v9 = vunpack.c.l.bf16 %v6706_v57 }
0x1273   :  { %7167 = vmatprep.subr.mxu0 %v6479_v10  ;;  %v6544_v10 = vunpack.c.h.bf16 %v6713_v3 }
0x1274   :  { %7168 = vmatpush3.msra.mxu0 %v6447_v14  ;;  %v6512_v14 = vunpack.c.h.bf16 %v6705_v7 }
0x1275   :  { %7172 = vmatprep.subr.mxu0 %v6572_v48  ;;  %v6543_v48 = vunpack.c.l.bf16 %v6713_v3 }
0x1315   :  { %v5306_v62 = vpop.f32.mrf.mxu0  ;;  %v10042_v0 = vpop.f32.mrf.mxu1 }
0x1316   :  { %v5307_v2 = vadd.f32 %v5306_v62, %v5223_v54  ;;  %v5378_v47 = vadd.f32 %v10042_v0, %v5231_v5  ;;  %v6727_v54 = vld [vmem:[%s10188_s22 + $0x38] sm:$0xff]  }
0x1317   :  { %v5308_v4 = vpop.f32.mrf.mxu0  ;;  %v5379_v6 = vpop.f32.mrf.mxu1  ;;  %v6603_v62 = vunpack.c.l.bf16 %v6727_v54 }
0x1318   :  { %v5309_v11 = vadd.f32 %v5308_v4, %v5227_v56  ;;  %v5380_v12 = vadd.f32 %v5379_v6, %v5235_v60  ;;  %v5382_v36 = vmax.f32 %v5307_v2, 0.0  ;;  %v5384_v50 = vmax.f32 %v5378_v47, 0.0  ;;  %v6726_v56 = vld [vmem:[%s10188_s22 + $0x30] sm:$0xff]   ;;  %v6725_v2 = vld [vmem:[%s10188_s22 + $0x28] sm:$0xff]  }
0x1319   :  { %v6604_v60 = vunpack.c.h.bf16 %v6727_v54  ;;  %v6600_v0 = vunpack.c.h.bf16 %v6726_v56  ;;  %v6599_v4 = vunpack.c.l.bf16 %v6726_v56  ;;  %v6596_v6 = vunpack.c.h.bf16 %v6725_v2 }
0x131a   :  { %v5383_v13 = vmax.f32 %v5309_v11, 0.0  ;;  %v5385_v17 = vmax.f32 %v5380_v12, 0.0  ;;  %v6595_v11 = vunpack.c.l.bf16 %v6725_v2  ;;  %v6592_v12 = vunpack.c.h.bf16 %v6724_v8 }
0x131b   :  { %8024 = vmatpush3.msra.mxu1 %v6604_v60 }
0x131c   :  { %5585 = vmatprep.mubr.f32.mxu0 %v5383_v13  ;;  %8025 = vmatprep.subr.mxu1 %v8102_v58  ;;  %v6723_v13 = vld [vmem:[%s10188_s22 + $0x18] sm:$0xff]  }
0x131d   :  { %5586 = vmatmul.mubr.f32.vlgmr.msra.gmra.mxu0 %v5382_v36  ;;  %8026 = vmatpush3.msra.mxu1 %v6603_v62  ;;  %v6588_v31 = vunpack.c.h.bf16 %v6723_v13  ;;  %v6722_v36 = vld [vmem:[%s10188_s22 + $0x10] sm:$0xff]  }
0x131e   :  { %7173 = vmatpush3.msra.mxu0 %v6540_v15  ;;  %5655 = vmatprep.mubr.f32.mxu0 %v5385_v17  ;;  %v6591_v15 = vunpack.c.l.bf16 %v6724_v8  ;;  %v6584_v61 = vunpack.c.h.bf16 %v6722_v36  ;;  %v6583_v17 = vunpack.c.l.bf16 %v6722_v36 }
0x131f   :  { %7174 = vmatprep.subr.mxu0 %v6571_v16  ;;  %8027 = vmatprep.subr.mxu1 %v8102_v58  ;;  %v6587_v16 = vunpack.c.l.bf16 %v6723_v13 }
0x1320   :  { %7175 = vmatpush3.msra.mxu0 %v6539_v18  ;;  %8028 = vmatpush3.msra.mxu1 %v6600_v0  ;;  %v6721_v18 = vld [vmem:[%s10188_s22 + $0x8] sm:$0xff]  }
0x1321   :  { %7176 = vmatprep.subr.mxu0 %v6568_v19  ;;  %8029 = vmatprep.subr.mxu1 %v8102_v58  ;;  %v6580_v19 = vunpack.c.h.bf16 %v6721_v18 }
0x1322   :  { %7177 = vmatpush3.msra.mxu0 %v6536_v20  ;;  %8030 = vmatpush3.msra.mxu1 %v6599_v4  ;;  %v6579_v20 = vunpack.c.l.bf16 %v6721_v18 }
0x1323   :  { %7178 = vmatprep.subr.mxu0 %v6567_v22  ;;  %8031 = vmatprep.subr.mxu1 %v8102_v58  ;;  %v6576_v22 = vunpack.c.h.bf16 %v6574_v21 }
0x1324   :  { %7179 = vmatpush3.msra.mxu0 %v6535_v24  ;;  %8032 = vmatpush3.msra.mxu1 %v6596_v6  ;;  %v6730_v24 = vld [vmem:[%s10190_s24 + $0x18] sm:$0xff]  }
0x1325   :  { %7180 = vmatprep.subr.mxu0 %v6564_v28  ;;  %8033 = vmatprep.subr.mxu1 %v8102_v58  ;;  %v6729_v28 = vld [vmem:[%s10190_s24 + $0x10] sm:$0xff]   ;;  %v6619_v33 = vunpack.c.l.bf16 %v6730_v24 }
0x1326   :  { %7181 = vmatpush3.msra.mxu0 %v6532_v29  ;;  %8034 = vmatpush3.msra.mxu1 %v6595_v11  ;;  %v6620_v29 = vunpack.c.h.bf16 %v6730_v24 }
0x1327   :  { %7182 = vmatprep.subr.mxu0 %v6563_v35  ;;  %8035 = vmatprep.subr.mxu1 %v8102_v58  ;;  %v6616_v35 = vunpack.c.h.bf16 %v6729_v28 }
0x1328   :  { %7183 = vmatpush3.msra.mxu0 %v6531_v38  ;;  %8036 = vmatpush3.msra.mxu1 %v6592_v12  ;;  %v6615_v38 = vunpack.c.l.bf16 %v6729_v28 }
0x1329   :  { %7184 = vmatprep.subr.mxu0 %v6560_v39  ;;  %8037 = vmatprep.subr.mxu1 %v8102_v58  ;;  %v6612_v39 = vunpack.c.h.bf16 %v6728_v37 }
0x132a   :  { %7185 = vmatpush3.msra.mxu0 %v6528_v40  ;;  %8038 = vmatpush3.msra.mxu1 %v6591_v15 }
0x132b   :  { %7186 = vmatprep.subr.mxu0 %v6559_v42  ;;  %8039 = vmatprep.subr.mxu1 %v8102_v58 }
0x132c   :  { %7187 = vmatpush3.msra.mxu0 %v6527_v44  ;;  %8040 = vmatpush3.msra.mxu1 %v6588_v31 }
0x132d   :  { %7188 = vmatprep.subr.mxu0 %v6556_v27  ;;  %8041 = vmatprep.subr.mxu1 %v8102_v58 }
0x132e   :  { %7189 = vmatpush3.msra.mxu0 %v6524_v23  ;;  %8042 = vmatpush3.msra.mxu1 %v6587_v16 }
0x132f   :  { %7190 = vmatprep.subr.mxu0 %v6555_v46  ;;  %8043 = vmatprep.subr.mxu1 %v8102_v58 }
0x1330   :  { %7191 = vmatpush3.msra.mxu0 %v6523_v25  ;;  %8044 = vmatpush3.msra.mxu1 %v6584_v61  ;;  %v6611_v25 = vunpack.c.l.bf16 %v6728_v37 }
0x1331   :  { %7192 = vmatprep.subr.mxu0 %v6552_v51  ;;  %8045 = vmatprep.subr.mxu1 %v8102_v58  ;;  %v6606_v51 = vld [vmem:[%s10190_s24] sm:$0xff]  }
0x1332   :  { %7193 = vmatpush3.msra.mxu0 %v6520_v32  ;;  %8046 = vmatpush3.msra.mxu1 %v6583_v17  ;;  %v6608_v32 = vunpack.c.h.bf16 %v6606_v51  ;;  %v6607_v34 = vunpack.c.l.bf16 %v6606_v51 }
0x1333   :  { %7194 = vmatprep.subr.mxu0 %v6551_v55  ;;  %8047 = vmatprep.subr.mxu1 %v8102_v58 }
0x1334   :  { %7195 = vmatpush3.msra.mxu0 %v6519_v59  ;;  %8048 = vmatpush3.msra.mxu1 %v6580_v19 }
0x1335   :  { %7196 = vmatprep.subr.mxu0 %v6548_v63  ;;  %8049 = vmatprep.subr.mxu1 %v8102_v58 }
0x1336   :  { %7197 = vmatpush3.msra.mxu0 %v6516_v1  ;;  %8050 = vmatpush3.msra.mxu1 %v6579_v20  ;;  %v6151_v1 = vld [vmem:[%s10191_s25] ss:$0 sm:$0xff] }
0x1337   :  { %7198 = vmatprep.subr.mxu0 %v6547_v26  ;;  %8051 = vmatprep.subr.mxu1 %v8102_v58 }
0x1338   :  { %7199 = vmatpush3.msra.mxu0 %v6515_v9  ;;  %8052 = vmatpush3.msra.mxu1 %v6576_v22 }
0x1339   :  { %7200 = vmatprep.subr.mxu0 %v6544_v10  ;;  %8053 = vmatprep.subr.mxu1 %v8102_v58 }
0x133a   :  { %7201 = vmatpush3.msra.mxu0 %v6512_v14  ;;  %8054 = vmatpush3.msra.mxu1 %v6575_v49 }
0x133b   :  { %7202 = vmatprep.subr.mxu0 %v6543_v48 }
0x133c   :  { %7203 = vmatpush3.msra.mxu0 %v6511_v52 }
0x133d   :  { %5656 = vmatmul.mubr.f32.vlgmr.msra.gmra.mxu0 %v5384_v50  ;;  %8058 = vmatprep.subr.mxu0 %v8102_v58 }
0x133e   :  { %8074 = vmatprep.mubr.msk.f32.mxu0 %vm8103_vm3, %v8102_v58  ;;  %8059 = vmatpush3.msra.mxu0 %v6620_v29 }
0x133f   :  { %8060 = vmatprep.subr.mxu0 %v8102_v58 }
0x1340   :  { %8061 = vmatpush3.msra.mxu0 %v6619_v33 }
0x1341   :  { %8062 = vmatprep.subr.mxu0 %v8102_v58 }
0x1342   :  { %8063 = vmatpush3.msra.mxu0 %v6616_v35 }
0x1343   :  { %8064 = vmatprep.subr.mxu0 %v8102_v58 }
0x1344   :  { %8065 = vmatpush3.msra.mxu0 %v6615_v38 }
0x1345   :  { %8066 = vmatprep.subr.mxu0 %v8102_v58 }
0x1346   :  { %8067 = vmatpush3.msra.mxu0 %v6612_v39 }
0x1347   :  { %8068 = vmatprep.subr.mxu0 %v8102_v58 }
0x1348   :  { %8069 = vmatpush3.msra.mxu0 %v6611_v25 }
0x1349   :  { %8070 = vmatprep.subr.mxu0 %v8102_v58 }
0x134a   :  { %8071 = vmatpush3.msra.mxu0 %v6608_v32 }
0x134b   :  { %8072 = vmatprep.subr.mxu0 %v8102_v58 }
0x134c   :  { %8073 = vmatpush3.msra.mxu0 %v6607_v34 }
0x13dd   :  { %v7169_v40 = vpop.f32.mrf.mxu0 }
0x13df   :  { %v7170_v41 = vpop.f32.mrf.mxu0 }
0x13e0   :  { %v7171_v42 = vadd.f32 %v7170_v41, %v7169_v40 }
0x13e2   :  { %v5588_v23 = vadd.f32 %v7171_v42, %v6149_v43 }
0x13fd   :  { %v7204_v44 = vpop.f32.mrf.mxu0 }
0x13ff   :  { %v7205_v27 = vpop.f32.mrf.mxu0 }
0x1400   :  { %v7206_v45 = vadd.f32 %v7205_v27, %v7204_v44 }
0x1402   :  { %v5658_v46 = vadd.f32 %v7206_v45, %v5588_v23 }
0x1404   :  { %v5661_v30 = vmax.f32 %v5658_v46, 0.0 }
0x1406   :  { %8056 = vmatmul.mubr.f32.vlgmr.msra.gmra.mxu1 %v5661_v30 }
0x14c6   :  { %v5767_v55 = vpop.f32.mrf.mxu1 }
0x14c7   :  { %v5768_v57 = vadd.f32 %v6150_v53, %v5767_v55 }
0x14c8   :  { %v8057_v59 = vpop.f32.mrf.mxu1 }
0x14c9   :  { %v5771_v63 = vmax.f32 %v5768_v57, 0.0 }
0x14cb   :  { %8075 = vmatmul.mubr.msk.f32.vlgmr.msra.gmra.mxu0 %vm2355_vm4, %v5771_v63 }
0x158b   :  { %v5864_v3 = vpop.f32.mrf.mxu0 }
0x158c   :  { %v5865_v58 = vadd.f32 %v6151_v1, %v5864_v3 }
0x158d   :  { %v8076_v5 = vpop.f32.mrf.mxu0 }
0x158e   :  { %5869 = vst.msk [vmem:[#allocation2] sm:$0x3] %vm5868_vm6, %v5865_v58 }
0x158f   :  { %8091 = shalt.err (!%p8088_p4)
}
0x1590   :  { %5879 = dma.vmem_to_hbm [thread:$0]  %s5877_s8, 32, %s10192_s26, [#allocation3]  }
0x1591   :  { %8100 = dma.done.wait [#allocation3], 32  }
0x1592   :  { %8101 = vsyncadd [#allocation3], 4294967264 }
0x1593   :  { %5883 = vsyncpa [#allocation3], 1 }

</bundles_post_ra>
